<compile_context>
chip_gen: v7x
topology: tpu7x:2x2x1
jax: 0.10.0
libtpu: 0.0.40
codegen_flags: <defaults>
</compile_context>

<pallas_src>
import functools

import jax
import jax.numpy as jnp
from jax.experimental import pallas as pl


def _round_up(x, m):
    return (x + m - 1) // m * m


# ---------------------------------------------------------------------------
# One LSTM step, PyTorch gate order (i, f, g, o), gate-padded weight layout:
# gate k occupies lanes [k*gs, k*gs + hs) of the 4*gs-wide gates vector, so every
# slice below starts at a multiple of 128 lanes (vreg-aligned, no lane rotates).
# `proj` already holds x @ W_ih^T + (b_ih + b_hh); only h @ W_hh is on the chain.
# ---------------------------------------------------------------------------
def _lstm_cell(proj, h, c, w_hh_t, hs, gs):
    gates = proj + jnp.dot(h, w_hh_t, preferred_element_type=jnp.float32)
    i_g = jax.nn.sigmoid(gates[:, 0 * gs:0 * gs + hs])
    f_g = jax.nn.sigmoid(gates[:, 1 * gs:1 * gs + hs])
    g_g = jnp.tanh(gates[:, 2 * gs:2 * gs + hs])
    o_g = jax.nn.sigmoid(gates[:, 3 * gs:3 * gs + hs])
    c_new = f_g * c + i_g * g_g
    h_new = o_g * jnp.tanh(c_new)
    return h_new, c_new


# ---------------------------------------------------------------------------
# Fused decoder kernel: (weight_slab, z) -> x_hat [B, W*O] (lane-dense, batch-first).
# ---------------------------------------------------------------------------
def _decoder_kernel(slab_ref, z_ref, out_ref, *, B, W, H, O, num_layers, num_dirs,
                    gs1, gs2, layout):
    he1 = _round_up(H, 8)          # padded state width of lstm_to_hidden
    he2 = _round_up(O, 8)          # padded state width of lstm_to_output

    def block(key):
        r0, nrows, ncols = layout[key]
        return slab_ref[r0:r0 + nrows, 0:ncols]   # static, 8/128-aligned slice -> load

    z = z_ref[...]                                 # [B, Lp]

    # ---------------- lstm_to_hidden (num_layers x num_dirs) ----------------
    prev_seq = None                                # [dir][t] -> [B, he1]
    for layer in range(num_layers):
        if layer > 0:
            # Stage previous layer's hidden sequence as [W*B, he1] per direction so the
            # next input projection is ONE matmul per direction (off the recurrence).
            stacked = [jnp.concatenate(prev_seq[dd], axis=0) for dd in range(num_dirs)]
        new_seq = []
        for d in range(num_dirs):
            w_hh = block(('whh', layer, d))        # [he1, 4*gs1]
            b = block(('b', layer, d))             # [1,   4*gs1]
            if layer == 0:
                # Input is z repeated over the window -> projection constant over t
                # (hoisted: one matmul per direction instead of W).
                w_ih = block(('wih', layer, d, 0))          # [Lp, 4*gs1]
                p = jnp.dot(z, w_ih, preferred_element_type=jnp.float32) + b
                proj = [p] * W
            else:
                acc = None
                for dd in range(num_dirs):
                    w_ih = block(('wih', layer, d, dd))     # [he1, 4*gs1]
                    term = jnp.dot(stacked[dd], w_ih,
                                   preferred_element_type=jnp.float32)
                    acc = term if acc is None else acc + term
                acc = acc + b                               # [W*B, 4*gs1]
                proj = [acc[t * B:(t + 1) * B, :] for t in range(W)]
            h = jnp.zeros((B, he1), jnp.float32)
            c = jnp.zeros((B, he1), jnp.float32)
            seq = [None] * W
            # Forward walks t = 0..W-1, backward walks t = W-1..0 (no jnp.flip).
            # The two direction chains are independent -> scheduler overlaps them.
            t_order = range(W) if d == 0 else range(W - 1, -1, -1)
            for t in t_order:
                h, c = _lstm_cell(proj[t], h, c, w_hh, he1, gs1)
                seq[t] = h
            new_seq.append(seq)
        prev_seq = new_seq
    # TODO(synk): inter-layer LSTM dropout and dropout_layer are training-only (p > 0);
    # this kernel implements the eval-mode forward where both are identity.

    # ---------------- lstm_to_output (unidirectional, hidden = input_size) ----------------
    stacked = [jnp.concatenate(prev_seq[dd], axis=0) for dd in range(num_dirs)]
    w_hh2 = block('whh2')                          # [he2, 4*gs2]
    b2 = block('b2')                               # [1,   4*gs2]
    acc = None
    for dd in range(num_dirs):
        w_ih2 = block(('wih2', dd))                # [he1, 4*gs2]
        term = jnp.dot(stacked[dd], w_ih2, preferred_element_type=jnp.float32)
        acc = term if acc is None else acc + term
    proj2 = acc + b2                               # [W*B, 4*gs2]

    h = jnp.zeros((B, he2), jnp.float32)
    c = jnp.zeros((B, he2), jnp.float32)
    outs = []
    for t in range(W):
        h, c = _lstm_cell(proj2[t * B:(t + 1) * B, :], h, c, w_hh2, he2, gs2)
        outs.append(h[:, :O])                      # padded lanes (if any) are exact zeros
    # One lane-dense, batch-first store; wrapper reshape -> [B, W, O] (no transpose op).
    out_ref[...] = jnp.concatenate(outs, axis=1)   # [B, W*O]


# ---------------------------------------------------------------------------
# Parameter packing: one f32 slab, pre-transposed, gate-stride-padded to 128 lanes,
# per-direction input chunks pre-split, contraction dims padded to sublane multiples.
# Done ONCE at parameter-prep time (not per forward call).
# ---------------------------------------------------------------------------
def pack_params(params, config):
    H = config['hidden_size']
    L = config['latent_dim']
    O = config['input_size']
    num_layers = config['num_layers']
    num_dirs = 2 if config['bidirectional'] else 1

    gs1 = _round_up(H, 128)
    gs2 = _round_up(O, 128)
    he1 = _round_up(H, 8)
    he2 = _round_up(O, 8)
    Lp = _round_up(L, 8)
    C = max(4 * gs1, 4 * gs2)

    blocks, layout = [], {}
    row = 0

    def pad_gates(w_t, hs, gs):
        # [in_dim, 4*hs] -> [in_dim, 4*gs]; gate k moved to lanes [k*gs, k*gs + hs).
        out = jnp.zeros((w_t.shape[0], 4 * gs), jnp.float32)
        for k in range(4):
            out = out.at[:, k * gs:k * gs + hs].set(w_t[:, k * hs:(k + 1) * hs])
        return out

    def pad_rows(mat, n):
        return jnp.zeros((n, mat.shape[1]), jnp.float32).at[:mat.shape[0], :].set(mat)

    def add(key, mat):
        nonlocal row
        r, c = mat.shape
        pr = _round_up(r, 8)                      # keep every block 8-sublane aligned
        blocks.append(jnp.zeros((pr, C), jnp.float32).at[:r, :c].set(mat))
        layout[key] = (row, r, c)
        row += pr

    for layer in range(num_layers):
        for d in range(num_dirs):
            p = params['lstm1'][(layer, d)]
            w_ih_t = pad_gates(p['w_ih'].T, H, gs1)              # [in_dim, 4*gs1]
            w_hh_t = pad_gates(p['w_hh'].T, H, gs1)              # [H, 4*gs1]
            bias = pad_gates((p['b_ih'] + p['b_hh'])[None, :], H, gs1)
            if layer == 0:
                add(('wih', layer, d, 0), pad_rows(w_ih_t, Lp))
            else:
                for dd in range(num_dirs):                       # per-direction chunks
                    add(('wih', layer, d, dd),
                        pad_rows(w_ih_t[dd * H:(dd + 1) * H, :], he1))
            add(('whh', layer, d), pad_rows(w_hh_t, he1))
            add(('b', layer, d), bias)

    p = params['lstm2']
    w_ih2_t = pad_gates(p['w_ih'].T, O, gs2)                     # [num_dirs*H, 4*gs2]
    for dd in range(num_dirs):
        add(('wih2', dd), pad_rows(w_ih2_t[dd * H:(dd + 1) * H, :], he1))
    add('whh2', pad_rows(pad_gates(p['w_hh'].T, O, gs2), he2))
    add('b2', pad_gates((p['b_ih'] + p['b_hh'])[None, :], O, gs2))

    slab = jnp.concatenate(blocks, axis=0)                       # [rows, C] f32
    meta = {'layout': layout, 'gs1': gs1, 'gs2': gs2, 'Lp': Lp}
    return slab, meta


# ---------------------------------------------------------------------------
# Wrapper: one fused pallas_call (two inputs: slab + z), free reshape to [B, W, O].
# ---------------------------------------------------------------------------
def decoder_forward(z, slab, meta, config):
    """z: [B, latent_dim] -> x_hat: [B, window_size, input_size] (eval mode)."""
    B = z.shape[0]
    W = config['window_size']
    H = config['hidden_size']
    O = config['input_size']
    L = config['latent_dim']
    num_layers = config['num_layers']
    num_dirs = 2 if config['bidirectional'] else 1
    gs1, gs2, Lp = meta['gs1'], meta['gs2'], meta['Lp']

    z_p = jnp.zeros((B, Lp), jnp.float32).at[:, :L].set(z.astype(jnp.float32))

    kernel = functools.partial(
        _decoder_kernel, B=B, W=W, H=H, O=O, num_layers=num_layers,
        num_dirs=num_dirs, gs1=gs1, gs2=gs2, layout=meta['layout'])

    # Advisory cost estimate so XLA schedules neighbours well around this micro-kernel.
    flops = 0
    for layer in range(num_layers):
        per_dir = (2 * B * Lp * 4 * gs1 if layer == 0
                   else num_dirs * 2 * W * B * H * 4 * gs1)
        per_dir += W * 2 * B * H * 4 * gs1
        flops += num_dirs * per_dir
    flops += num_dirs * 2 * W * B * H * 4 * gs2 + W * 2 * B * O * 4 * gs2
    trans = num_layers * num_dirs * W * 5 * B * H + W * 5 * B * O
    bytes_accessed = (slab.size + z_p.size + B * W * O) * 4

    out = pl.pallas_call(
        kernel,
        out_shape=jax.ShapeDtypeStruct((B, W * O), jnp.float32),
        cost_estimate=pl.CostEstimate(flops=int(flops), transcendentals=int(trans),
                                      bytes_accessed=int(bytes_accessed)),
    )(slab, z_p)
    return out.reshape(B, W, O)                    # metadata-only reshape, batch-first


# ---------------------------------------------------------------------------
# Deterministic PyTorch-style init (uniform(-1/sqrt(hidden), 1/sqrt(hidden))),
# natural nn.LSTM layout (used directly by the pure-JAX reference).
# ---------------------------------------------------------------------------
def init_params(key, config):
    H = config['hidden_size']
    L = config['latent_dim']
    O = config['input_size']
    num_layers = config['num_layers']
    num_dirs = 2 if config['bidirectional'] else 1

    def uni(k, shape, bound):
        return jax.random.uniform(k, shape, jnp.float32, -bound, bound)

    params = {'lstm1': {}}
    bnd1 = 1.0 / (H ** 0.5)
    for layer in range(num_layers):
        in_dim = L if layer == 0 else num_dirs * H
        for d in range(num_dirs):
            key, k1, k2, k3, k4 = jax.random.split(key, 5)
            params['lstm1'][(layer, d)] = {
                'w_ih': uni(k1, (4 * H, in_dim), bnd1),
                'w_hh': uni(k2, (4 * H, H), bnd1),
                'b_ih': uni(k3, (4 * H,), bnd1),
                'b_hh': uni(k4, (4 * H,), bnd1),
            }
    bnd2 = 1.0 / (O ** 0.5)
    key, k1, k2, k3, k4 = jax.random.split(key, 5)
    params['lstm2'] = {
        'w_ih': uni(k1, (4 * O, num_dirs * H), bnd2),
        'w_hh': uni(k2, (4 * O, O), bnd2),
        'b_ih': uni(k3, (4 * O,), bnd2),
        'b_hh': uni(k4, (4 * O,), bnd2),
    }
    return params


# ---------------------------------------------------------------------------
# Pure-JAX reference (PyTorch semantics, highest matmul precision).
# ---------------------------------------------------------------------------
def _ref_cell(x, h, c, w_ih, w_hh, b, hs):
    hp = jax.lax.Precision.HIGHEST
    gates = (jnp.dot(x, w_ih.T, precision=hp) + jnp.dot(h, w_hh.T, precision=hp) + b)
    i_g = jax.nn.sigmoid(gates[:, 0 * hs:1 * hs])
    f_g = jax.nn.sigmoid(gates[:, 1 * hs:2 * hs])
    g_g = jnp.tanh(gates[:, 2 * hs:3 * hs])
    o_g = jax.nn.sigmoid(gates[:, 3 * hs:4 * hs])
    c = f_g * c + i_g * g_g
    h = o_g * jnp.tanh(c)
    return h, c


def decoder_reference(z, params, config):
    B = z.shape[0]
    W = config['window_size']
    H = config['hidden_size']
    O = config['input_size']
    num_layers = config['num_layers']
    num_dirs = 2 if config['bidirectional'] else 1

    x = jnp.broadcast_to(z[:, None, :], (B, W, z.shape[1]))      # repeat z over window
    for layer in range(num_layers):
        outs = []
        for d in range(num_dirs):
            p = params['lstm1'][(layer, d)]
            b = p['b_ih'] + p['b_hh']
            h = jnp.zeros((B, H), jnp.float32)
            c = jnp.zeros((B, H), jnp.float32)
            seq = [None] * W
            order = range(W) if d == 0 else range(W - 1, -1, -1)
            for t in order:
                h, c = _ref_cell(x[:, t, :], h, c, p['w_ih'], p['w_hh'], b, H)
                seq[t] = h
            outs.append(jnp.stack(seq, axis=1))
        x = jnp.concatenate(outs, axis=-1)

    p = params['lstm2']
    b = p['b_ih'] + p['b_hh']
    h = jnp.zeros((B, O), jnp.float32)
    c = jnp.zeros((B, O), jnp.float32)
    seq = [None] * W
    for t in range(W):
        h, c = _ref_cell(x[:, t, :], h, c, p['w_ih'], p['w_hh'], b, O)
        seq[t] = h
    return jnp.stack(seq, axis=1)


def _run_and_check(config, B, seed):
    key = jax.random.PRNGKey(seed)
    k_z, k_p = jax.random.split(key)
    z = jax.random.normal(k_z, (B, config['latent_dim']), jnp.float32)
    params = init_params(k_p, config)
    slab, meta = pack_params(params, config)

    x_hat = decoder_forward(z, slab, meta, config)
    jax.block_until_ready(x_hat)
    assert x_hat.shape == (B, config['window_size'], config['input_size'])

    x_ref = decoder_reference(z, params, config)
    err = float(jnp.max(jnp.abs(x_hat - x_ref)))
    assert jnp.allclose(x_hat, x_ref, atol=1e-3, rtol=1e-3), err


if __name__ == "__main__":
    # Main config (typical DTE decoder setup): B=2, latent=2, hidden=32, window=8, out=4.
    config = {
        'input_size': 4,
        'hidden_size': 32,
        'latent_dim': 2,
        'num_layers': 1,
        'bidirectional': True,
        'window_size': 8,
        'dropout_lstm_decoder': 0.0,
        'dropout_layer_decoder': 0.0,
    }
    _run_and_check(config, B=2, seed=0)

    # Also exercise the multi-layer / unidirectional code path.
    config2 = dict(config, num_layers=2, bidirectional=False, window_size=5)
    _run_and_check(config2, B=3, seed=0)

    print("KERNEL_OK")
</pallas_src>

<mosaic_0001>
module attributes {stable_mosaic.version = 11 : i64} {
  func.func @_decoder_kernel(%arg0: memref<176x512xf32, #tpu.memory_space<vmem>>, %arg1: memref<2x8xf32, #tpu.memory_space<vmem>>, %arg2: memref<2x32xf32, #tpu.memory_space<vmem>>) attributes {dimension_semantics = [], scalar_prefetch = 0 : i64, scratch_operands = 0 : i64, tpu.core_type = #tpu.core_type<tc>} {
    %c0 = arith.constant 0 : index
    %c0_0 = arith.constant 0 : index
    %0 = vector.load %arg1[%c0, %c0_0] : memref<2x8xf32, #tpu.memory_space<vmem>>, vector<2x8xf32>
    %c8 = arith.constant 8 : index
    %c0_1 = arith.constant 0 : index
    %1 = vector.load %arg0[%c8, %c0_1] : memref<176x512xf32, #tpu.memory_space<vmem>>, vector<32x512xf32>
    %c40 = arith.constant 40 : index
    %c0_2 = arith.constant 0 : index
    %2 = vector.load %arg0[%c40, %c0_2] : memref<176x512xf32, #tpu.memory_space<vmem>>, vector<1x512xf32>
    %c0_3 = arith.constant 0 : index
    %c0_4 = arith.constant 0 : index
    %3 = vector.load %arg0[%c0_3, %c0_4] : memref<176x512xf32, #tpu.memory_space<vmem>>, vector<8x512xf32>
    %cst = arith.constant dense<0.000000e+00> : vector<2x512xf32>
    %4 = tpu.matmul %0, %3, %cst {dimension_numbers = #tpu.dot_dimension_numbers<[1], [0], [0], [1], [0, 0, 1, 1], [], []>} : vector<2x8xf32>, vector<8x512xf32>, vector<2x512xf32> -> vector<2x512xf32>
    %5 = vector.broadcast %2 : vector<1x512xf32> to vector<2x512xf32>
    %6 = arith.addf %4, %5 : vector<2x512xf32>
    %cst_5 = arith.constant 0.000000e+00 : f32
    %7 = vector.broadcast %cst_5 : f32 to vector<2x32xf32>
    %cst_6 = arith.constant 0.000000e+00 : f32
    %8 = vector.broadcast %cst_6 : f32 to vector<2x32xf32>
    %cst_7 = arith.constant dense<0.000000e+00> : vector<2x512xf32>
    %9 = tpu.matmul %7, %1, %cst_7 {dimension_numbers = #tpu.dot_dimension_numbers<[1], [0], [0], [1], [0, 0, 1, 1], [], []>} : vector<2x32xf32>, vector<32x512xf32>, vector<2x512xf32> -> vector<2x512xf32>
    %10 = arith.addf %6, %9 : vector<2x512xf32>
    %11 = vector.extract_strided_slice %10 {offsets = [0, 0], sizes = [2, 32], strides = [1, 1]} : vector<2x512xf32> to vector<2x32xf32>
    %12 = arith.negf %11 : vector<2x32xf32>
    %13 = math.exp %12 : vector<2x32xf32>
    %cst_8 = arith.constant 1.000000e+00 : f32
    %14 = vector.broadcast %cst_8 : f32 to vector<2x32xf32>
    %15 = arith.addf %14, %13 : vector<2x32xf32>
    %16 = arith.divf %14, %15 : vector<2x32xf32>
    %17 = vector.extract_strided_slice %10 {offsets = [0, 128], sizes = [2, 32], strides = [1, 1]} : vector<2x512xf32> to vector<2x32xf32>
    %18 = arith.negf %17 : vector<2x32xf32>
    %19 = math.exp %18 : vector<2x32xf32>
    %cst_9 = arith.constant 1.000000e+00 : f32
    %20 = vector.broadcast %cst_9 : f32 to vector<2x32xf32>
    %21 = arith.addf %20, %19 : vector<2x32xf32>
    %22 = arith.divf %20, %21 : vector<2x32xf32>
    %23 = vector.extract_strided_slice %10 {offsets = [0, 256], sizes = [2, 32], strides = [1, 1]} : vector<2x512xf32> to vector<2x32xf32>
    %24 = math.tanh %23 : vector<2x32xf32>
    %25 = vector.extract_strided_slice %10 {offsets = [0, 384], sizes = [2, 32], strides = [1, 1]} : vector<2x512xf32> to vector<2x32xf32>
    %26 = arith.negf %25 : vector<2x32xf32>
    %27 = math.exp %26 : vector<2x32xf32>
    %cst_10 = arith.constant 1.000000e+00 : f32
    %28 = vector.broadcast %cst_10 : f32 to vector<2x32xf32>
    %29 = arith.addf %28, %27 : vector<2x32xf32>
    %30 = arith.divf %28, %29 : vector<2x32xf32>
    %31 = arith.mulf %22, %8 : vector<2x32xf32>
    %32 = arith.mulf %16, %24 : vector<2x32xf32>
    %33 = arith.addf %31, %32 : vector<2x32xf32>
    %34 = math.tanh %33 : vector<2x32xf32>
    %35 = arith.mulf %30, %34 : vector<2x32xf32>
    %cst_11 = arith.constant dense<0.000000e+00> : vector<2x512xf32>
    %36 = tpu.matmul %35, %1, %cst_11 {dimension_numbers = #tpu.dot_dimension_numbers<[1], [0], [0], [1], [0, 0, 1, 1], [], []>} : vector<2x32xf32>, vector<32x512xf32>, vector<2x512xf32> -> vector<2x512xf32>
    %37 = arith.addf %6, %36 : vector<2x512xf32>
    %38 = vector.extract_strided_slice %37 {offsets = [0, 0], sizes = [2, 32], strides = [1, 1]} : vector<2x512xf32> to vector<2x32xf32>
    %39 = arith.negf %38 : vector<2x32xf32>
    %40 = math.exp %39 : vector<2x32xf32>
    %cst_12 = arith.constant 1.000000e+00 : f32
    %41 = vector.broadcast %cst_12 : f32 to vector<2x32xf32>
    %42 = arith.addf %41, %40 : vector<2x32xf32>
    %43 = arith.divf %41, %42 : vector<2x32xf32>
    %44 = vector.extract_strided_slice %37 {offsets = [0, 128], sizes = [2, 32], strides = [1, 1]} : vector<2x512xf32> to vector<2x32xf32>
    %45 = arith.negf %44 : vector<2x32xf32>
    %46 = math.exp %45 : vector<2x32xf32>
    %cst_13 = arith.constant 1.000000e+00 : f32
    %47 = vector.broadcast %cst_13 : f32 to vector<2x32xf32>
    %48 = arith.addf %47, %46 : vector<2x32xf32>
    %49 = arith.divf %47, %48 : vector<2x32xf32>
    %50 = vector.extract_strided_slice %37 {offsets = [0, 256], sizes = [2, 32], strides = [1, 1]} : vector<2x512xf32> to vector<2x32xf32>
    %51 = math.tanh %50 : vector<2x32xf32>
    %52 = vector.extract_strided_slice %37 {offsets = [0, 384], sizes = [2, 32], strides = [1, 1]} : vector<2x512xf32> to vector<2x32xf32>
    %53 = arith.negf %52 : vector<2x32xf32>
    %54 = math.exp %53 : vector<2x32xf32>
    %cst_14 = arith.constant 1.000000e+00 : f32
    %55 = vector.broadcast %cst_14 : f32 to vector<2x32xf32>
    %56 = arith.addf %55, %54 : vector<2x32xf32>
    %57 = arith.divf %55, %56 : vector<2x32xf32>
    %58 = arith.mulf %49, %33 : vector<2x32xf32>
    %59 = arith.mulf %43, %51 : vector<2x32xf32>
    %60 = arith.addf %58, %59 : vector<2x32xf32>
    %61 = math.tanh %60 : vector<2x32xf32>
    %62 = arith.mulf %57, %61 : vector<2x32xf32>
    %cst_15 = arith.constant dense<0.000000e+00> : vector<2x512xf32>
    %63 = tpu.matmul %62, %1, %cst_15 {dimension_numbers = #tpu.dot_dimension_numbers<[1], [0], [0], [1], [0, 0, 1, 1], [], []>} : vector<2x32xf32>, vector<32x512xf32>, vector<2x512xf32> -> vector<2x512xf32>
    %64 = arith.addf %6, %63 : vector<2x512xf32>
    %65 = vector.extract_strided_slice %64 {offsets = [0, 0], sizes = [2, 32], strides = [1, 1]} : vector<2x512xf32> to vector<2x32xf32>
    %66 = arith.negf %65 : vector<2x32xf32>
    %67 = math.exp %66 : vector<2x32xf32>
    %cst_16 = arith.constant 1.000000e+00 : f32
    %68 = vector.broadcast %cst_16 : f32 to vector<2x32xf32>
    %69 = arith.addf %68, %67 : vector<2x32xf32>
    %70 = arith.divf %68, %69 : vector<2x32xf32>
    %71 = vector.extract_strided_slice %64 {offsets = [0, 128], sizes = [2, 32], strides = [1, 1]} : vector<2x512xf32> to vector<2x32xf32>
    %72 = arith.negf %71 : vector<2x32xf32>
    %73 = math.exp %72 : vector<2x32xf32>
    %cst_17 = arith.constant 1.000000e+00 : f32
    %74 = vector.broadcast %cst_17 : f32 to vector<2x32xf32>
    %75 = arith.addf %74, %73 : vector<2x32xf32>
    %76 = arith.divf %74, %75 : vector<2x32xf32>
    %77 = vector.extract_strided_slice %64 {offsets = [0, 256], sizes = [2, 32], strides = [1, 1]} : vector<2x512xf32> to vector<2x32xf32>
    %78 = math.tanh %77 : vector<2x32xf32>
    %79 = vector.extract_strided_slice %64 {offsets = [0, 384], sizes = [2, 32], strides = [1, 1]} : vector<2x512xf32> to vector<2x32xf32>
    %80 = arith.negf %79 : vector<2x32xf32>
    %81 = math.exp %80 : vector<2x32xf32>
    %cst_18 = arith.constant 1.000000e+00 : f32
    %82 = vector.broadcast %cst_18 : f32 to vector<2x32xf32>
    %83 = arith.addf %82, %81 : vector<2x32xf32>
    %84 = arith.divf %82, %83 : vector<2x32xf32>
    %85 = arith.mulf %76, %60 : vector<2x32xf32>
    %86 = arith.mulf %70, %78 : vector<2x32xf32>
    %87 = arith.addf %85, %86 : vector<2x32xf32>
    %88 = math.tanh %87 : vector<2x32xf32>
    %89 = arith.mulf %84, %88 : vector<2x32xf32>
    %cst_19 = arith.constant dense<0.000000e+00> : vector<2x512xf32>
    %90 = tpu.matmul %89, %1, %cst_19 {dimension_numbers = #tpu.dot_dimension_numbers<[1], [0], [0], [1], [0, 0, 1, 1], [], []>} : vector<2x32xf32>, vector<32x512xf32>, vector<2x512xf32> -> vector<2x512xf32>
    %91 = arith.addf %6, %90 : vector<2x512xf32>
    %92 = vector.extract_strided_slice %91 {offsets = [0, 0], sizes = [2, 32], strides = [1, 1]} : vector<2x512xf32> to vector<2x32xf32>
    %93 = arith.negf %92 : vector<2x32xf32>
    %94 = math.exp %93 : vector<2x32xf32>
    %cst_20 = arith.constant 1.000000e+00 : f32
    %95 = vector.broadcast %cst_20 : f32 to vector<2x32xf32>
    %96 = arith.addf %95, %94 : vector<2x32xf32>
    %97 = arith.divf %95, %96 : vector<2x32xf32>
    %98 = vector.extract_strided_slice %91 {offsets = [0, 128], sizes = [2, 32], strides = [1, 1]} : vector<2x512xf32> to vector<2x32xf32>
    %99 = arith.negf %98 : vector<2x32xf32>
    %100 = math.exp %99 : vector<2x32xf32>
    %cst_21 = arith.constant 1.000000e+00 : f32
    %101 = vector.broadcast %cst_21 : f32 to vector<2x32xf32>
    %102 = arith.addf %101, %100 : vector<2x32xf32>
    %103 = arith.divf %101, %102 : vector<2x32xf32>
    %104 = vector.extract_strided_slice %91 {offsets = [0, 256], sizes = [2, 32], strides = [1, 1]} : vector<2x512xf32> to vector<2x32xf32>
    %105 = math.tanh %104 : vector<2x32xf32>
    %106 = vector.extract_strided_slice %91 {offsets = [0, 384], sizes = [2, 32], strides = [1, 1]} : vector<2x512xf32> to vector<2x32xf32>
    %107 = arith.negf %106 : vector<2x32xf32>
    %108 = math.exp %107 : vector<2x32xf32>
    %cst_22 = arith.constant 1.000000e+00 : f32
    %109 = vector.broadcast %cst_22 : f32 to vector<2x32xf32>
    %110 = arith.addf %109, %108 : vector<2x32xf32>
    %111 = arith.divf %109, %110 : vector<2x32xf32>
    %112 = arith.mulf %103, %87 : vector<2x32xf32>
    %113 = arith.mulf %97, %105 : vector<2x32xf32>
    %114 = arith.addf %112, %113 : vector<2x32xf32>
    %115 = math.tanh %114 : vector<2x32xf32>
    %116 = arith.mulf %111, %115 : vector<2x32xf32>
    %cst_23 = arith.constant dense<0.000000e+00> : vector<2x512xf32>
    %117 = tpu.matmul %116, %1, %cst_23 {dimension_numbers = #tpu.dot_dimension_numbers<[1], [0], [0], [1], [0, 0, 1, 1], [], []>} : vector<2x32xf32>, vector<32x512xf32>, vector<2x512xf32> -> vector<2x512xf32>
    %118 = arith.addf %6, %117 : vector<2x512xf32>
    %119 = vector.extract_strided_slice %118 {offsets = [0, 0], sizes = [2, 32], strides = [1, 1]} : vector<2x512xf32> to vector<2x32xf32>
    %120 = arith.negf %119 : vector<2x32xf32>
    %121 = math.exp %120 : vector<2x32xf32>
    %cst_24 = arith.constant 1.000000e+00 : f32
    %122 = vector.broadcast %cst_24 : f32 to vector<2x32xf32>
    %123 = arith.addf %122, %121 : vector<2x32xf32>
    %124 = arith.divf %122, %123 : vector<2x32xf32>
    %125 = vector.extract_strided_slice %118 {offsets = [0, 128], sizes = [2, 32], strides = [1, 1]} : vector<2x512xf32> to vector<2x32xf32>
    %126 = arith.negf %125 : vector<2x32xf32>
    %127 = math.exp %126 : vector<2x32xf32>
    %cst_25 = arith.constant 1.000000e+00 : f32
    %128 = vector.broadcast %cst_25 : f32 to vector<2x32xf32>
    %129 = arith.addf %128, %127 : vector<2x32xf32>
    %130 = arith.divf %128, %129 : vector<2x32xf32>
    %131 = vector.extract_strided_slice %118 {offsets = [0, 256], sizes = [2, 32], strides = [1, 1]} : vector<2x512xf32> to vector<2x32xf32>
    %132 = math.tanh %131 : vector<2x32xf32>
    %133 = vector.extract_strided_slice %118 {offsets = [0, 384], sizes = [2, 32], strides = [1, 1]} : vector<2x512xf32> to vector<2x32xf32>
    %134 = arith.negf %133 : vector<2x32xf32>
    %135 = math.exp %134 : vector<2x32xf32>
    %cst_26 = arith.constant 1.000000e+00 : f32
    %136 = vector.broadcast %cst_26 : f32 to vector<2x32xf32>
    %137 = arith.addf %136, %135 : vector<2x32xf32>
    %138 = arith.divf %136, %137 : vector<2x32xf32>
    %139 = arith.mulf %130, %114 : vector<2x32xf32>
    %140 = arith.mulf %124, %132 : vector<2x32xf32>
    %141 = arith.addf %139, %140 : vector<2x32xf32>
    %142 = math.tanh %141 : vector<2x32xf32>
    %143 = arith.mulf %138, %142 : vector<2x32xf32>
    %cst_27 = arith.constant dense<0.000000e+00> : vector<2x512xf32>
    %144 = tpu.matmul %143, %1, %cst_27 {dimension_numbers = #tpu.dot_dimension_numbers<[1], [0], [0], [1], [0, 0, 1, 1], [], []>} : vector<2x32xf32>, vector<32x512xf32>, vector<2x512xf32> -> vector<2x512xf32>
    %145 = arith.addf %6, %144 : vector<2x512xf32>
    %146 = vector.extract_strided_slice %145 {offsets = [0, 0], sizes = [2, 32], strides = [1, 1]} : vector<2x512xf32> to vector<2x32xf32>
    %147 = arith.negf %146 : vector<2x32xf32>
    %148 = math.exp %147 : vector<2x32xf32>
    %cst_28 = arith.constant 1.000000e+00 : f32
    %149 = vector.broadcast %cst_28 : f32 to vector<2x32xf32>
    %150 = arith.addf %149, %148 : vector<2x32xf32>
    %151 = arith.divf %149, %150 : vector<2x32xf32>
    %152 = vector.extract_strided_slice %145 {offsets = [0, 128], sizes = [2, 32], strides = [1, 1]} : vector<2x512xf32> to vector<2x32xf32>
    %153 = arith.negf %152 : vector<2x32xf32>
    %154 = math.exp %153 : vector<2x32xf32>
    %cst_29 = arith.constant 1.000000e+00 : f32
    %155 = vector.broadcast %cst_29 : f32 to vector<2x32xf32>
    %156 = arith.addf %155, %154 : vector<2x32xf32>
    %157 = arith.divf %155, %156 : vector<2x32xf32>
    %158 = vector.extract_strided_slice %145 {offsets = [0, 256], sizes = [2, 32], strides = [1, 1]} : vector<2x512xf32> to vector<2x32xf32>
    %159 = math.tanh %158 : vector<2x32xf32>
    %160 = vector.extract_strided_slice %145 {offsets = [0, 384], sizes = [2, 32], strides = [1, 1]} : vector<2x512xf32> to vector<2x32xf32>
    %161 = arith.negf %160 : vector<2x32xf32>
    %162 = math.exp %161 : vector<2x32xf32>
    %cst_30 = arith.constant 1.000000e+00 : f32
    %163 = vector.broadcast %cst_30 : f32 to vector<2x32xf32>
    %164 = arith.addf %163, %162 : vector<2x32xf32>
    %165 = arith.divf %163, %164 : vector<2x32xf32>
    %166 = arith.mulf %157, %141 : vector<2x32xf32>
    %167 = arith.mulf %151, %159 : vector<2x32xf32>
    %168 = arith.addf %166, %167 : vector<2x32xf32>
    %169 = math.tanh %168 : vector<2x32xf32>
    %170 = arith.mulf %165, %169 : vector<2x32xf32>
    %cst_31 = arith.constant dense<0.000000e+00> : vector<2x512xf32>
    %171 = tpu.matmul %170, %1, %cst_31 {dimension_numbers = #tpu.dot_dimension_numbers<[1], [0], [0], [1], [0, 0, 1, 1], [], []>} : vector<2x32xf32>, vector<32x512xf32>, vector<2x512xf32> -> vector<2x512xf32>
    %172 = arith.addf %6, %171 : vector<2x512xf32>
    %173 = vector.extract_strided_slice %172 {offsets = [0, 0], sizes = [2, 32], strides = [1, 1]} : vector<2x512xf32> to vector<2x32xf32>
    %174 = arith.negf %173 : vector<2x32xf32>
    %175 = math.exp %174 : vector<2x32xf32>
    %cst_32 = arith.constant 1.000000e+00 : f32
    %176 = vector.broadcast %cst_32 : f32 to vector<2x32xf32>
    %177 = arith.addf %176, %175 : vector<2x32xf32>
    %178 = arith.divf %176, %177 : vector<2x32xf32>
    %179 = vector.extract_strided_slice %172 {offsets = [0, 128], sizes = [2, 32], strides = [1, 1]} : vector<2x512xf32> to vector<2x32xf32>
    %180 = arith.negf %179 : vector<2x32xf32>
    %181 = math.exp %180 : vector<2x32xf32>
    %cst_33 = arith.constant 1.000000e+00 : f32
    %182 = vector.broadcast %cst_33 : f32 to vector<2x32xf32>
    %183 = arith.addf %182, %181 : vector<2x32xf32>
    %184 = arith.divf %182, %183 : vector<2x32xf32>
    %185 = vector.extract_strided_slice %172 {offsets = [0, 256], sizes = [2, 32], strides = [1, 1]} : vector<2x512xf32> to vector<2x32xf32>
    %186 = math.tanh %185 : vector<2x32xf32>
    %187 = vector.extract_strided_slice %172 {offsets = [0, 384], sizes = [2, 32], strides = [1, 1]} : vector<2x512xf32> to vector<2x32xf32>
    %188 = arith.negf %187 : vector<2x32xf32>
    %189 = math.exp %188 : vector<2x32xf32>
    %cst_34 = arith.constant 1.000000e+00 : f32
    %190 = vector.broadcast %cst_34 : f32 to vector<2x32xf32>
    %191 = arith.addf %190, %189 : vector<2x32xf32>
    %192 = arith.divf %190, %191 : vector<2x32xf32>
    %193 = arith.mulf %184, %168 : vector<2x32xf32>
    %194 = arith.mulf %178, %186 : vector<2x32xf32>
    %195 = arith.addf %193, %194 : vector<2x32xf32>
    %196 = math.tanh %195 : vector<2x32xf32>
    %197 = arith.mulf %192, %196 : vector<2x32xf32>
    %cst_35 = arith.constant dense<0.000000e+00> : vector<2x512xf32>
    %198 = tpu.matmul %197, %1, %cst_35 {dimension_numbers = #tpu.dot_dimension_numbers<[1], [0], [0], [1], [0, 0, 1, 1], [], []>} : vector<2x32xf32>, vector<32x512xf32>, vector<2x512xf32> -> vector<2x512xf32>
    %199 = arith.addf %6, %198 : vector<2x512xf32>
    %200 = vector.extract_strided_slice %199 {offsets = [0, 0], sizes = [2, 32], strides = [1, 1]} : vector<2x512xf32> to vector<2x32xf32>
    %201 = arith.negf %200 : vector<2x32xf32>
    %202 = math.exp %201 : vector<2x32xf32>
    %cst_36 = arith.constant 1.000000e+00 : f32
    %203 = vector.broadcast %cst_36 : f32 to vector<2x32xf32>
    %204 = arith.addf %203, %202 : vector<2x32xf32>
    %205 = arith.divf %203, %204 : vector<2x32xf32>
    %206 = vector.extract_strided_slice %199 {offsets = [0, 128], sizes = [2, 32], strides = [1, 1]} : vector<2x512xf32> to vector<2x32xf32>
    %207 = arith.negf %206 : vector<2x32xf32>
    %208 = math.exp %207 : vector<2x32xf32>
    %cst_37 = arith.constant 1.000000e+00 : f32
    %209 = vector.broadcast %cst_37 : f32 to vector<2x32xf32>
    %210 = arith.addf %209, %208 : vector<2x32xf32>
    %211 = arith.divf %209, %210 : vector<2x32xf32>
    %212 = vector.extract_strided_slice %199 {offsets = [0, 256], sizes = [2, 32], strides = [1, 1]} : vector<2x512xf32> to vector<2x32xf32>
    %213 = math.tanh %212 : vector<2x32xf32>
    %214 = vector.extract_strided_slice %199 {offsets = [0, 384], sizes = [2, 32], strides = [1, 1]} : vector<2x512xf32> to vector<2x32xf32>
    %215 = arith.negf %214 : vector<2x32xf32>
    %216 = math.exp %215 : vector<2x32xf32>
    %cst_38 = arith.constant 1.000000e+00 : f32
    %217 = vector.broadcast %cst_38 : f32 to vector<2x32xf32>
    %218 = arith.addf %217, %216 : vector<2x32xf32>
    %219 = arith.divf %217, %218 : vector<2x32xf32>
    %220 = arith.mulf %211, %195 : vector<2x32xf32>
    %221 = arith.mulf %205, %213 : vector<2x32xf32>
    %222 = arith.addf %220, %221 : vector<2x32xf32>
    %223 = math.tanh %222 : vector<2x32xf32>
    %224 = arith.mulf %219, %223 : vector<2x32xf32>
    %c56 = arith.constant 56 : index
    %c0_39 = arith.constant 0 : index
    %225 = vector.load %arg0[%c56, %c0_39] : memref<176x512xf32, #tpu.memory_space<vmem>>, vector<32x512xf32>
    %c88 = arith.constant 88 : index
    %c0_40 = arith.constant 0 : index
    %226 = vector.load %arg0[%c88, %c0_40] : memref<176x512xf32, #tpu.memory_space<vmem>>, vector<1x512xf32>
    %c48 = arith.constant 48 : index
    %c0_41 = arith.constant 0 : index
    %227 = vector.load %arg0[%c48, %c0_41] : memref<176x512xf32, #tpu.memory_space<vmem>>, vector<8x512xf32>
    %cst_42 = arith.constant dense<0.000000e+00> : vector<2x512xf32>
    %228 = tpu.matmul %0, %227, %cst_42 {dimension_numbers = #tpu.dot_dimension_numbers<[1], [0], [0], [1], [0, 0, 1, 1], [], []>} : vector<2x8xf32>, vector<8x512xf32>, vector<2x512xf32> -> vector<2x512xf32>
    %229 = vector.broadcast %226 : vector<1x512xf32> to vector<2x512xf32>
    %230 = arith.addf %228, %229 : vector<2x512xf32>
    %cst_43 = arith.constant 0.000000e+00 : f32
    %231 = vector.broadcast %cst_43 : f32 to vector<2x32xf32>
    %cst_44 = arith.constant 0.000000e+00 : f32
    %232 = vector.broadcast %cst_44 : f32 to vector<2x32xf32>
    %cst_45 = arith.constant dense<0.000000e+00> : vector<2x512xf32>
    %233 = tpu.matmul %231, %225, %cst_45 {dimension_numbers = #tpu.dot_dimension_numbers<[1], [0], [0], [1], [0, 0, 1, 1], [], []>} : vector<2x32xf32>, vector<32x512xf32>, vector<2x512xf32> -> vector<2x512xf32>
    %234 = arith.addf %230, %233 : vector<2x512xf32>
    %235 = vector.extract_strided_slice %234 {offsets = [0, 0], sizes = [2, 32], strides = [1, 1]} : vector<2x512xf32> to vector<2x32xf32>
    %236 = arith.negf %235 : vector<2x32xf32>
    %237 = math.exp %236 : vector<2x32xf32>
    %cst_46 = arith.constant 1.000000e+00 : f32
    %238 = vector.broadcast %cst_46 : f32 to vector<2x32xf32>
    %239 = arith.addf %238, %237 : vector<2x32xf32>
    %240 = arith.divf %238, %239 : vector<2x32xf32>
    %241 = vector.extract_strided_slice %234 {offsets = [0, 128], sizes = [2, 32], strides = [1, 1]} : vector<2x512xf32> to vector<2x32xf32>
    %242 = arith.negf %241 : vector<2x32xf32>
    %243 = math.exp %242 : vector<2x32xf32>
    %cst_47 = arith.constant 1.000000e+00 : f32
    %244 = vector.broadcast %cst_47 : f32 to vector<2x32xf32>
    %245 = arith.addf %244, %243 : vector<2x32xf32>
    %246 = arith.divf %244, %245 : vector<2x32xf32>
    %247 = vector.extract_strided_slice %234 {offsets = [0, 256], sizes = [2, 32], strides = [1, 1]} : vector<2x512xf32> to vector<2x32xf32>
    %248 = math.tanh %247 : vector<2x32xf32>
    %249 = vector.extract_strided_slice %234 {offsets = [0, 384], sizes = [2, 32], strides = [1, 1]} : vector<2x512xf32> to vector<2x32xf32>
    %250 = arith.negf %249 : vector<2x32xf32>
    %251 = math.exp %250 : vector<2x32xf32>
    %cst_48 = arith.constant 1.000000e+00 : f32
    %252 = vector.broadcast %cst_48 : f32 to vector<2x32xf32>
    %253 = arith.addf %252, %251 : vector<2x32xf32>
    %254 = arith.divf %252, %253 : vector<2x32xf32>
    %255 = arith.mulf %246, %232 : vector<2x32xf32>
    %256 = arith.mulf %240, %248 : vector<2x32xf32>
    %257 = arith.addf %255, %256 : vector<2x32xf32>
    %258 = math.tanh %257 : vector<2x32xf32>
    %259 = arith.mulf %254, %258 : vector<2x32xf32>
    %cst_49 = arith.constant dense<0.000000e+00> : vector<2x512xf32>
    %260 = tpu.matmul %259, %225, %cst_49 {dimension_numbers = #tpu.dot_dimension_numbers<[1], [0], [0], [1], [0, 0, 1, 1], [], []>} : vector<2x32xf32>, vector<32x512xf32>, vector<2x512xf32> -> vector<2x512xf32>
    %261 = arith.addf %230, %260 : vector<2x512xf32>
    %262 = vector.extract_strided_slice %261 {offsets = [0, 0], sizes = [2, 32], strides = [1, 1]} : vector<2x512xf32> to vector<2x32xf32>
    %263 = arith.negf %262 : vector<2x32xf32>
    %264 = math.exp %263 : vector<2x32xf32>
    %cst_50 = arith.constant 1.000000e+00 : f32
    %265 = vector.broadcast %cst_50 : f32 to vector<2x32xf32>
    %266 = arith.addf %265, %264 : vector<2x32xf32>
    %267 = arith.divf %265, %266 : vector<2x32xf32>
    %268 = vector.extract_strided_slice %261 {offsets = [0, 128], sizes = [2, 32], strides = [1, 1]} : vector<2x512xf32> to vector<2x32xf32>
    %269 = arith.negf %268 : vector<2x32xf32>
    %270 = math.exp %269 : vector<2x32xf32>
    %cst_51 = arith.constant 1.000000e+00 : f32
    %271 = vector.broadcast %cst_51 : f32 to vector<2x32xf32>
    %272 = arith.addf %271, %270 : vector<2x32xf32>
    %273 = arith.divf %271, %272 : vector<2x32xf32>
    %274 = vector.extract_strided_slice %261 {offsets = [0, 256], sizes = [2, 32], strides = [1, 1]} : vector<2x512xf32> to vector<2x32xf32>
    %275 = math.tanh %274 : vector<2x32xf32>
    %276 = vector.extract_strided_slice %261 {offsets = [0, 384], sizes = [2, 32], strides = [1, 1]} : vector<2x512xf32> to vector<2x32xf32>
    %277 = arith.negf %276 : vector<2x32xf32>
    %278 = math.exp %277 : vector<2x32xf32>
    %cst_52 = arith.constant 1.000000e+00 : f32
    %279 = vector.broadcast %cst_52 : f32 to vector<2x32xf32>
    %280 = arith.addf %279, %278 : vector<2x32xf32>
    %281 = arith.divf %279, %280 : vector<2x32xf32>
    %282 = arith.mulf %273, %257 : vector<2x32xf32>
    %283 = arith.mulf %267, %275 : vector<2x32xf32>
    %284 = arith.addf %282, %283 : vector<2x32xf32>
    %285 = math.tanh %284 : vector<2x32xf32>
    %286 = arith.mulf %281, %285 : vector<2x32xf32>
    %cst_53 = arith.constant dense<0.000000e+00> : vector<2x512xf32>
    %287 = tpu.matmul %286, %225, %cst_53 {dimension_numbers = #tpu.dot_dimension_numbers<[1], [0], [0], [1], [0, 0, 1, 1], [], []>} : vector<2x32xf32>, vector<32x512xf32>, vector<2x512xf32> -> vector<2x512xf32>
    %288 = arith.addf %230, %287 : vector<2x512xf32>
    %289 = vector.extract_strided_slice %288 {offsets = [0, 0], sizes = [2, 32], strides = [1, 1]} : vector<2x512xf32> to vector<2x32xf32>
    %290 = arith.negf %289 : vector<2x32xf32>
    %291 = math.exp %290 : vector<2x32xf32>
    %cst_54 = arith.constant 1.000000e+00 : f32
    %292 = vector.broadcast %cst_54 : f32 to vector<2x32xf32>
    %293 = arith.addf %292, %291 : vector<2x32xf32>
    %294 = arith.divf %292, %293 : vector<2x32xf32>
    %295 = vector.extract_strided_slice %288 {offsets = [0, 128], sizes = [2, 32], strides = [1, 1]} : vector<2x512xf32> to vector<2x32xf32>
    %296 = arith.negf %295 : vector<2x32xf32>
    %297 = math.exp %296 : vector<2x32xf32>
    %cst_55 = arith.constant 1.000000e+00 : f32
    %298 = vector.broadcast %cst_55 : f32 to vector<2x32xf32>
    %299 = arith.addf %298, %297 : vector<2x32xf32>
    %300 = arith.divf %298, %299 : vector<2x32xf32>
    %301 = vector.extract_strided_slice %288 {offsets = [0, 256], sizes = [2, 32], strides = [1, 1]} : vector<2x512xf32> to vector<2x32xf32>
    %302 = math.tanh %301 : vector<2x32xf32>
    %303 = vector.extract_strided_slice %288 {offsets = [0, 384], sizes = [2, 32], strides = [1, 1]} : vector<2x512xf32> to vector<2x32xf32>
    %304 = arith.negf %303 : vector<2x32xf32>
    %305 = math.exp %304 : vector<2x32xf32>
    %cst_56 = arith.constant 1.000000e+00 : f32
    %306 = vector.broadcast %cst_56 : f32 to vector<2x32xf32>
    %307 = arith.addf %306, %305 : vector<2x32xf32>
    %308 = arith.divf %306, %307 : vector<2x32xf32>
    %309 = arith.mulf %300, %284 : vector<2x32xf32>
    %310 = arith.mulf %294, %302 : vector<2x32xf32>
    %311 = arith.addf %309, %310 : vector<2x32xf32>
    %312 = math.tanh %311 : vector<2x32xf32>
    %313 = arith.mulf %308, %312 : vector<2x32xf32>
    %cst_57 = arith.constant dense<0.000000e+00> : vector<2x512xf32>
    %314 = tpu.matmul %313, %225, %cst_57 {dimension_numbers = #tpu.dot_dimension_numbers<[1], [0], [0], [1], [0, 0, 1, 1], [], []>} : vector<2x32xf32>, vector<32x512xf32>, vector<2x512xf32> -> vector<2x512xf32>
    %315 = arith.addf %230, %314 : vector<2x512xf32>
    %316 = vector.extract_strided_slice %315 {offsets = [0, 0], sizes = [2, 32], strides = [1, 1]} : vector<2x512xf32> to vector<2x32xf32>
    %317 = arith.negf %316 : vector<2x32xf32>
    %318 = math.exp %317 : vector<2x32xf32>
    %cst_58 = arith.constant 1.000000e+00 : f32
    %319 = vector.broadcast %cst_58 : f32 to vector<2x32xf32>
    %320 = arith.addf %319, %318 : vector<2x32xf32>
    %321 = arith.divf %319, %320 : vector<2x32xf32>
    %322 = vector.extract_strided_slice %315 {offsets = [0, 128], sizes = [2, 32], strides = [1, 1]} : vector<2x512xf32> to vector<2x32xf32>
    %323 = arith.negf %322 : vector<2x32xf32>
    %324 = math.exp %323 : vector<2x32xf32>
    %cst_59 = arith.constant 1.000000e+00 : f32
    %325 = vector.broadcast %cst_59 : f32 to vector<2x32xf32>
    %326 = arith.addf %325, %324 : vector<2x32xf32>
    %327 = arith.divf %325, %326 : vector<2x32xf32>
    %328 = vector.extract_strided_slice %315 {offsets = [0, 256], sizes = [2, 32], strides = [1, 1]} : vector<2x512xf32> to vector<2x32xf32>
    %329 = math.tanh %328 : vector<2x32xf32>
    %330 = vector.extract_strided_slice %315 {offsets = [0, 384], sizes = [2, 32], strides = [1, 1]} : vector<2x512xf32> to vector<2x32xf32>
    %331 = arith.negf %330 : vector<2x32xf32>
    %332 = math.exp %331 : vector<2x32xf32>
    %cst_60 = arith.constant 1.000000e+00 : f32
    %333 = vector.broadcast %cst_60 : f32 to vector<2x32xf32>
    %334 = arith.addf %333, %332 : vector<2x32xf32>
    %335 = arith.divf %333, %334 : vector<2x32xf32>
    %336 = arith.mulf %327, %311 : vector<2x32xf32>
    %337 = arith.mulf %321, %329 : vector<2x32xf32>
    %338 = arith.addf %336, %337 : vector<2x32xf32>
    %339 = math.tanh %338 : vector<2x32xf32>
    %340 = arith.mulf %335, %339 : vector<2x32xf32>
    %cst_61 = arith.constant dense<0.000000e+00> : vector<2x512xf32>
    %341 = tpu.matmul %340, %225, %cst_61 {dimension_numbers = #tpu.dot_dimension_numbers<[1], [0], [0], [1], [0, 0, 1, 1], [], []>} : vector<2x32xf32>, vector<32x512xf32>, vector<2x512xf32> -> vector<2x512xf32>
    %342 = arith.addf %230, %341 : vector<2x512xf32>
    %343 = vector.extract_strided_slice %342 {offsets = [0, 0], sizes = [2, 32], strides = [1, 1]} : vector<2x512xf32> to vector<2x32xf32>
    %344 = arith.negf %343 : vector<2x32xf32>
    %345 = math.exp %344 : vector<2x32xf32>
    %cst_62 = arith.constant 1.000000e+00 : f32
    %346 = vector.broadcast %cst_62 : f32 to vector<2x32xf32>
    %347 = arith.addf %346, %345 : vector<2x32xf32>
    %348 = arith.divf %346, %347 : vector<2x32xf32>
    %349 = vector.extract_strided_slice %342 {offsets = [0, 128], sizes = [2, 32], strides = [1, 1]} : vector<2x512xf32> to vector<2x32xf32>
    %350 = arith.negf %349 : vector<2x32xf32>
    %351 = math.exp %350 : vector<2x32xf32>
    %cst_63 = arith.constant 1.000000e+00 : f32
    %352 = vector.broadcast %cst_63 : f32 to vector<2x32xf32>
    %353 = arith.addf %352, %351 : vector<2x32xf32>
    %354 = arith.divf %352, %353 : vector<2x32xf32>
    %355 = vector.extract_strided_slice %342 {offsets = [0, 256], sizes = [2, 32], strides = [1, 1]} : vector<2x512xf32> to vector<2x32xf32>
    %356 = math.tanh %355 : vector<2x32xf32>
    %357 = vector.extract_strided_slice %342 {offsets = [0, 384], sizes = [2, 32], strides = [1, 1]} : vector<2x512xf32> to vector<2x32xf32>
    %358 = arith.negf %357 : vector<2x32xf32>
    %359 = math.exp %358 : vector<2x32xf32>
    %cst_64 = arith.constant 1.000000e+00 : f32
    %360 = vector.broadcast %cst_64 : f32 to vector<2x32xf32>
    %361 = arith.addf %360, %359 : vector<2x32xf32>
    %362 = arith.divf %360, %361 : vector<2x32xf32>
    %363 = arith.mulf %354, %338 : vector<2x32xf32>
    %364 = arith.mulf %348, %356 : vector<2x32xf32>
    %365 = arith.addf %363, %364 : vector<2x32xf32>
    %366 = math.tanh %365 : vector<2x32xf32>
    %367 = arith.mulf %362, %366 : vector<2x32xf32>
    %cst_65 = arith.constant dense<0.000000e+00> : vector<2x512xf32>
    %368 = tpu.matmul %367, %225, %cst_65 {dimension_numbers = #tpu.dot_dimension_numbers<[1], [0], [0], [1], [0, 0, 1, 1], [], []>} : vector<2x32xf32>, vector<32x512xf32>, vector<2x512xf32> -> vector<2x512xf32>
    %369 = arith.addf %230, %368 : vector<2x512xf32>
    %370 = vector.extract_strided_slice %369 {offsets = [0, 0], sizes = [2, 32], strides = [1, 1]} : vector<2x512xf32> to vector<2x32xf32>
    %371 = arith.negf %370 : vector<2x32xf32>
    %372 = math.exp %371 : vector<2x32xf32>
    %cst_66 = arith.constant 1.000000e+00 : f32
    %373 = vector.broadcast %cst_66 : f32 to vector<2x32xf32>
    %374 = arith.addf %373, %372 : vector<2x32xf32>
    %375 = arith.divf %373, %374 : vector<2x32xf32>
    %376 = vector.extract_strided_slice %369 {offsets = [0, 128], sizes = [2, 32], strides = [1, 1]} : vector<2x512xf32> to vector<2x32xf32>
    %377 = arith.negf %376 : vector<2x32xf32>
    %378 = math.exp %377 : vector<2x32xf32>
    %cst_67 = arith.constant 1.000000e+00 : f32
    %379 = vector.broadcast %cst_67 : f32 to vector<2x32xf32>
    %380 = arith.addf %379, %378 : vector<2x32xf32>
    %381 = arith.divf %379, %380 : vector<2x32xf32>
    %382 = vector.extract_strided_slice %369 {offsets = [0, 256], sizes = [2, 32], strides = [1, 1]} : vector<2x512xf32> to vector<2x32xf32>
    %383 = math.tanh %382 : vector<2x32xf32>
    %384 = vector.extract_strided_slice %369 {offsets = [0, 384], sizes = [2, 32], strides = [1, 1]} : vector<2x512xf32> to vector<2x32xf32>
    %385 = arith.negf %384 : vector<2x32xf32>
    %386 = math.exp %385 : vector<2x32xf32>
    %cst_68 = arith.constant 1.000000e+00 : f32
    %387 = vector.broadcast %cst_68 : f32 to vector<2x32xf32>
    %388 = arith.addf %387, %386 : vector<2x32xf32>
    %389 = arith.divf %387, %388 : vector<2x32xf32>
    %390 = arith.mulf %381, %365 : vector<2x32xf32>
    %391 = arith.mulf %375, %383 : vector<2x32xf32>
    %392 = arith.addf %390, %391 : vector<2x32xf32>
    %393 = math.tanh %392 : vector<2x32xf32>
    %394 = arith.mulf %389, %393 : vector<2x32xf32>
    %cst_69 = arith.constant dense<0.000000e+00> : vector<2x512xf32>
    %395 = tpu.matmul %394, %225, %cst_69 {dimension_numbers = #tpu.dot_dimension_numbers<[1], [0], [0], [1], [0, 0, 1, 1], [], []>} : vector<2x32xf32>, vector<32x512xf32>, vector<2x512xf32> -> vector<2x512xf32>
    %396 = arith.addf %230, %395 : vector<2x512xf32>
    %397 = vector.extract_strided_slice %396 {offsets = [0, 0], sizes = [2, 32], strides = [1, 1]} : vector<2x512xf32> to vector<2x32xf32>
    %398 = arith.negf %397 : vector<2x32xf32>
    %399 = math.exp %398 : vector<2x32xf32>
    %cst_70 = arith.constant 1.000000e+00 : f32
    %400 = vector.broadcast %cst_70 : f32 to vector<2x32xf32>
    %401 = arith.addf %400, %399 : vector<2x32xf32>
    %402 = arith.divf %400, %401 : vector<2x32xf32>
    %403 = vector.extract_strided_slice %396 {offsets = [0, 128], sizes = [2, 32], strides = [1, 1]} : vector<2x512xf32> to vector<2x32xf32>
    %404 = arith.negf %403 : vector<2x32xf32>
    %405 = math.exp %404 : vector<2x32xf32>
    %cst_71 = arith.constant 1.000000e+00 : f32
    %406 = vector.broadcast %cst_71 : f32 to vector<2x32xf32>
    %407 = arith.addf %406, %405 : vector<2x32xf32>
    %408 = arith.divf %406, %407 : vector<2x32xf32>
    %409 = vector.extract_strided_slice %396 {offsets = [0, 256], sizes = [2, 32], strides = [1, 1]} : vector<2x512xf32> to vector<2x32xf32>
    %410 = math.tanh %409 : vector<2x32xf32>
    %411 = vector.extract_strided_slice %396 {offsets = [0, 384], sizes = [2, 32], strides = [1, 1]} : vector<2x512xf32> to vector<2x32xf32>
    %412 = arith.negf %411 : vector<2x32xf32>
    %413 = math.exp %412 : vector<2x32xf32>
    %cst_72 = arith.constant 1.000000e+00 : f32
    %414 = vector.broadcast %cst_72 : f32 to vector<2x32xf32>
    %415 = arith.addf %414, %413 : vector<2x32xf32>
    %416 = arith.divf %414, %415 : vector<2x32xf32>
    %417 = arith.mulf %408, %392 : vector<2x32xf32>
    %418 = arith.mulf %402, %410 : vector<2x32xf32>
    %419 = arith.addf %417, %418 : vector<2x32xf32>
    %420 = math.tanh %419 : vector<2x32xf32>
    %421 = arith.mulf %416, %420 : vector<2x32xf32>
    %cst_73 = arith.constant dense<0.000000e+00> : vector<2x512xf32>
    %422 = tpu.matmul %421, %225, %cst_73 {dimension_numbers = #tpu.dot_dimension_numbers<[1], [0], [0], [1], [0, 0, 1, 1], [], []>} : vector<2x32xf32>, vector<32x512xf32>, vector<2x512xf32> -> vector<2x512xf32>
    %423 = arith.addf %230, %422 : vector<2x512xf32>
    %424 = vector.extract_strided_slice %423 {offsets = [0, 0], sizes = [2, 32], strides = [1, 1]} : vector<2x512xf32> to vector<2x32xf32>
    %425 = arith.negf %424 : vector<2x32xf32>
    %426 = math.exp %425 : vector<2x32xf32>
    %cst_74 = arith.constant 1.000000e+00 : f32
    %427 = vector.broadcast %cst_74 : f32 to vector<2x32xf32>
    %428 = arith.addf %427, %426 : vector<2x32xf32>
    %429 = arith.divf %427, %428 : vector<2x32xf32>
    %430 = vector.extract_strided_slice %423 {offsets = [0, 128], sizes = [2, 32], strides = [1, 1]} : vector<2x512xf32> to vector<2x32xf32>
    %431 = arith.negf %430 : vector<2x32xf32>
    %432 = math.exp %431 : vector<2x32xf32>
    %cst_75 = arith.constant 1.000000e+00 : f32
    %433 = vector.broadcast %cst_75 : f32 to vector<2x32xf32>
    %434 = arith.addf %433, %432 : vector<2x32xf32>
    %435 = arith.divf %433, %434 : vector<2x32xf32>
    %436 = vector.extract_strided_slice %423 {offsets = [0, 256], sizes = [2, 32], strides = [1, 1]} : vector<2x512xf32> to vector<2x32xf32>
    %437 = math.tanh %436 : vector<2x32xf32>
    %438 = vector.extract_strided_slice %423 {offsets = [0, 384], sizes = [2, 32], strides = [1, 1]} : vector<2x512xf32> to vector<2x32xf32>
    %439 = arith.negf %438 : vector<2x32xf32>
    %440 = math.exp %439 : vector<2x32xf32>
    %cst_76 = arith.constant 1.000000e+00 : f32
    %441 = vector.broadcast %cst_76 : f32 to vector<2x32xf32>
    %442 = arith.addf %441, %440 : vector<2x32xf32>
    %443 = arith.divf %441, %442 : vector<2x32xf32>
    %444 = arith.mulf %435, %419 : vector<2x32xf32>
    %445 = arith.mulf %429, %437 : vector<2x32xf32>
    %446 = arith.addf %444, %445 : vector<2x32xf32>
    %447 = math.tanh %446 : vector<2x32xf32>
    %448 = arith.mulf %443, %447 : vector<2x32xf32>
    %449 = tpu.concatenate %35, %62, %89, %116, %143, %170, %197, %224 in 0 : vector<2x32xf32>, vector<2x32xf32>, vector<2x32xf32>, vector<2x32xf32>, vector<2x32xf32>, vector<2x32xf32>, vector<2x32xf32>, vector<2x32xf32> -> vector<16x32xf32>
    %450 = tpu.concatenate %448, %421, %394, %367, %340, %313, %286, %259 in 0 : vector<2x32xf32>, vector<2x32xf32>, vector<2x32xf32>, vector<2x32xf32>, vector<2x32xf32>, vector<2x32xf32>, vector<2x32xf32>, vector<2x32xf32> -> vector<16x32xf32>
    %c160 = arith.constant 160 : index
    %c0_77 = arith.constant 0 : index
    %451 = vector.load %arg0[%c160, %c0_77] : memref<176x512xf32, #tpu.memory_space<vmem>>, vector<8x512xf32>
    %c168 = arith.constant 168 : index
    %c0_78 = arith.constant 0 : index
    %452 = vector.load %arg0[%c168, %c0_78] : memref<176x512xf32, #tpu.memory_space<vmem>>, vector<1x512xf32>
    %c96 = arith.constant 96 : index
    %c0_79 = arith.constant 0 : index
    %453 = vector.load %arg0[%c96, %c0_79] : memref<176x512xf32, #tpu.memory_space<vmem>>, vector<32x512xf32>
    %cst_80 = arith.constant dense<0.000000e+00> : vector<16x512xf32>
    %454 = tpu.matmul %449, %453, %cst_80 {dimension_numbers = #tpu.dot_dimension_numbers<[1], [0], [0], [1], [0, 0, 1, 1], [], []>} : vector<16x32xf32>, vector<32x512xf32>, vector<16x512xf32> -> vector<16x512xf32>
    %c128 = arith.constant 128 : index
    %c0_81 = arith.constant 0 : index
    %455 = vector.load %arg0[%c128, %c0_81] : memref<176x512xf32, #tpu.memory_space<vmem>>, vector<32x512xf32>
    %cst_82 = arith.constant dense<0.000000e+00> : vector<16x512xf32>
    %456 = tpu.matmul %450, %455, %cst_82 {dimension_numbers = #tpu.dot_dimension_numbers<[1], [0], [0], [1], [0, 0, 1, 1], [], []>} : vector<16x32xf32>, vector<32x512xf32>, vector<16x512xf32> -> vector<16x512xf32>
    %457 = arith.addf %454, %456 : vector<16x512xf32>
    %458 = vector.broadcast %452 : vector<1x512xf32> to vector<16x512xf32>
    %459 = arith.addf %457, %458 : vector<16x512xf32>
    %cst_83 = arith.constant 0.000000e+00 : f32
    %460 = vector.broadcast %cst_83 : f32 to vector<2x8xf32>
    %cst_84 = arith.constant 0.000000e+00 : f32
    %461 = vector.broadcast %cst_84 : f32 to vector<2x8xf32>
    %462 = vector.extract_strided_slice %459 {offsets = [0, 0], sizes = [2, 512], strides = [1, 1]} : vector<16x512xf32> to vector<2x512xf32>
    %cst_85 = arith.constant dense<0.000000e+00> : vector<2x512xf32>
    %463 = tpu.matmul %460, %451, %cst_85 {dimension_numbers = #tpu.dot_dimension_numbers<[1], [0], [0], [1], [0, 0, 1, 1], [], []>} : vector<2x8xf32>, vector<8x512xf32>, vector<2x512xf32> -> vector<2x512xf32>
    %464 = arith.addf %462, %463 : vector<2x512xf32>
    %465 = vector.extract_strided_slice %464 {offsets = [0, 0], sizes = [2, 8], strides = [1, 1]} : vector<2x512xf32> to vector<2x8xf32>
    %466 = arith.negf %465 : vector<2x8xf32>
    %467 = math.exp %466 : vector<2x8xf32>
    %cst_86 = arith.constant 1.000000e+00 : f32
    %468 = vector.broadcast %cst_86 : f32 to vector<2x8xf32>
    %469 = arith.addf %468, %467 : vector<2x8xf32>
    %470 = arith.divf %468, %469 : vector<2x8xf32>
    %471 = vector.extract_strided_slice %464 {offsets = [0, 128], sizes = [2, 8], strides = [1, 1]} : vector<2x512xf32> to vector<2x8xf32>
    %472 = arith.negf %471 : vector<2x8xf32>
    %473 = math.exp %472 : vector<2x8xf32>
    %cst_87 = arith.constant 1.000000e+00 : f32
    %474 = vector.broadcast %cst_87 : f32 to vector<2x8xf32>
    %475 = arith.addf %474, %473 : vector<2x8xf32>
    %476 = arith.divf %474, %475 : vector<2x8xf32>
    %477 = vector.extract_strided_slice %464 {offsets = [0, 256], sizes = [2, 8], strides = [1, 1]} : vector<2x512xf32> to vector<2x8xf32>
    %478 = math.tanh %477 : vector<2x8xf32>
    %479 = vector.extract_strided_slice %464 {offsets = [0, 384], sizes = [2, 8], strides = [1, 1]} : vector<2x512xf32> to vector<2x8xf32>
    %480 = arith.negf %479 : vector<2x8xf32>
    %481 = math.exp %480 : vector<2x8xf32>
    %cst_88 = arith.constant 1.000000e+00 : f32
    %482 = vector.broadcast %cst_88 : f32 to vector<2x8xf32>
    %483 = arith.addf %482, %481 : vector<2x8xf32>
    %484 = arith.divf %482, %483 : vector<2x8xf32>
    %485 = arith.mulf %476, %461 : vector<2x8xf32>
    %486 = arith.mulf %470, %478 : vector<2x8xf32>
    %487 = arith.addf %485, %486 : vector<2x8xf32>
    %488 = math.tanh %487 : vector<2x8xf32>
    %489 = arith.mulf %484, %488 : vector<2x8xf32>
    %490 = vector.extract_strided_slice %489 {offsets = [0, 0], sizes = [2, 4], strides = [1, 1]} : vector<2x8xf32> to vector<2x4xf32>
    %491 = vector.extract_strided_slice %459 {offsets = [2, 0], sizes = [2, 512], strides = [1, 1]} : vector<16x512xf32> to vector<2x512xf32>
    %cst_89 = arith.constant dense<0.000000e+00> : vector<2x512xf32>
    %492 = tpu.matmul %489, %451, %cst_89 {dimension_numbers = #tpu.dot_dimension_numbers<[1], [0], [0], [1], [0, 0, 1, 1], [], []>} : vector<2x8xf32>, vector<8x512xf32>, vector<2x512xf32> -> vector<2x512xf32>
    %493 = arith.addf %491, %492 : vector<2x512xf32>
    %494 = vector.extract_strided_slice %493 {offsets = [0, 0], sizes = [2, 8], strides = [1, 1]} : vector<2x512xf32> to vector<2x8xf32>
    %495 = arith.negf %494 : vector<2x8xf32>
    %496 = math.exp %495 : vector<2x8xf32>
    %cst_90 = arith.constant 1.000000e+00 : f32
    %497 = vector.broadcast %cst_90 : f32 to vector<2x8xf32>
    %498 = arith.addf %497, %496 : vector<2x8xf32>
    %499 = arith.divf %497, %498 : vector<2x8xf32>
    %500 = vector.extract_strided_slice %493 {offsets = [0, 128], sizes = [2, 8], strides = [1, 1]} : vector<2x512xf32> to vector<2x8xf32>
    %501 = arith.negf %500 : vector<2x8xf32>
    %502 = math.exp %501 : vector<2x8xf32>
    %cst_91 = arith.constant 1.000000e+00 : f32
    %503 = vector.broadcast %cst_91 : f32 to vector<2x8xf32>
    %504 = arith.addf %503, %502 : vector<2x8xf32>
    %505 = arith.divf %503, %504 : vector<2x8xf32>
    %506 = vector.extract_strided_slice %493 {offsets = [0, 256], sizes = [2, 8], strides = [1, 1]} : vector<2x512xf32> to vector<2x8xf32>
    %507 = math.tanh %506 : vector<2x8xf32>
    %508 = vector.extract_strided_slice %493 {offsets = [0, 384], sizes = [2, 8], strides = [1, 1]} : vector<2x512xf32> to vector<2x8xf32>
    %509 = arith.negf %508 : vector<2x8xf32>
    %510 = math.exp %509 : vector<2x8xf32>
    %cst_92 = arith.constant 1.000000e+00 : f32
    %511 = vector.broadcast %cst_92 : f32 to vector<2x8xf32>
    %512 = arith.addf %511, %510 : vector<2x8xf32>
    %513 = arith.divf %511, %512 : vector<2x8xf32>
    %514 = arith.mulf %505, %487 : vector<2x8xf32>
    %515 = arith.mulf %499, %507 : vector<2x8xf32>
    %516 = arith.addf %514, %515 : vector<2x8xf32>
    %517 = math.tanh %516 : vector<2x8xf32>
    %518 = arith.mulf %513, %517 : vector<2x8xf32>
    %519 = vector.extract_strided_slice %518 {offsets = [0, 0], sizes = [2, 4], strides = [1, 1]} : vector<2x8xf32> to vector<2x4xf32>
    %520 = vector.extract_strided_slice %459 {offsets = [4, 0], sizes = [2, 512], strides = [1, 1]} : vector<16x512xf32> to vector<2x512xf32>
    %cst_93 = arith.constant dense<0.000000e+00> : vector<2x512xf32>
    %521 = tpu.matmul %518, %451, %cst_93 {dimension_numbers = #tpu.dot_dimension_numbers<[1], [0], [0], [1], [0, 0, 1, 1], [], []>} : vector<2x8xf32>, vector<8x512xf32>, vector<2x512xf32> -> vector<2x512xf32>
    %522 = arith.addf %520, %521 : vector<2x512xf32>
    %523 = vector.extract_strided_slice %522 {offsets = [0, 0], sizes = [2, 8], strides = [1, 1]} : vector<2x512xf32> to vector<2x8xf32>
    %524 = arith.negf %523 : vector<2x8xf32>
    %525 = math.exp %524 : vector<2x8xf32>
    %cst_94 = arith.constant 1.000000e+00 : f32
    %526 = vector.broadcast %cst_94 : f32 to vector<2x8xf32>
    %527 = arith.addf %526, %525 : vector<2x8xf32>
    %528 = arith.divf %526, %527 : vector<2x8xf32>
    %529 = vector.extract_strided_slice %522 {offsets = [0, 128], sizes = [2, 8], strides = [1, 1]} : vector<2x512xf32> to vector<2x8xf32>
    %530 = arith.negf %529 : vector<2x8xf32>
    %531 = math.exp %530 : vector<2x8xf32>
    %cst_95 = arith.constant 1.000000e+00 : f32
    %532 = vector.broadcast %cst_95 : f32 to vector<2x8xf32>
    %533 = arith.addf %532, %531 : vector<2x8xf32>
    %534 = arith.divf %532, %533 : vector<2x8xf32>
    %535 = vector.extract_strided_slice %522 {offsets = [0, 256], sizes = [2, 8], strides = [1, 1]} : vector<2x512xf32> to vector<2x8xf32>
    %536 = math.tanh %535 : vector<2x8xf32>
    %537 = vector.extract_strided_slice %522 {offsets = [0, 384], sizes = [2, 8], strides = [1, 1]} : vector<2x512xf32> to vector<2x8xf32>
    %538 = arith.negf %537 : vector<2x8xf32>
    %539 = math.exp %538 : vector<2x8xf32>
    %cst_96 = arith.constant 1.000000e+00 : f32
    %540 = vector.broadcast %cst_96 : f32 to vector<2x8xf32>
    %541 = arith.addf %540, %539 : vector<2x8xf32>
    %542 = arith.divf %540, %541 : vector<2x8xf32>
    %543 = arith.mulf %534, %516 : vector<2x8xf32>
    %544 = arith.mulf %528, %536 : vector<2x8xf32>
    %545 = arith.addf %543, %544 : vector<2x8xf32>
    %546 = math.tanh %545 : vector<2x8xf32>
    %547 = arith.mulf %542, %546 : vector<2x8xf32>
    %548 = vector.extract_strided_slice %547 {offsets = [0, 0], sizes = [2, 4], strides = [1, 1]} : vector<2x8xf32> to vector<2x4xf32>
    %549 = vector.extract_strided_slice %459 {offsets = [6, 0], sizes = [2, 512], strides = [1, 1]} : vector<16x512xf32> to vector<2x512xf32>
    %cst_97 = arith.constant dense<0.000000e+00> : vector<2x512xf32>
    %550 = tpu.matmul %547, %451, %cst_97 {dimension_numbers = #tpu.dot_dimension_numbers<[1], [0], [0], [1], [0, 0, 1, 1], [], []>} : vector<2x8xf32>, vector<8x512xf32>, vector<2x512xf32> -> vector<2x512xf32>
    %551 = arith.addf %549, %550 : vector<2x512xf32>
    %552 = vector.extract_strided_slice %551 {offsets = [0, 0], sizes = [2, 8], strides = [1, 1]} : vector<2x512xf32> to vector<2x8xf32>
    %553 = arith.negf %552 : vector<2x8xf32>
    %554 = math.exp %553 : vector<2x8xf32>
    %cst_98 = arith.constant 1.000000e+00 : f32
    %555 = vector.broadcast %cst_98 : f32 to vector<2x8xf32>
    %556 = arith.addf %555, %554 : vector<2x8xf32>
    %557 = arith.divf %555, %556 : vector<2x8xf32>
    %558 = vector.extract_strided_slice %551 {offsets = [0, 128], sizes = [2, 8], strides = [1, 1]} : vector<2x512xf32> to vector<2x8xf32>
    %559 = arith.negf %558 : vector<2x8xf32>
    %560 = math.exp %559 : vector<2x8xf32>
    %cst_99 = arith.constant 1.000000e+00 : f32
    %561 = vector.broadcast %cst_99 : f32 to vector<2x8xf32>
    %562 = arith.addf %561, %560 : vector<2x8xf32>
    %563 = arith.divf %561, %562 : vector<2x8xf32>
    %564 = vector.extract_strided_slice %551 {offsets = [0, 256], sizes = [2, 8], strides = [1, 1]} : vector<2x512xf32> to vector<2x8xf32>
    %565 = math.tanh %564 : vector<2x8xf32>
    %566 = vector.extract_strided_slice %551 {offsets = [0, 384], sizes = [2, 8], strides = [1, 1]} : vector<2x512xf32> to vector<2x8xf32>
    %567 = arith.negf %566 : vector<2x8xf32>
    %568 = math.exp %567 : vector<2x8xf32>
    %cst_100 = arith.constant 1.000000e+00 : f32
    %569 = vector.broadcast %cst_100 : f32 to vector<2x8xf32>
    %570 = arith.addf %569, %568 : vector<2x8xf32>
    %571 = arith.divf %569, %570 : vector<2x8xf32>
    %572 = arith.mulf %563, %545 : vector<2x8xf32>
    %573 = arith.mulf %557, %565 : vector<2x8xf32>
    %574 = arith.addf %572, %573 : vector<2x8xf32>
    %575 = math.tanh %574 : vector<2x8xf32>
    %576 = arith.mulf %571, %575 : vector<2x8xf32>
    %577 = vector.extract_strided_slice %576 {offsets = [0, 0], sizes = [2, 4], strides = [1, 1]} : vector<2x8xf32> to vector<2x4xf32>
    %578 = vector.extract_strided_slice %459 {offsets = [8, 0], sizes = [2, 512], strides = [1, 1]} : vector<16x512xf32> to vector<2x512xf32>
    %cst_101 = arith.constant dense<0.000000e+00> : vector<2x512xf32>
    %579 = tpu.matmul %576, %451, %cst_101 {dimension_numbers = #tpu.dot_dimension_numbers<[1], [0], [0], [1], [0, 0, 1, 1], [], []>} : vector<2x8xf32>, vector<8x512xf32>, vector<2x512xf32> -> vector<2x512xf32>
    %580 = arith.addf %578, %579 : vector<2x512xf32>
    %581 = vector.extract_strided_slice %580 {offsets = [0, 0], sizes = [2, 8], strides = [1, 1]} : vector<2x512xf32> to vector<2x8xf32>
    %582 = arith.negf %581 : vector<2x8xf32>
    %583 = math.exp %582 : vector<2x8xf32>
    %cst_102 = arith.constant 1.000000e+00 : f32
    %584 = vector.broadcast %cst_102 : f32 to vector<2x8xf32>
    %585 = arith.addf %584, %583 : vector<2x8xf32>
    %586 = arith.divf %584, %585 : vector<2x8xf32>
    %587 = vector.extract_strided_slice %580 {offsets = [0, 128], sizes = [2, 8], strides = [1, 1]} : vector<2x512xf32> to vector<2x8xf32>
    %588 = arith.negf %587 : vector<2x8xf32>
    %589 = math.exp %588 : vector<2x8xf32>
    %cst_103 = arith.constant 1.000000e+00 : f32
    %590 = vector.broadcast %cst_103 : f32 to vector<2x8xf32>
    %591 = arith.addf %590, %589 : vector<2x8xf32>
    %592 = arith.divf %590, %591 : vector<2x8xf32>
    %593 = vector.extract_strided_slice %580 {offsets = [0, 256], sizes = [2, 8], strides = [1, 1]} : vector<2x512xf32> to vector<2x8xf32>
    %594 = math.tanh %593 : vector<2x8xf32>
    %595 = vector.extract_strided_slice %580 {offsets = [0, 384], sizes = [2, 8], strides = [1, 1]} : vector<2x512xf32> to vector<2x8xf32>
    %596 = arith.negf %595 : vector<2x8xf32>
    %597 = math.exp %596 : vector<2x8xf32>
    %cst_104 = arith.constant 1.000000e+00 : f32
    %598 = vector.broadcast %cst_104 : f32 to vector<2x8xf32>
    %599 = arith.addf %598, %597 : vector<2x8xf32>
    %600 = arith.divf %598, %599 : vector<2x8xf32>
    %601 = arith.mulf %592, %574 : vector<2x8xf32>
    %602 = arith.mulf %586, %594 : vector<2x8xf32>
    %603 = arith.addf %601, %602 : vector<2x8xf32>
    %604 = math.tanh %603 : vector<2x8xf32>
    %605 = arith.mulf %600, %604 : vector<2x8xf32>
    %606 = vector.extract_strided_slice %605 {offsets = [0, 0], sizes = [2, 4], strides = [1, 1]} : vector<2x8xf32> to vector<2x4xf32>
    %607 = vector.extract_strided_slice %459 {offsets = [10, 0], sizes = [2, 512], strides = [1, 1]} : vector<16x512xf32> to vector<2x512xf32>
    %cst_105 = arith.constant dense<0.000000e+00> : vector<2x512xf32>
    %608 = tpu.matmul %605, %451, %cst_105 {dimension_numbers = #tpu.dot_dimension_numbers<[1], [0], [0], [1], [0, 0, 1, 1], [], []>} : vector<2x8xf32>, vector<8x512xf32>, vector<2x512xf32> -> vector<2x512xf32>
    %609 = arith.addf %607, %608 : vector<2x512xf32>
    %610 = vector.extract_strided_slice %609 {offsets = [0, 0], sizes = [2, 8], strides = [1, 1]} : vector<2x512xf32> to vector<2x8xf32>
    %611 = arith.negf %610 : vector<2x8xf32>
    %612 = math.exp %611 : vector<2x8xf32>
    %cst_106 = arith.constant 1.000000e+00 : f32
    %613 = vector.broadcast %cst_106 : f32 to vector<2x8xf32>
    %614 = arith.addf %613, %612 : vector<2x8xf32>
    %615 = arith.divf %613, %614 : vector<2x8xf32>
    %616 = vector.extract_strided_slice %609 {offsets = [0, 128], sizes = [2, 8], strides = [1, 1]} : vector<2x512xf32> to vector<2x8xf32>
    %617 = arith.negf %616 : vector<2x8xf32>
    %618 = math.exp %617 : vector<2x8xf32>
    %cst_107 = arith.constant 1.000000e+00 : f32
    %619 = vector.broadcast %cst_107 : f32 to vector<2x8xf32>
    %620 = arith.addf %619, %618 : vector<2x8xf32>
    %621 = arith.divf %619, %620 : vector<2x8xf32>
    %622 = vector.extract_strided_slice %609 {offsets = [0, 256], sizes = [2, 8], strides = [1, 1]} : vector<2x512xf32> to vector<2x8xf32>
    %623 = math.tanh %622 : vector<2x8xf32>
    %624 = vector.extract_strided_slice %609 {offsets = [0, 384], sizes = [2, 8], strides = [1, 1]} : vector<2x512xf32> to vector<2x8xf32>
    %625 = arith.negf %624 : vector<2x8xf32>
    %626 = math.exp %625 : vector<2x8xf32>
    %cst_108 = arith.constant 1.000000e+00 : f32
    %627 = vector.broadcast %cst_108 : f32 to vector<2x8xf32>
    %628 = arith.addf %627, %626 : vector<2x8xf32>
    %629 = arith.divf %627, %628 : vector<2x8xf32>
    %630 = arith.mulf %621, %603 : vector<2x8xf32>
    %631 = arith.mulf %615, %623 : vector<2x8xf32>
    %632 = arith.addf %630, %631 : vector<2x8xf32>
    %633 = math.tanh %632 : vector<2x8xf32>
    %634 = arith.mulf %629, %633 : vector<2x8xf32>
    %635 = vector.extract_strided_slice %634 {offsets = [0, 0], sizes = [2, 4], strides = [1, 1]} : vector<2x8xf32> to vector<2x4xf32>
    %636 = vector.extract_strided_slice %459 {offsets = [12, 0], sizes = [2, 512], strides = [1, 1]} : vector<16x512xf32> to vector<2x512xf32>
    %cst_109 = arith.constant dense<0.000000e+00> : vector<2x512xf32>
    %637 = tpu.matmul %634, %451, %cst_109 {dimension_numbers = #tpu.dot_dimension_numbers<[1], [0], [0], [1], [0, 0, 1, 1], [], []>} : vector<2x8xf32>, vector<8x512xf32>, vector<2x512xf32> -> vector<2x512xf32>
    %638 = arith.addf %636, %637 : vector<2x512xf32>
    %639 = vector.extract_strided_slice %638 {offsets = [0, 0], sizes = [2, 8], strides = [1, 1]} : vector<2x512xf32> to vector<2x8xf32>
    %640 = arith.negf %639 : vector<2x8xf32>
    %641 = math.exp %640 : vector<2x8xf32>
    %cst_110 = arith.constant 1.000000e+00 : f32
    %642 = vector.broadcast %cst_110 : f32 to vector<2x8xf32>
    %643 = arith.addf %642, %641 : vector<2x8xf32>
    %644 = arith.divf %642, %643 : vector<2x8xf32>
    %645 = vector.extract_strided_slice %638 {offsets = [0, 128], sizes = [2, 8], strides = [1, 1]} : vector<2x512xf32> to vector<2x8xf32>
    %646 = arith.negf %645 : vector<2x8xf32>
    %647 = math.exp %646 : vector<2x8xf32>
    %cst_111 = arith.constant 1.000000e+00 : f32
    %648 = vector.broadcast %cst_111 : f32 to vector<2x8xf32>
    %649 = arith.addf %648, %647 : vector<2x8xf32>
    %650 = arith.divf %648, %649 : vector<2x8xf32>
    %651 = vector.extract_strided_slice %638 {offsets = [0, 256], sizes = [2, 8], strides = [1, 1]} : vector<2x512xf32> to vector<2x8xf32>
    %652 = math.tanh %651 : vector<2x8xf32>
    %653 = vector.extract_strided_slice %638 {offsets = [0, 384], sizes = [2, 8], strides = [1, 1]} : vector<2x512xf32> to vector<2x8xf32>
    %654 = arith.negf %653 : vector<2x8xf32>
    %655 = math.exp %654 : vector<2x8xf32>
    %cst_112 = arith.constant 1.000000e+00 : f32
    %656 = vector.broadcast %cst_112 : f32 to vector<2x8xf32>
    %657 = arith.addf %656, %655 : vector<2x8xf32>
    %658 = arith.divf %656, %657 : vector<2x8xf32>
    %659 = arith.mulf %650, %632 : vector<2x8xf32>
    %660 = arith.mulf %644, %652 : vector<2x8xf32>
    %661 = arith.addf %659, %660 : vector<2x8xf32>
    %662 = math.tanh %661 : vector<2x8xf32>
    %663 = arith.mulf %658, %662 : vector<2x8xf32>
    %664 = vector.extract_strided_slice %663 {offsets = [0, 0], sizes = [2, 4], strides = [1, 1]} : vector<2x8xf32> to vector<2x4xf32>
    %665 = vector.extract_strided_slice %459 {offsets = [14, 0], sizes = [2, 512], strides = [1, 1]} : vector<16x512xf32> to vector<2x512xf32>
    %cst_113 = arith.constant dense<0.000000e+00> : vector<2x512xf32>
    %666 = tpu.matmul %663, %451, %cst_113 {dimension_numbers = #tpu.dot_dimension_numbers<[1], [0], [0], [1], [0, 0, 1, 1], [], []>} : vector<2x8xf32>, vector<8x512xf32>, vector<2x512xf32> -> vector<2x512xf32>
    %667 = arith.addf %665, %666 : vector<2x512xf32>
    %668 = vector.extract_strided_slice %667 {offsets = [0, 0], sizes = [2, 8], strides = [1, 1]} : vector<2x512xf32> to vector<2x8xf32>
    %669 = arith.negf %668 : vector<2x8xf32>
    %670 = math.exp %669 : vector<2x8xf32>
    %cst_114 = arith.constant 1.000000e+00 : f32
    %671 = vector.broadcast %cst_114 : f32 to vector<2x8xf32>
    %672 = arith.addf %671, %670 : vector<2x8xf32>
    %673 = arith.divf %671, %672 : vector<2x8xf32>
    %674 = vector.extract_strided_slice %667 {offsets = [0, 128], sizes = [2, 8], strides = [1, 1]} : vector<2x512xf32> to vector<2x8xf32>
    %675 = arith.negf %674 : vector<2x8xf32>
    %676 = math.exp %675 : vector<2x8xf32>
    %cst_115 = arith.constant 1.000000e+00 : f32
    %677 = vector.broadcast %cst_115 : f32 to vector<2x8xf32>
    %678 = arith.addf %677, %676 : vector<2x8xf32>
    %679 = arith.divf %677, %678 : vector<2x8xf32>
    %680 = vector.extract_strided_slice %667 {offsets = [0, 256], sizes = [2, 8], strides = [1, 1]} : vector<2x512xf32> to vector<2x8xf32>
    %681 = math.tanh %680 : vector<2x8xf32>
    %682 = vector.extract_strided_slice %667 {offsets = [0, 384], sizes = [2, 8], strides = [1, 1]} : vector<2x512xf32> to vector<2x8xf32>
    %683 = arith.negf %682 : vector<2x8xf32>
    %684 = math.exp %683 : vector<2x8xf32>
    %cst_116 = arith.constant 1.000000e+00 : f32
    %685 = vector.broadcast %cst_116 : f32 to vector<2x8xf32>
    %686 = arith.addf %685, %684 : vector<2x8xf32>
    %687 = arith.divf %685, %686 : vector<2x8xf32>
    %688 = arith.mulf %679, %661 : vector<2x8xf32>
    %689 = arith.mulf %673, %681 : vector<2x8xf32>
    %690 = arith.addf %688, %689 : vector<2x8xf32>
    %691 = math.tanh %690 : vector<2x8xf32>
    %692 = arith.mulf %687, %691 : vector<2x8xf32>
    %693 = vector.extract_strided_slice %692 {offsets = [0, 0], sizes = [2, 4], strides = [1, 1]} : vector<2x8xf32> to vector<2x4xf32>
    %694 = tpu.concatenate %490, %519, %548, %577, %606, %635, %664, %693 in 1 : vector<2x4xf32>, vector<2x4xf32>, vector<2x4xf32>, vector<2x4xf32>, vector<2x4xf32>, vector<2x4xf32>, vector<2x4xf32>, vector<2x4xf32> -> vector<2x32xf32>
    %c0_117 = arith.constant 0 : index
    %c0_118 = arith.constant 0 : index
    %695 = vector.load %arg2[%c0_117, %c0_118] : memref<2x32xf32, #tpu.memory_space<vmem>>, vector<2x32xf32>
    tpu.vector_store %arg2[%c0_117, %c0_118], %694 {strides = array<i32>} : memref<2x32xf32, #tpu.memory_space<vmem>>, vector<2x32xf32>,
    return
  }
}

</mosaic_0001>

<bundles_post_ra>
// kernel: tpu_custom_call.1
= control target key start
LH: loop header
LB: loop body
LE: loop exit
PB: predicated region body
PF: predicated region fallthrough
CT: control target
= control target key end

     0   :  { %7 = vsyncpa [#allocation3], 0  ;;  %s6603_s0 = inlined_call_operand.hbm [shape: f32[176,512], index: 0, kind: input, shape index: {}]   ;;  %s6604_s1 = inlined_call_operand.vmem [shape: f32[2,8], index: 1, kind: input, shape index: {}]   ;;  %s6605_s2 = inlined_call_operand.hbm [shape: f32[2,32], index: 2, kind: output, shape index: {}]  }
   0x1   :  { %8 = vsyncpa [#allocation4], 0  ;;  %s5994_s9 = smov [#allocation2]   ;;  %s5946_s13 = scalar_lea.hbm %s6603_s0, 11264 }
   0x2   :  { %s14_s10 = sshll.u32 %s5994_s9, 4  ;;  %p5947_p0 = scmp.ne.s32.totalorder %s6603_s0, %s5946_s13  ;;  %s15_s10 = int_to_ptr.vmem [resolvable:$true] %s14_s10 }
   0x3   :  { %p5950_p1 = scmp.lt.u32.totalorder %s5946_s13, %s6603_s0 }
   0x5   :  { %p5952_p2 = pnand %p5950_p1, %p5947_p0 }
   0x7   :  { %5955 = shalt.err (!%p5952_p2)
}
   0x8   :  { %s5956_s18 = scalar_lea.vmem %s15_s10, 11264  ;;  %p5961_p4 = scmp.lt.s32.totalorder %s15_s10, %s15_s10 }
   0x9   :  { %p5957_p3 = scmp.ne.s32.totalorder %s15_s10, %s5956_s18  ;;  %p5962_p5 = scmp.lt.s32.totalorder %s5956_s18, %s5956_s18 }
   0xb   :  { %p5963_p6 = por %p5962_p5, %p5961_p4 }
   0xd   :  { %p5964_p7 = pnand %p5963_p6, %p5957_p3 }
   0xf   :  { %5967 = shalt.err (!%p5964_p7)
}
  0x10   :  { %s5995_s19 = smov 512   ;;  %s5996_s20 = smov 32  }
  0x11   :  { %20 = dma.hbm_to_vmem [thread:$0]  %s6603_s0, 11264, %s15_s10, [#allocation3], %s5995_s19, %s5995_s19, %s5996_s20  }
  0x12   :  { %5990 = dma.done.wait [#allocation3], 11264  }
  0x13   :  { %5991 = vsyncadd [#allocation3], 4294956032  ;;  %v5997_v0 = vmov 0.0   ;;  %v46_v1 = vld [vmem:[#allocation2 + $0x8] sm:$0xff]  ;;  %v45_v2 = vld [vmem:[#allocation2] sm:$0xff]  ;;  %vm70_vm0 = vcmask 64512   ;;  %v50_v30 = vlaneseq }
  0x14   :  { %138 = vmatprep.mubr.f32.mxu0 %v5997_v0  ;;  %209 = vmatprep.mubr.f32.mxu1 %v5997_v0  ;;  %v6038_v3 = vld [vmem:[%s6604_s1] sm:$0x3]  ;;  %v28_v4 = vld [vmem:[#allocation2 + $0x28] sm:$0xff]  ;;  %v48_v15 = vld [vmem:[#allocation2 + $0x18] sm:$0xff]  ;;  %vm216_vm1 = vcmask 261120   ;;  %vm3180_vm2 = vcmask 1041408  }
  0x15   :  { %74 = vmatprep.subr.mxu0 %v46_v1  ;;  %v32_v5 = vld [vmem:[#allocation2 + $0x48] sm:$0xff]  ;;  %v27_v6 = vld [vmem:[#allocation2 + $0x20] sm:$0xff]  ;;  %145 = vmatprep.subr.mxu1 %v48_v15  ;;  %v47_v16 = vld [vmem:[#allocation2 + $0x10] sm:$0xff]  ;;  %v51_v31 = vshrl.u32 %v50_v30, 7  ;;  %vm3182_vm3 = vcmask 1043456   ;;  %vm3184_vm4 = vcmask 1045504  }
  0x16   :  { %75 = vmatpush1.msra.mxu0 %v45_v2  ;;  %v6040_v7 = vpack.c.bf16 %v32_v5, %v28_v4  ;;  %v31_v8 = vld [vmem:[#allocation2 + $0x40] sm:$0xff]  ;;  %v36_v9 = vld [vmem:[#allocation2 + $0x68] sm:$0xff]  ;;  %v30_v17 = vld [vmem:[#allocation2 + $0x38] sm:$0xff]  ;;  %146 = vmatpush1.msra.mxu1 %v47_v16  ;;  %s5998_s0 = smov 4   ;;  %s5999_s1 = smov 8   ;;  %vm5098_vm5 = vcmask 31744  }
  0x17   :  { %v40_v10 = vld [vmem:[#allocation2 + $0x88] sm:$0xff]  ;;  %5128 = vmatmul.mubr.msk.f32.vlgmr.msra.gmra.mrb[0].mxu0 %vm70_vm0, %v6038_v3  ;;  %v6044_v11 = vpack.c.bf16 %v31_v8, %v27_v6  ;;  %v35_v13 = vld [vmem:[#allocation2 + $0x60] sm:$0xff]  ;;  %v34_v18 = vld [vmem:[#allocation2 + $0x58] sm:$0xff]  ;;  %5129 = vmatmul.mubr.msk.f32.vlgmr.msra.gmra.mrb[0].mxu1 %vm70_vm0, %v6038_v3  ;;  %v6084_v32 = vsub.s32 0, %v51_v31  ;;  %v6086_v35 = vsub.s32 1, %v51_v31  ;;  %v6090_v40 = vsub.s32 3, %v51_v31 }
  0x18   :  { %v6046_v12 = vpack.c.bf16 %v40_v10, %v36_v9  ;;  %v39_v14 = vld [vmem:[#allocation2 + $0x80] sm:$0xff]  ;;  %5255 = vmatprep.subr.bf16.mxu0 %v6040_v7  ;;  %284 = vmatprep.mubr.f32.mxu0 %v5997_v0  ;;  %v6053_v20 = vpack.c.bf16 %v34_v18, %v30_v17  ;;  %v29_v21 = vld [vmem:[#allocation2 + $0x30] sm:$0xff]  ;;  %v38_v23 = vld [vmem:[#allocation2 + $0x78] sm:$0xff]  ;;  %v6098_v48 = vsub.s32 2, %v51_v31  ;;  %s6000_s25 = smov 12   ;;  %s6001_s26 = smov 16  }
  0x19   :  { %5257 = vmatpush1.bf16.msra.mxu0 %v6044_v11  ;;  %v6050_v19 = vpack.c.bf16 %v39_v14, %v35_v13  ;;  %v33_v22 = vld [vmem:[#allocation2 + $0x50] sm:$0xff]  ;;  %v42_v25 = vld [vmem:[#allocation2 + $0x98] sm:$0xff]  ;;  %355 = vmatprep.mubr.f32.mxu1 %v5997_v0  ;;  %s6002_s27 = smov 20   ;;  %s6003_s28 = smov 24   ;;  %vm5101_vm6 = vcmask 97280   ;;  %vm5103_vm7 = vcmask 130048  }
  0x1a   :  { %5259 = vmatprep.subr.bf16.mxu0 %v6046_v12  ;;  %v6056_v24 = vpack.c.bf16 %v33_v22, %v29_v21  ;;  %v37_v26 = vld [vmem:[#allocation2 + $0x70] sm:$0xff]  ;;  %5263 = vmatprep.subr.bf16.mxu1 %v6053_v20  ;;  %v6061_v28 = vpack.c.bf16 %v42_v25, %v38_v23  ;;  %s6004_s29 = smov 28   ;;  %vm5105_vm8 = vcmask 162816   ;;  %vm5107_vm9 = vcmask 195584   ;;  %s6005_s30 = smov [#allocation5]  }
  0x1b   :  { %v41_v27 = vld [vmem:[#allocation2 + $0x90] sm:$0xff]  ;;  %s5119_s3 = sshll.u32 %s6005_s30, 4  ;;  %vm5109_vm10 = vcmask 228352   ;;  %vm5111_vm11 = vcmask 254976   ;;  %s5120_s3 = int_to_ptr.vmem [resolvable:$true] %s5119_s3 }
  0x1c   :  { %5265 = vmatpush1.bf16.msra.mxu1 %v6056_v24  ;;  %v6064_v29 = vpack.c.bf16 %v41_v27, %v37_v26  ;;  %v44_v34 = vld [vmem:[#allocation2 + $0xa0] ss:$8 sm:$0xf]  ;;  %s5968_s4 = scalar_lea.vmem %s5120_s3, 32  ;;  %p5973_p9 = scmp.lt.s32.totalorder %s5120_s3, %s5120_s3 }
  0x1d   :  { %5261 = vmatpush1.bf16.msra.mxu0 %v6050_v19  ;;  %5267 = vmatprep.subr.bf16.mxu1 %v6061_v28  ;;  %v53_v37 = vrot.slane %v44_v34, %v6084_v32  ;;  %v57_v39 = vrot.slane %v44_v34, %v6086_v35  ;;  %v65_v45 = vrot.slane %v44_v34, %v6090_v40  ;;  %p5969_p8 = scmp.ne.s32.totalorder %s5120_s3, %s5968_s4  ;;  %p5974_p10 = scmp.lt.s32.totalorder %s5968_s4, %s5968_s4 }
  0x1e   :  { %5271 = vmatprep.subr.bf16.mxu0 %v6040_v7  ;;  %v61_v55 = vrot.slane %v44_v34, %v6098_v48 }
  0x1f   :  { %p5975_p11 = por %p5974_p10, %p5973_p9 }
  0x20   :  { %285 = vmatmul.mubr.f32.vlgmr.msra.gmra.mrb[2].mxu0 %v5997_v0  ;;  %5269 = vmatpush1.bf16.msra.mxu1 %v6064_v29 }
  0x21   :  { %5279 = vmatprep.subr.bf16.mxu1 %v6053_v20  ;;  %5273 = vmatpush1.bf16.msra.mxu0 %v6044_v11  ;;  %p5976_p12 = pnand %p5975_p11, %p5969_p8 }
  0x22   :  { %5275 = vmatprep.subr.bf16.mxu0 %v6046_v12  ;;  %457 = vmatprep.mubr.f32.mxu0 %v5997_v0 }
  0x23   :  { %356 = vmatmul.mubr.f32.vlgmr.msra.gmra.mrb[2].mxu1 %v5997_v0 }
  0x24   :  { %5281 = vmatpush1.bf16.msra.mxu1 %v6056_v24  ;;  %528 = vmatprep.mubr.f32.mxu1 %v5997_v0 }
  0x25   :  { %5283 = vmatprep.subr.bf16.mxu1 %v6061_v28  ;;  %5277 = vmatpush1.bf16.msra.mxu0 %v6050_v19 }
  0x26   :  { %5287 = vmatprep.subr.bf16.mxu0 %v6040_v7 }
  0x28   :  { %5285 = vmatpush1.bf16.msra.mxu1 %v6064_v29 }
  0x29   :  { %5295 = vmatprep.subr.bf16.mxu1 %v6053_v20 }
  0xea   :  { %v140_v33 = vpop.f32.mrb[0].mxu0  ;;  %v211_v38 = vpop.f32.mrb[0].mxu1 }
  0xeb   :  { %v142_v36 = vpop.f32.mrb[1].mxu0  ;;  %v213_v41 = vpop.f32.mrb[1].mxu1  ;;  %v6092_v42 = vadd.f32 %v140_v33, %v53_v37  ;;  %v6105_v57 = vadd.f32 %v211_v38, %v61_v55 }
  0xec   :  { %v6094_v43 = vadd.f32 %v142_v36, %v57_v39  ;;  %v6101_v53 = vadd.f32 %v213_v41, %v65_v45 }
  0xf3   :  { %v286_v44 = vpop.f32.mrb[2].mxu0 }
  0xf4   :  { %v362_v46 = vadd.f32 %v286_v44, %v6092_v42  ;;  %v288_v47 = vpop.f32.mrb[3].mxu0 }
  0xf5   :  { %v363_v49 = vadd.f32 %v288_v47, %v6094_v43 }
  0xf6   :  { %v5130_v50 = vmul.f32 -1.442695, %v362_v46  ;;  %v357_v51 = vpop.f32.mrb[2].mxu1 }
  0xf7   :  { %v5131_v52 = vmul.f32 -1.442695, %v363_v49  ;;  %v359_v54 = vpop.f32.mrb[3].mxu1  ;;  %v364_v59 = vadd.f32 %v357_v51, %v6105_v57 }
  0xf8   :  { %5562 = vpow2.f32 %v5130_v50  ;;  %v365_v56 = vadd.f32 %v359_v54, %v6101_v53 }
  0xf9   :  { %5564 = vpow2.f32 %v5131_v52 }
  0xfa   :  { %v5132_v58 = vmul.f32 -1.442695, %v365_v56 }
  0xfc   :  { %5566 = vpow2.f32 %v5132_v58 }
  0xfd   :  { %5568 = vtanh.f32 %v364_v59 }
 0x102   :  { %v5563_v60 = vpop.eup %5562 }
 0x103   :  { %v5565_v61 = vpop.eup %5564  ;;  %v369_v62 = vadd.f32 1.0, %v5563_v60 }
 0x104   :  { %v375_v63 = vadd.f32 1.0, %v5565_v61 }
 0x105   :  { %5570 = vrcp.f32 %v369_v62 }
 0x106   :  { %5572 = vrcp.f32 %v375_v63  ;;  %v5567_v1 = vpop.eup %5566 }
 0x107   :  { %v5569_v2 = vpop.eup %5568  ;;  %v382_v8 = vadd.f32 1.0, %v5567_v1 }
 0x109   :  { %5574 = vrcp.f32 %v382_v8 }
 0x10f   :  { %v5571_v4 = vpop.eup %5570 }
 0x110   :  { %v5573_v5 = vpop.eup %5572  ;;  %v386_v6 = vmul.f32 %v5571_v4, %v5569_v2 }
 0x111   :  { %v385_v9 = vmul.f32 0.0, %v5573_v5 }
 0x113   :  { %v387_v10 = vadd.f32 %v386_v6, %v385_v9  ;;  %v5575_v13 = vpop.eup %5574 }
 0x115   :  { %5576 = vtanh.f32 %v387_v10 }
 0x11f   :  { %v5577_v14 = vpop.eup %5576 }
 0x120   :  { %v6108_v15 = vmul.f32 %v5577_v14, %v5575_v13 }
 0x122   :  { %5133 = vmatmul.mubr.msk.f32.vlgmr.msra.gmra.mrb[4].mxu0 %vm216_vm1, %v6108_v15  ;;  %5134 = vmatmul.mubr.msk.f32.vlgmr.msra.gmra.mrb[4].mxu1 %vm216_vm1, %v6108_v15 }
 0x123   :  { %5289 = vmatpush1.bf16.msra.mxu0 %v6044_v11  ;;  %5297 = vmatpush1.bf16.msra.mxu1 %v6056_v24 }
 0x124   :  { %5291 = vmatprep.subr.bf16.mxu0 %v6046_v12  ;;  %5299 = vmatprep.subr.bf16.mxu1 %v6061_v28 }
 0x125   :  { %630 = vmatprep.mubr.f32.mxu0 %v5997_v0  ;;  %701 = vmatprep.mubr.f32.mxu1 %v5997_v0 }
 0x127   :  { %5293 = vmatpush1.bf16.msra.mxu0 %v6050_v19  ;;  %5301 = vmatpush1.bf16.msra.mxu1 %v6064_v29 }
 0x128   :  { %5303 = vmatprep.subr.bf16.mxu0 %v6040_v7  ;;  %5311 = vmatprep.subr.bf16.mxu1 %v6053_v20 }
 0x1f5   :  { %v459_v16 = vpop.f32.mrb[4].mxu0  ;;  %v530_v17 = vpop.f32.mrb[4].mxu1 }
 0x1f6   :  { %v535_v18 = vadd.f32 %v459_v16, %v6092_v42  ;;  %v461_v21 = vpop.f32.mrb[5].mxu0  ;;  %v532_v22 = vpop.f32.mrb[5].mxu1  ;;  %v537_v31 = vadd.f32 %v530_v17, %v6105_v57 }
 0x1f7   :  { %v536_v23 = vadd.f32 %v461_v21, %v6094_v43  ;;  %v538_v27 = vadd.f32 %v532_v22, %v6101_v53 }
 0x1f8   :  { %v5135_v25 = vmul.f32 -1.442695, %v535_v18 }
 0x1f9   :  { %v5136_v26 = vmul.f32 -1.442695, %v536_v23  ;;  %v5137_v30 = vmul.f32 -1.442695, %v538_v27 }
 0x1fa   :  { %5578 = vpow2.f32 %v5135_v25 }
 0x1fb   :  { %5580 = vpow2.f32 %v5136_v26 }
 0x1fc   :  { %5582 = vpow2.f32 %v5137_v30 }
 0x1fd   :  { %5584 = vtanh.f32 %v537_v31 }
 0x204   :  { %v5579_v33 = vpop.eup %5578 }
 0x205   :  { %v5581_v34 = vpop.eup %5580  ;;  %v542_v36 = vadd.f32 1.0, %v5579_v33 }
 0x206   :  { %v548_v37 = vadd.f32 1.0, %v5581_v34  ;;  %v5583_v38 = vpop.eup %5582 }
 0x207   :  { %5586 = vrcp.f32 %v542_v36  ;;  %v5585_v39 = vpop.eup %5584  ;;  %v555_v46 = vadd.f32 1.0, %v5583_v38 }
 0x208   :  { %5588 = vrcp.f32 %v548_v37 }
 0x209   :  { %5590 = vrcp.f32 %v555_v46 }
 0x211   :  { %v5587_v41 = vpop.eup %5586 }
 0x212   :  { %v5589_v44 = vpop.eup %5588  ;;  %v559_v45 = vmul.f32 %v5587_v41, %v5585_v39 }
 0x213   :  { %v558_v47 = vmul.f32 %v5589_v44, %v387_v10  ;;  %v5591_v50 = vpop.eup %5590 }
 0x215   :  { %v560_v49 = vadd.f32 %v559_v45, %v558_v47 }
 0x217   :  { %5592 = vtanh.f32 %v560_v49 }
 0x221   :  { %v5593_v51 = vpop.eup %5592 }
 0x222   :  { %v562_v52 = vmul.f32 %v5593_v51, %v5591_v50 }
 0x224   :  { %5138 = vmatmul.mubr.msk.f32.vlgmr.msra.gmra.mrb[6].mxu0 %vm216_vm1, %v562_v52  ;;  %5139 = vmatmul.mubr.msk.f32.vlgmr.msra.gmra.mrb[6].mxu1 %vm216_vm1, %v562_v52  ;;  %v3167_v25 = vrot.slane %v562_v52, 6 }
 0x225   :  { %5305 = vmatpush1.bf16.msra.mxu0 %v6044_v11  ;;  %5313 = vmatpush1.bf16.msra.mxu1 %v6056_v24 }
 0x226   :  { %5307 = vmatprep.subr.bf16.mxu0 %v6046_v12  ;;  %5315 = vmatprep.subr.bf16.mxu1 %v6061_v28  ;;  %v3181_v30 = vsel %vm3180_vm2, %v6108_v15, %v3167_v25 }
 0x227   :  { %803 = vmatprep.mubr.f32.mxu0 %v5997_v0  ;;  %874 = vmatprep.mubr.f32.mxu1 %v5997_v0 }
 0x229   :  { %5309 = vmatpush1.bf16.msra.mxu0 %v6050_v19  ;;  %5317 = vmatpush1.bf16.msra.mxu1 %v6064_v29 }
 0x22a   :  { %5319 = vmatprep.subr.bf16.mxu0 %v6040_v7  ;;  %5327 = vmatprep.subr.bf16.mxu1 %v6053_v20 }
 0x2f7   :  { %v632_v54 = vpop.f32.mrb[6].mxu0  ;;  %v703_v55 = vpop.f32.mrb[6].mxu1 }
 0x2f8   :  { %v708_v56 = vadd.f32 %v632_v54, %v6092_v42  ;;  %v634_v58 = vpop.f32.mrb[7].mxu0  ;;  %v705_v59 = vpop.f32.mrb[7].mxu1  ;;  %v710_v2 = vadd.f32 %v703_v55, %v6105_v57 }
 0x2f9   :  { %v709_v60 = vadd.f32 %v634_v58, %v6094_v43  ;;  %v711_v63 = vadd.f32 %v705_v59, %v6101_v53 }
 0x2fa   :  { %v5140_v61 = vmul.f32 -1.442695, %v708_v56 }
 0x2fb   :  { %v5141_v62 = vmul.f32 -1.442695, %v709_v60  ;;  %v5142_v1 = vmul.f32 -1.442695, %v711_v63 }
 0x2fc   :  { %5594 = vpow2.f32 %v5140_v61 }
 0x2fd   :  { %5596 = vpow2.f32 %v5141_v62 }
 0x2fe   :  { %5598 = vpow2.f32 %v5142_v1 }
 0x2ff   :  { %5600 = vtanh.f32 %v710_v2 }
 0x306   :  { %v5595_v4 = vpop.eup %5594 }
 0x307   :  { %v5597_v5 = vpop.eup %5596  ;;  %v715_v6 = vadd.f32 1.0, %v5595_v4 }
 0x308   :  { %v721_v8 = vadd.f32 1.0, %v5597_v5  ;;  %v5599_v9 = vpop.eup %5598 }
 0x309   :  { %5602 = vrcp.f32 %v715_v6  ;;  %v5601_v10 = vpop.eup %5600  ;;  %v728_v17 = vadd.f32 1.0, %v5599_v9 }
 0x30a   :  { %5604 = vrcp.f32 %v721_v8 }
 0x30b   :  { %5606 = vrcp.f32 %v728_v17 }
 0x313   :  { %v5603_v13 = vpop.eup %5602 }
 0x314   :  { %v5605_v14 = vpop.eup %5604  ;;  %v732_v16 = vmul.f32 %v5603_v13, %v5601_v10 }
 0x315   :  { %v731_v18 = vmul.f32 %v5605_v14, %v560_v49  ;;  %v5607_v22 = vpop.eup %5606 }
 0x317   :  { %v733_v21 = vadd.f32 %v732_v16, %v731_v18 }
 0x319   :  { %5608 = vtanh.f32 %v733_v21 }
 0x323   :  { %v5609_v23 = vpop.eup %5608 }
 0x324   :  { %v735_v26 = vmul.f32 %v5609_v23, %v5607_v22 }
 0x326   :  { %5143 = vmatmul.mubr.msk.f32.vlgmr.msra.gmra.mrb[8].mxu0 %vm216_vm1, %v735_v26  ;;  %5144 = vmatmul.mubr.msk.f32.vlgmr.msra.gmra.mrb[8].mxu1 %vm216_vm1, %v735_v26  ;;  %v3169_v27 = vrot.slane %v735_v26, 4 }
 0x327   :  { %5321 = vmatpush1.bf16.msra.mxu0 %v6044_v11  ;;  %5329 = vmatpush1.bf16.msra.mxu1 %v6056_v24 }
 0x328   :  { %5323 = vmatprep.subr.bf16.mxu0 %v6046_v12  ;;  %5331 = vmatprep.subr.bf16.mxu1 %v6061_v28  ;;  %v3183_v31 = vsel %vm3182_vm3, %v3181_v30, %v3169_v27 }
 0x329   :  { %976 = vmatprep.mubr.f32.mxu0 %v5997_v0  ;;  %1047 = vmatprep.mubr.f32.mxu1 %v5997_v0 }
 0x32b   :  { %5325 = vmatpush1.bf16.msra.mxu0 %v6050_v19  ;;  %5333 = vmatpush1.bf16.msra.mxu1 %v6064_v29 }
 0x32c   :  { %5335 = vmatprep.subr.bf16.mxu0 %v6040_v7  ;;  %5343 = vmatprep.subr.bf16.mxu1 %v6053_v20 }
 0x3f9   :  { %v805_v33 = vpop.f32.mrb[8].mxu0  ;;  %v876_v15 = vpop.f32.mrb[8].mxu1 }
 0x3fa   :  { %v881_v34 = vadd.f32 %v805_v33, %v6092_v42  ;;  %v807_v36 = vpop.f32.mrb[9].mxu0  ;;  %v878_v37 = vpop.f32.mrb[9].mxu1  ;;  %v883_v46 = vadd.f32 %v876_v15, %v6105_v57 }
 0x3fb   :  { %v882_v38 = vadd.f32 %v807_v36, %v6094_v43  ;;  %v884_v44 = vadd.f32 %v878_v37, %v6101_v53 }
 0x3fc   :  { %v5145_v39 = vmul.f32 -1.442695, %v881_v34 }
 0x3fd   :  { %v5146_v41 = vmul.f32 -1.442695, %v882_v38  ;;  %v5147_v45 = vmul.f32 -1.442695, %v884_v44 }
 0x3fe   :  { %5610 = vpow2.f32 %v5145_v39 }
 0x3ff   :  { %5612 = vpow2.f32 %v5146_v41 }
 0x400   :  { %5614 = vpow2.f32 %v5147_v45 }
 0x401   :  { %5616 = vtanh.f32 %v883_v46 }
 0x408   :  { %v5611_v47 = vpop.eup %5610 }
 0x409   :  { %v5613_v49 = vpop.eup %5612  ;;  %v888_v50 = vadd.f32 1.0, %v5611_v47 }
 0x40a   :  { %v894_v51 = vadd.f32 1.0, %v5613_v49  ;;  %v5615_v52 = vpop.eup %5614 }
 0x40b   :  { %5618 = vrcp.f32 %v888_v50  ;;  %v5617_v54 = vpop.eup %5616  ;;  %v901_v59 = vadd.f32 1.0, %v5615_v52 }
 0x40c   :  { %5620 = vrcp.f32 %v894_v51 }
 0x40d   :  { %5622 = vrcp.f32 %v901_v59 }
 0x415   :  { %v5619_v55 = vpop.eup %5618 }
 0x416   :  { %v5621_v56 = vpop.eup %5620  ;;  %v905_v58 = vmul.f32 %v5619_v55, %v5617_v54 }
 0x417   :  { %v904_v60 = vmul.f32 %v5621_v56, %v733_v21  ;;  %v5623_v62 = vpop.eup %5622 }
 0x419   :  { %v906_v61 = vadd.f32 %v905_v58, %v904_v60 }
 0x41b   :  { %5624 = vtanh.f32 %v906_v61 }
 0x425   :  { %v5625_v63 = vpop.eup %5624 }
 0x426   :  { %v908_v1 = vmul.f32 %v5625_v63, %v5623_v62 }
 0x428   :  { %5148 = vmatmul.mubr.msk.f32.vlgmr.msra.gmra.mrb[10].mxu0 %vm216_vm1, %v908_v1  ;;  %5149 = vmatmul.mubr.msk.f32.vlgmr.msra.gmra.mrb[10].mxu1 %vm216_vm1, %v908_v1  ;;  %v3171_v2 = vrot.slane %v908_v1, 2 }
 0x429   :  { %5337 = vmatpush1.bf16.msra.mxu0 %v6044_v11  ;;  %5345 = vmatpush1.bf16.msra.mxu1 %v6056_v24 }
 0x42a   :  { %5339 = vmatprep.subr.bf16.mxu0 %v6046_v12  ;;  %5347 = vmatprep.subr.bf16.mxu1 %v6061_v28  ;;  %v6170_v4 = vsel %vm3184_vm4, %v3183_v31, %v3171_v2 }
 0x42b   :  { %1149 = vmatprep.mubr.f32.mxu0 %v5997_v0  ;;  %1220 = vmatprep.mubr.f32.mxu1 %v5997_v0 }
 0x42d   :  { %5341 = vmatpush1.bf16.msra.mxu0 %v6050_v19  ;;  %5349 = vmatpush1.bf16.msra.mxu1 %v6064_v29 }
 0x42e   :  { %5351 = vmatprep.subr.bf16.mxu0 %v6040_v7  ;;  %5359 = vmatprep.subr.bf16.mxu1 %v6053_v20 }
 0x4fb   :  { %v978_v5 = vpop.f32.mrb[10].mxu0  ;;  %v1049_v6 = vpop.f32.mrb[10].mxu1 }
 0x4fc   :  { %v1054_v8 = vadd.f32 %v978_v5, %v6092_v42  ;;  %v980_v9 = vpop.f32.mrb[11].mxu0  ;;  %v1051_v10 = vpop.f32.mrb[11].mxu1  ;;  %v1056_v21 = vadd.f32 %v1049_v6, %v6105_v57 }
 0x4fd   :  { %v1055_v13 = vadd.f32 %v980_v9, %v6094_v43  ;;  %v1057_v17 = vadd.f32 %v1051_v10, %v6101_v53 }
 0x4fe   :  { %v5150_v14 = vmul.f32 -1.442695, %v1054_v8 }
 0x4ff   :  { %v5151_v16 = vmul.f32 -1.442695, %v1055_v13  ;;  %v5152_v18 = vmul.f32 -1.442695, %v1057_v17  ;;  %v1620_v13 = vld [vmem:[#allocation2 + $0xc8] sm:$0xff] }
 0x500   :  { %5626 = vpow2.f32 %v5150_v14  ;;  %v1622_v14 = vld [vmem:[#allocation2 + $0xd8] sm:$0xff] }
 0x501   :  { %5628 = vpow2.f32 %v5151_v16 }
 0x502   :  { %5630 = vpow2.f32 %v5152_v18 }
 0x503   :  { %5632 = vtanh.f32 %v1056_v21 }
 0x50a   :  { %v5627_v22 = vpop.eup %5626 }
 0x50b   :  { %v5629_v23 = vpop.eup %5628  ;;  %v1061_v25 = vadd.f32 1.0, %v5627_v22 }
 0x50c   :  { %v1067_v26 = vadd.f32 1.0, %v5629_v23  ;;  %v5631_v27 = vpop.eup %5630 }
 0x50d   :  { %5634 = vrcp.f32 %v1061_v25  ;;  %v5633_v30 = vpop.eup %5632  ;;  %v1074_v34 = vadd.f32 1.0, %v5631_v27 }
 0x50e   :  { %5636 = vrcp.f32 %v1067_v26 }
 0x50f   :  { %5638 = vrcp.f32 %v1074_v34 }
 0x517   :  { %v5635_v31 = vpop.eup %5634 }
 0x518   :  { %v5637_v33 = vpop.eup %5636  ;;  %v1078_v15 = vmul.f32 %v5635_v31, %v5633_v30 }
 0x519   :  { %v1077_v36 = vmul.f32 %v5637_v33, %v906_v61  ;;  %v5639_v38 = vpop.eup %5638 }
 0x51b   :  { %v1079_v37 = vadd.f32 %v1078_v15, %v1077_v36 }
 0x51d   :  { %5640 = vtanh.f32 %v1079_v37 }
 0x527   :  { %v5641_v39 = vpop.eup %5640 }
 0x528   :  { %v6182_v41 = vmul.f32 %v5641_v39, %v5639_v38  ;;  %v1602_v39 = vld [vmem:[#allocation2 + $0xe8] sm:$0xff] }
 0x52a   :  { %5153 = vmatmul.mubr.msk.f32.vlgmr.msra.gmra.mrb[12].mxu0 %vm216_vm1, %v6182_v41  ;;  %5154 = vmatmul.mubr.msk.f32.vlgmr.msra.gmra.mrb[12].mxu1 %vm216_vm1, %v6182_v41 }
 0x52b   :  { %5353 = vmatpush1.bf16.msra.mxu0 %v6044_v11  ;;  %5361 = vmatpush1.bf16.msra.mxu1 %v6056_v24 }
 0x52c   :  { %5355 = vmatprep.subr.bf16.mxu0 %v6046_v12  ;;  %5363 = vmatprep.subr.bf16.mxu1 %v6061_v28 }
 0x52d   :  { %1322 = vmatprep.mubr.f32.mxu0 %v5997_v0  ;;  %1393 = vmatprep.mubr.f32.mxu1 %v5997_v0 }
 0x52f   :  { %5357 = vmatpush1.bf16.msra.mxu0 %v6050_v19  ;;  %5365 = vmatpush1.bf16.msra.mxu1 %v6064_v29 }
 0x530   :  { %5367 = vmatprep.subr.bf16.mxu0 %v6040_v7  ;;  %5375 = vmatprep.subr.bf16.mxu1 %v6053_v20 }
 0x5fd   :  { %v1151_v44 = vpop.f32.mrb[12].mxu0  ;;  %v1222_v45 = vpop.f32.mrb[12].mxu1 }
 0x5fe   :  { %v1227_v46 = vadd.f32 %v1151_v44, %v6092_v42  ;;  %v1153_v47 = vpop.f32.mrb[13].mxu0  ;;  %v1224_v49 = vpop.f32.mrb[13].mxu1  ;;  %v1229_v56 = vadd.f32 %v1222_v45, %v6105_v57  ;;  %v1606_v44 = vld [vmem:[#allocation2 + $0x108] sm:$0xff] }
 0x5ff   :  { %v1228_v50 = vadd.f32 %v1153_v47, %v6094_v43  ;;  %v1230_v54 = vadd.f32 %v1224_v49, %v6101_v53  ;;  %v1608_v47 = vld [vmem:[#allocation2 + $0x118] sm:$0xff] }
 0x600   :  { %v5155_v51 = vmul.f32 -1.442695, %v1227_v46  ;;  %v1604_v46 = vld [vmem:[#allocation2 + $0xf8] sm:$0xff] }
 0x601   :  { %v5156_v52 = vmul.f32 -1.442695, %v1228_v50  ;;  %v5157_v55 = vmul.f32 -1.442695, %v1230_v54  ;;  %v1619_v50 = vld [vmem:[#allocation2 + $0xc0] sm:$0xff] }
 0x602   :  { %5642 = vpow2.f32 %v5155_v51  ;;  %v1601_v51 = vld [vmem:[#allocation2 + $0xe0] sm:$0xff] }
 0x603   :  { %5644 = vpow2.f32 %v5156_v52 }
 0x604   :  { %5646 = vpow2.f32 %v5157_v55  ;;  %v6224_v55 = vpack.c.bf16 %v1606_v44, %v1602_v39 }
 0x605   :  { %5648 = vtanh.f32 %v1229_v56  ;;  %v1605_v56 = vld [vmem:[#allocation2 + $0x100] sm:$0xff] }
 0x60c   :  { %v5643_v7 = vpop.eup %5642 }
 0x60d   :  { %v5645_v58 = vpop.eup %5644  ;;  %v1234_v20 = vadd.f32 1.0, %v5643_v7  ;;  %v1610_v7 = vld [vmem:[#allocation2 + $0x128] sm:$0xff] }
 0x60e   :  { %v1240_v59 = vadd.f32 1.0, %v5645_v58  ;;  %v5647_v60 = vpop.eup %5646  ;;  %v1614_v58 = vld [vmem:[#allocation2 + $0x148] sm:$0xff] }
 0x60f   :  { %5650 = vrcp.f32 %v1234_v20  ;;  %v5649_v61 = vpop.eup %5648  ;;  %v1247_v2 = vadd.f32 1.0, %v5647_v60  ;;  %v1621_v20 = vld [vmem:[#allocation2 + $0xd0] sm:$0xff] }
 0x610   :  { %5652 = vrcp.f32 %v1240_v59  ;;  %v6226_v59 = vpack.c.bf16 %v1608_v47, %v1604_v46  ;;  %v1603_v60 = vld [vmem:[#allocation2 + $0xf0] sm:$0xff] }
 0x611   :  { %5654 = vrcp.f32 %v1247_v2  ;;  %v6231_v2 = vpack.c.bf16 %v1605_v56, %v1601_v51 }
 0x619   :  { %v5651_v62 = vpop.eup %5650 }
 0x61a   :  { %v5653_v63 = vpop.eup %5652  ;;  %v1251_v1 = vmul.f32 %v5651_v62, %v5649_v61  ;;  %v1607_v61 = vld [vmem:[#allocation2 + $0x110] sm:$0xff]  ;;  %v1612_v62 = vld [vmem:[#allocation2 + $0x138] sm:$0xff] }
 0x61b   :  { %v1250_v5 = vmul.f32 %v5653_v63, %v1079_v37  ;;  %v5655_v8 = vpop.eup %5654  ;;  %v1616_v63 = vld [vmem:[#allocation2 + $0x158] sm:$0xff] }
 0x61d   :  { %v1252_v6 = vadd.f32 %v1251_v1, %v1250_v5 }
 0x61f   :  { %5656 = vtanh.f32 %v1252_v6 }
 0x629   :  { %v5657_v9 = vpop.eup %5656 }
 0x62a   :  { %v6202_v10 = vmul.f32 %v5657_v9, %v5655_v8  ;;  %v1609_v8 = vld [vmem:[#allocation2 + $0x120] sm:$0xff] }
 0x62b   :  { %v1613_v9 = vld [vmem:[#allocation2 + $0x140] sm:$0xff] }
 0x62c   :  { %5158 = vmatmul.mubr.msk.f32.vlgmr.msra.gmra.mrb[14].mxu0 %vm216_vm1, %v6202_v10  ;;  %5159 = vmatmul.mubr.msk.f32.vlgmr.msra.gmra.mrb[14].mxu1 %vm216_vm1, %v6202_v10  ;;  %v3173_v52 = vrot.slane %v6202_v10, 6  ;;  %v6238_v10 = vpack.c.bf16 %v1607_v61, %v1603_v60 }
 0x62d   :  { %5369 = vmatpush1.bf16.msra.mxu0 %v6044_v11  ;;  %5377 = vmatpush1.bf16.msra.mxu1 %v6056_v24 }
 0x62e   :  { %5371 = vmatprep.subr.bf16.mxu0 %v6046_v12  ;;  %5379 = vmatprep.subr.bf16.mxu1 %v6061_v28  ;;  %v3186_v5 = vsel %vm3180_vm2, %v6182_v41, %v3173_v52  ;;  %v1615_v41 = vld [vmem:[#allocation2 + $0x150] sm:$0xff] }
 0x62f   :  { %1495 = vmatprep.mubr.f32.mxu0 %v5997_v0  ;;  %1566 = vmatprep.mubr.f32.mxu1 %v5997_v0 }
 0x631   :  { %5373 = vmatpush1.bf16.msra.mxu0 %v6050_v19  ;;  %5381 = vmatpush1.bf16.msra.mxu1 %v6064_v29 }
 0x632   :  { %1644 = vmatprep.subr.mxu0 %v1620_v13  ;;  %1715 = vmatprep.subr.mxu1 %v1622_v14  ;;  %v6245_v14 = vpack.c.bf16 %v1616_v63, %v1612_v62 }
 0x6ff   :  { %v1324_v16 = vpop.f32.mrb[14].mxu0  ;;  %v1395_v11 = vpop.f32.mrb[14].mxu1 }
 0x700   :  { %v1400_v24 = vadd.f32 %v1324_v16, %v6092_v42  ;;  %v1326_v17 = vpop.f32.mrb[15].mxu0  ;;  %v1397_v12 = vpop.f32.mrb[15].mxu1  ;;  %v1402_v29 = vadd.f32 %v1395_v11, %v6105_v57  ;;  %v1611_v16 = vld [vmem:[#allocation2 + $0x130] sm:$0xff]  ;;  %v6252_v11 = vpack.c.bf16 %v1613_v9, %v1609_v8 }
 0x701   :  { %v1401_v28 = vadd.f32 %v1326_v17, %v6094_v43  ;;  %v1403_v19 = vadd.f32 %v1397_v12, %v6101_v53 }
 0x702   :  { %v5160_v18 = vmul.f32 -1.442695, %v1400_v24  ;;  %v6257_v24 = vpack.c.bf16 %v1615_v41, %v1611_v16 }
 0x703   :  { %v5161_v21 = vmul.f32 -1.442695, %v1401_v28  ;;  %v5162_v22 = vmul.f32 -1.442695, %v1403_v19 }
 0x704   :  { %5658 = vpow2.f32 %v5160_v18 }
 0x705   :  { %5660 = vpow2.f32 %v5161_v21 }
 0x706   :  { %5662 = vpow2.f32 %v5162_v22  ;;  %v1618_v22 = vld [vmem:[#allocation2 + $0x160] ss:$8 sm:$0xf] }
 0x707   :  { %5664 = vtanh.f32 %v1402_v29 }
 0x70e   :  { %v5659_v23 = vpop.eup %5658 }
 0x70f   :  { %v5661_v25 = vpop.eup %5660  ;;  %v1407_v26 = vadd.f32 1.0, %v5659_v23 }
 0x710   :  { %v1413_v27 = vadd.f32 1.0, %v5661_v25  ;;  %v5663_v30 = vpop.eup %5662 }
 0x711   :  { %5666 = vrcp.f32 %v1407_v26  ;;  %v5665_v31 = vpop.eup %5664  ;;  %v1420_v36 = vadd.f32 1.0, %v5663_v30  ;;  %v1627_v30 = vrot.slane %v1618_v22, %v6084_v32 }
 0x712   :  { %5668 = vrcp.f32 %v1413_v27 }
 0x713   :  { %5670 = vrcp.f32 %v1420_v36 }
 0x71b   :  { %v5667_v33 = vpop.eup %5666 }
 0x71c   :  { %v5669_v15 = vpop.eup %5668  ;;  %v1424_v34 = vmul.f32 %v5667_v33, %v5665_v31  ;;  %v1631_v33 = vrot.slane %v1618_v22, %v6086_v35 }
 0x71d   :  { %v1423_v37 = vmul.f32 %v5669_v15, %v1252_v6  ;;  %v5671_v45 = vpop.eup %5670  ;;  %v6236_v6 = vpack.c.bf16 %v1614_v58, %v1610_v7 }
 0x71f   :  { %v6220_v38 = vadd.f32 %v1424_v34, %v1423_v37 }
 0x721   :  { %5672 = vtanh.f32 %v6220_v38 }
 0x72b   :  { %v5673_v49 = vpop.eup %5672 }
 0x72c   :  { %v1427_v54 = vmul.f32 %v5673_v49, %v5671_v45 }
 0x72e   :  { %5163 = vmatmul.mubr.msk.f32.vlgmr.msra.gmra.mrb[16].mxu0 %vm216_vm1, %v1427_v54  ;;  %5164 = vmatmul.mubr.msk.f32.vlgmr.msra.gmra.mrb[16].mxu1 %vm216_vm1, %v1427_v54  ;;  %v3175_v1 = vrot.slane %v1427_v54, 4  ;;  %v1635_v54 = vrot.slane %v1618_v22, %v6098_v48 }
 0x72f   :  { %1645 = vmatpush1.msra.mxu0 %v1619_v50  ;;  %1708 = vmatprep.mubr.f32.mxu0 %v5997_v0 }
 0x730   :  { %5383 = vmatprep.subr.bf16.mxu0 %v6224_v55  ;;  %1716 = vmatpush1.msra.mxu1 %v1621_v20  ;;  %v6241_v13 = vsel %vm3182_vm3, %v3186_v5, %v3175_v1 }
 0x731   :  { %1779 = vmatprep.mubr.f32.mxu1 %v5997_v0  ;;  %5391 = vmatprep.subr.bf16.mxu1 %v6226_v59 }
 0x732   :  { %5168 = vmatmul.mubr.msk.f32.vlgmr.msra.gmra.mrb[18].mxu0 %vm70_vm0, %v6038_v3  ;;  %5169 = vmatmul.mubr.msk.f32.vlgmr.msra.gmra.mrb[18].mxu1 %vm70_vm0, %v6038_v3 }
 0x733   :  { %5385 = vmatpush1.bf16.msra.mxu0 %v6231_v2  ;;  %1850 = vmatprep.mubr.f32.mxu0 %v5997_v0 }
 0x734   :  { %5387 = vmatprep.subr.bf16.mxu0 %v6236_v6  ;;  %5393 = vmatpush1.bf16.msra.mxu1 %v6238_v10 }
 0x735   :  { %5395 = vmatprep.subr.bf16.mxu1 %v6245_v14  ;;  %1921 = vmatprep.mubr.f32.mxu1 %v5997_v0 }
 0x737   :  { %5389 = vmatpush1.bf16.msra.mxu0 %v6252_v11 }
 0x738   :  { %5397 = vmatpush1.bf16.msra.mxu1 %v6257_v24  ;;  %5399 = vmatprep.subr.bf16.mxu0 %v6224_v55 }
 0x739   :  { %5407 = vmatprep.subr.bf16.mxu1 %v6226_v59 }
 0x73a   :  { %1851 = vmatmul.mubr.f32.vlgmr.msra.gmra.mrb[20].mxu0 %v5997_v0 }
 0x73b   :  { %1922 = vmatmul.mubr.f32.vlgmr.msra.gmra.mrb[20].mxu1 %v5997_v0  ;;  %5401 = vmatpush1.bf16.msra.mxu0 %v6231_v2 }
 0x73c   :  { %5409 = vmatpush1.bf16.msra.mxu1 %v6238_v10  ;;  %5403 = vmatprep.subr.bf16.mxu0 %v6236_v6 }
 0x73d   :  { %5411 = vmatprep.subr.bf16.mxu1 %v6245_v14  ;;  %2023 = vmatprep.mubr.f32.mxu0 %v5997_v0 }
 0x73e   :  { %2094 = vmatprep.mubr.f32.mxu1 %v5997_v0 }
 0x73f   :  { %5405 = vmatpush1.bf16.msra.mxu0 %v6252_v11 }
 0x740   :  { %5413 = vmatpush1.bf16.msra.mxu1 %v6257_v24  ;;  %5415 = vmatprep.subr.bf16.mxu0 %v6224_v55 }
 0x741   :  { %5423 = vmatprep.subr.bf16.mxu1 %v6226_v59 }
 0x801   :  { %v1497_v3 = vpop.f32.mrb[16].mxu0  ;;  %v1568_v17 = vpop.f32.mrb[16].mxu1 }
 0x802   :  { %v1573_v12 = vadd.f32 %v1497_v3, %v6092_v42  ;;  %v1499_v28 = vpop.f32.mrb[17].mxu0  ;;  %v1570_v18 = vpop.f32.mrb[17].mxu1  ;;  %v1575_v42 = vadd.f32 %v1568_v17, %v6105_v57  ;;  %v1639_v57 = vrot.slane %v1618_v22, %v6090_v40 }
 0x803   :  { %v1574_v21 = vadd.f32 %v1499_v28, %v6094_v43  ;;  %v1576_v31 = vadd.f32 %v1570_v18, %v6101_v53 }
 0x804   :  { %v5165_v19 = vmul.f32 -1.442695, %v1573_v12 }
 0x805   :  { %v5166_v29 = vmul.f32 -1.442695, %v1574_v21  ;;  %v1710_v23 = vpop.f32.mrb[18].mxu0  ;;  %v1781_v25 = vpop.f32.mrb[18].mxu1  ;;  %v5167_v43 = vmul.f32 -1.442695, %v1576_v31 }
 0x806   :  { %5674 = vpow2.f32 %v5165_v19  ;;  %v1712_v26 = vpop.f32.mrb[19].mxu0  ;;  %v1783_v27 = vpop.f32.mrb[19].mxu1  ;;  %v6283_v15 = vadd.f32 %v1710_v23, %v1627_v30  ;;  %v6293_v7 = vadd.f32 %v1781_v25, %v1635_v54 }
 0x807   :  { %5676 = vpow2.f32 %v5166_v29  ;;  %v6285_v34 = vadd.f32 %v1712_v26, %v1631_v33  ;;  %v6291_v56 = vadd.f32 %v1783_v27, %v1639_v57 }
 0x808   :  { %5678 = vtanh.f32 %v1575_v42 }
 0x809   :  { %5680 = vpow2.f32 %v5167_v43 }
 0x80d   :  { %v1852_v36 = vpop.f32.mrb[20].mxu0 }
 0x80e   :  { %v1928_v37 = vadd.f32 %v1852_v36, %v6283_v15  ;;  %v1854_v39 = vpop.f32.mrb[21].mxu0  ;;  %v1923_v44 = vpop.f32.mrb[20].mxu1 }
 0x80f   :  { %v1929_v45 = vadd.f32 %v1854_v39, %v6285_v34  ;;  %v1925_v46 = vpop.f32.mrb[21].mxu1  ;;  %v1930_v60 = vadd.f32 %v1923_v44, %v6293_v7 }
 0x810   :  { %v5675_v47 = vpop.eup %5674  ;;  %v5170_v53 = vmul.f32 -1.442695, %v1928_v37  ;;  %v1931_v58 = vadd.f32 %v1925_v46, %v6291_v56 }
 0x811   :  { %v5677_v49 = vpop.eup %5676  ;;  %v1580_v50 = vadd.f32 1.0, %v5675_v47  ;;  %v5171_v52 = vmul.f32 -1.442695, %v1929_v45 }
 0x812   :  { %v1586_v51 = vadd.f32 1.0, %v5677_v49  ;;  %5682 = vpow2.f32 %v5170_v53  ;;  %v5679_v20 = vpop.eup %5678  ;;  %v5172_v5 = vmul.f32 -1.442695, %v1931_v58 }
 0x813   :  { %5684 = vrcp.f32 %v1580_v50  ;;  %v5681_v61 = vpop.eup %5680 }
 0x814   :  { %5686 = vrcp.f32 %v1586_v51  ;;  %v1593_v16 = vadd.f32 1.0, %v5681_v61 }
 0x815   :  { %5688 = vpow2.f32 %v5171_v52 }
 0x816   :  { %5690 = vtanh.f32 %v1930_v60 }
 0x81c   :  { %v5683_v62 = vpop.eup %5682 }
 0x81d   :  { %v5685_v63 = vpop.eup %5684  ;;  %v1935_v1 = vadd.f32 1.0, %v5683_v62 }
 0x81e   :  { %v5687_v8 = vpop.eup %5686  ;;  %v1597_v9 = vmul.f32 %v5685_v63, %v5679_v20 }
 0x81f   :  { %v1596_v41 = vmul.f32 %v5687_v8, %v6220_v38  ;;  %5692 = vrcp.f32 %v1935_v1  ;;  %v5689_v3 = vpop.eup %5688 }
 0x820   :  { %v1941_v12 = vadd.f32 1.0, %v5689_v3  ;;  %5694 = vpow2.f32 %v5172_v5  ;;  %v5691_v28 = vpop.eup %5690 }
 0x821   :  { %v1598_v17 = vadd.f32 %v1597_v9, %v1596_v41  ;;  %5696 = vrcp.f32 %v1593_v16 }
 0x823   :  { %5698 = vtanh.f32 %v1598_v17 }
 0x824   :  { %5700 = vrcp.f32 %v1941_v12 }
 0x829   :  { %v5693_v18 = vpop.eup %5692 }
 0x82a   :  { %v1952_v21 = vmul.f32 %v5693_v18, %v5691_v28  ;;  %v5695_v19 = vpop.eup %5694 }
 0x82b   :  { %v5697_v22 = vpop.eup %5696  ;;  %v1948_v25 = vadd.f32 1.0, %v5695_v19 }
 0x82d   :  { %v5699_v29 = vpop.eup %5698  ;;  %5702 = vrcp.f32 %v1948_v25 }
 0x82e   :  { %v5701_v23 = vpop.eup %5700  ;;  %v1600_v26 = vmul.f32 %v5699_v29, %v5697_v22 }
 0x82f   :  { %v1951_v27 = vmul.f32 0.0, %v5701_v23 }
 0x830   :  { %v3178_v30 = vrot.slane %v1600_v26, 2 }
 0x831   :  { %v1953_v38 = vadd.f32 %v1952_v21, %v1951_v27 }
 0x832   :  { %v6300_v31 = vsel %vm3184_vm4, %v6241_v13, %v3178_v30 }
 0x833   :  { %5704 = vtanh.f32 %v1953_v38 }
 0x837   :  { %v5703_v33 = vpop.eup %5702 }
 0x83d   :  { %v5705_v42 = vpop.eup %5704 }
 0x83e   :  { %v6302_v43 = vmul.f32 %v5705_v42, %v5703_v33 }
 0x840   :  { %5173 = vmatmul.mubr.msk.f32.vlgmr.msra.gmra.mrb[22].mxu0 %vm216_vm1, %v6302_v43  ;;  %5174 = vmatmul.mubr.msk.f32.vlgmr.msra.gmra.mrb[22].mxu1 %vm216_vm1, %v6302_v43 }
 0x841   :  { %5417 = vmatpush1.bf16.msra.mxu0 %v6231_v2  ;;  %5425 = vmatpush1.bf16.msra.mxu1 %v6238_v10 }
 0x842   :  { %5419 = vmatprep.subr.bf16.mxu0 %v6236_v6  ;;  %5427 = vmatprep.subr.bf16.mxu1 %v6245_v14 }
 0x843   :  { %2196 = vmatprep.mubr.f32.mxu0 %v5997_v0  ;;  %2267 = vmatprep.mubr.f32.mxu1 %v5997_v0 }
 0x845   :  { %5421 = vmatpush1.bf16.msra.mxu0 %v6252_v11  ;;  %5429 = vmatpush1.bf16.msra.mxu1 %v6257_v24 }
 0x846   :  { %5431 = vmatprep.subr.bf16.mxu0 %v6224_v55  ;;  %5439 = vmatprep.subr.bf16.mxu1 %v6226_v59 }
 0x913   :  { %v2025_v13 = vpop.f32.mrb[22].mxu0  ;;  %v2096_v36 = vpop.f32.mrb[22].mxu1 }
 0x914   :  { %v2101_v37 = vadd.f32 %v2025_v13, %v6283_v15  ;;  %v2027_v39 = vpop.f32.mrb[23].mxu0  ;;  %v2098_v44 = vpop.f32.mrb[23].mxu1  ;;  %v2103_v50 = vadd.f32 %v2096_v36, %v6293_v7 }
 0x915   :  { %v2102_v45 = vadd.f32 %v2027_v39, %v6285_v34  ;;  %v2104_v53 = vadd.f32 %v2098_v44, %v6291_v56 }
 0x916   :  { %v5175_v46 = vmul.f32 -1.442695, %v2101_v37 }
 0x917   :  { %v5176_v47 = vmul.f32 -1.442695, %v2102_v45  ;;  %v5177_v49 = vmul.f32 -1.442695, %v2104_v53 }
 0x918   :  { %5706 = vpow2.f32 %v5175_v46 }
 0x919   :  { %5708 = vpow2.f32 %v5176_v47 }
 0x91a   :  { %5710 = vpow2.f32 %v5177_v49 }
 0x91b   :  { %5712 = vtanh.f32 %v2103_v50 }
 0x922   :  { %v5707_v57 = vpop.eup %5706 }
 0x923   :  { %v5709_v51 = vpop.eup %5708  ;;  %v2108_v52 = vadd.f32 1.0, %v5707_v57 }
 0x924   :  { %v2114_v54 = vadd.f32 1.0, %v5709_v51  ;;  %v5711_v58 = vpop.eup %5710 }
 0x925   :  { %5714 = vrcp.f32 %v2108_v52  ;;  %v5713_v20 = vpop.eup %5712  ;;  %v2121_v63 = vadd.f32 1.0, %v5711_v58 }
 0x926   :  { %5716 = vrcp.f32 %v2114_v54 }
 0x927   :  { %5718 = vrcp.f32 %v2121_v63 }
 0x92f   :  { %v5715_v60 = vpop.eup %5714 }
 0x930   :  { %v5717_v61 = vpop.eup %5716  ;;  %v2125_v62 = vmul.f32 %v5715_v60, %v5713_v20 }
 0x931   :  { %v2124_v1 = vmul.f32 %v5717_v61, %v1953_v38  ;;  %v5719_v8 = vpop.eup %5718 }
 0x933   :  { %v2126_v5 = vadd.f32 %v2125_v62, %v2124_v1 }
 0x935   :  { %5720 = vtanh.f32 %v2126_v5 }
 0x93f   :  { %v5721_v9 = vpop.eup %5720 }
 0x940   :  { %v6322_v16 = vmul.f32 %v5721_v9, %v5719_v8 }
 0x942   :  { %5178 = vmatmul.mubr.msk.f32.vlgmr.msra.gmra.mrb[24].mxu0 %vm216_vm1, %v6322_v16  ;;  %5179 = vmatmul.mubr.msk.f32.vlgmr.msra.gmra.mrb[24].mxu1 %vm216_vm1, %v6322_v16 }
 0x943   :  { %5433 = vmatpush1.bf16.msra.mxu0 %v6231_v2  ;;  %5441 = vmatpush1.bf16.msra.mxu1 %v6238_v10 }
 0x944   :  { %5435 = vmatprep.subr.bf16.mxu0 %v6236_v6  ;;  %5443 = vmatprep.subr.bf16.mxu1 %v6245_v14 }
 0x945   :  { %2369 = vmatprep.mubr.f32.mxu0 %v5997_v0  ;;  %2440 = vmatprep.mubr.f32.mxu1 %v5997_v0 }
 0x947   :  { %5437 = vmatpush1.bf16.msra.mxu0 %v6252_v11  ;;  %5445 = vmatpush1.bf16.msra.mxu1 %v6257_v24 }
 0x948   :  { %5447 = vmatprep.subr.bf16.mxu0 %v6224_v55  ;;  %5455 = vmatprep.subr.bf16.mxu1 %v6226_v59 }
 0xa15   :  { %v2198_v41 = vpop.f32.mrb[24].mxu0  ;;  %v2269_v3 = vpop.f32.mrb[24].mxu1 }
 0xa16   :  { %v2274_v17 = vadd.f32 %v2198_v41, %v6283_v15  ;;  %v2200_v12 = vpop.f32.mrb[25].mxu0  ;;  %v2271_v28 = vpop.f32.mrb[25].mxu1  ;;  %v2276_v23 = vadd.f32 %v2269_v3, %v6293_v7 }
 0xa17   :  { %v2275_v18 = vadd.f32 %v2200_v12, %v6285_v34  ;;  %v2277_v22 = vadd.f32 %v2271_v28, %v6291_v56 }
 0xa18   :  { %v5180_v21 = vmul.f32 -1.442695, %v2274_v17 }
 0xa19   :  { %v5181_v19 = vmul.f32 -1.442695, %v2275_v18  ;;  %v5182_v29 = vmul.f32 -1.442695, %v2277_v22 }
 0xa1a   :  { %5722 = vpow2.f32 %v5180_v21 }
 0xa1b   :  { %5724 = vpow2.f32 %v5181_v19 }
 0xa1c   :  { %5726 = vpow2.f32 %v5182_v29 }
 0xa1d   :  { %5728 = vtanh.f32 %v2276_v23  ;;  %v3197_v23 = vrot.slane %v6322_v16, 4 }
 0xa24   :  { %v5723_v25 = vpop.eup %5722 }
 0xa25   :  { %v5725_v26 = vpop.eup %5724  ;;  %v2281_v27 = vadd.f32 1.0, %v5723_v25  ;;  %v3199_v25 = vrot.slane %v6302_v43, 2 }
 0xa26   :  { %v2287_v30 = vadd.f32 1.0, %v5725_v26  ;;  %v5727_v38 = vpop.eup %5726 }
 0xa27   :  { %5730 = vrcp.f32 %v2281_v27  ;;  %v5729_v33 = vpop.eup %5728  ;;  %v2294_v37 = vadd.f32 1.0, %v5727_v38 }
 0xa28   :  { %5732 = vrcp.f32 %v2287_v30 }
 0xa29   :  { %5734 = vrcp.f32 %v2294_v37 }
 0xa31   :  { %v5731_v42 = vpop.eup %5730 }
 0xa32   :  { %v5733_v13 = vpop.eup %5732  ;;  %v2298_v36 = vmul.f32 %v5731_v42, %v5729_v33 }
 0xa33   :  { %v2297_v39 = vmul.f32 %v5733_v13, %v2126_v5  ;;  %v5735_v45 = vpop.eup %5734 }
 0xa35   :  { %v2299_v44 = vadd.f32 %v2298_v36, %v2297_v39 }
 0xa37   :  { %5736 = vtanh.f32 %v2299_v44 }
 0xa41   :  { %v5737_v46 = vpop.eup %5736 }
 0xa42   :  { %v2301_v47 = vmul.f32 %v5737_v46, %v5735_v45 }
 0xa44   :  { %5183 = vmatmul.mubr.msk.f32.vlgmr.msra.gmra.mrb[26].mxu0 %vm216_vm1, %v2301_v47  ;;  %5184 = vmatmul.mubr.msk.f32.vlgmr.msra.gmra.mrb[26].mxu1 %vm216_vm1, %v2301_v47  ;;  %v3195_v29 = vrot.slane %v2301_v47, 6 }
 0xa45   :  { %5449 = vmatpush1.bf16.msra.mxu0 %v6231_v2  ;;  %5457 = vmatpush1.bf16.msra.mxu1 %v6238_v10 }
 0xa46   :  { %5451 = vmatprep.subr.bf16.mxu0 %v6236_v6  ;;  %5459 = vmatprep.subr.bf16.mxu1 %v6245_v14 }
 0xa47   :  { %2542 = vmatprep.mubr.f32.mxu0 %v5997_v0  ;;  %2613 = vmatprep.mubr.f32.mxu1 %v5997_v0 }
 0xa49   :  { %5453 = vmatpush1.bf16.msra.mxu0 %v6252_v11  ;;  %5461 = vmatpush1.bf16.msra.mxu1 %v6257_v24 }
 0xa4a   :  { %5463 = vmatprep.subr.bf16.mxu0 %v6224_v55  ;;  %5471 = vmatprep.subr.bf16.mxu1 %v6226_v59 }
 0xb17   :  { %v2371_v53 = vpop.f32.mrb[26].mxu0  ;;  %v2442_v49 = vpop.f32.mrb[26].mxu1 }
 0xb18   :  { %v2447_v50 = vadd.f32 %v2371_v53, %v6283_v15  ;;  %v2373_v57 = vpop.f32.mrb[27].mxu0  ;;  %v2444_v51 = vpop.f32.mrb[27].mxu1  ;;  %v2449_v61 = vadd.f32 %v2442_v49, %v6293_v7 }
 0xb19   :  { %v2448_v52 = vadd.f32 %v2373_v57, %v6285_v34  ;;  %v2450_v20 = vadd.f32 %v2444_v51, %v6291_v56 }
 0xb1a   :  { %v5185_v54 = vmul.f32 -1.442695, %v2447_v50 }
 0xb1b   :  { %v5186_v58 = vmul.f32 -1.442695, %v2448_v52  ;;  %v5187_v60 = vmul.f32 -1.442695, %v2450_v20 }
 0xb1c   :  { %5738 = vpow2.f32 %v5185_v54 }
 0xb1d   :  { %5740 = vpow2.f32 %v5186_v58 }
 0xb1e   :  { %5742 = vpow2.f32 %v5187_v60 }
 0xb1f   :  { %5744 = vtanh.f32 %v2449_v61 }
 0xb26   :  { %v5739_v62 = vpop.eup %5738 }
 0xb27   :  { %v5741_v63 = vpop.eup %5740  ;;  %v2454_v1 = vadd.f32 1.0, %v5739_v62 }
 0xb28   :  { %v2460_v5 = vadd.f32 1.0, %v5741_v63  ;;  %v5743_v8 = vpop.eup %5742 }
 0xb29   :  { %5746 = vrcp.f32 %v2454_v1  ;;  %v5745_v9 = vpop.eup %5744  ;;  %v2467_v12 = vadd.f32 1.0, %v5743_v8 }
 0xb2a   :  { %5748 = vrcp.f32 %v2460_v5 }
 0xb2b   :  { %5750 = vrcp.f32 %v2467_v12 }
 0xb33   :  { %v5747_v41 = vpop.eup %5746 }
 0xb34   :  { %v5749_v3 = vpop.eup %5748  ;;  %v2471_v17 = vmul.f32 %v5747_v41, %v5745_v9 }
 0xb35   :  { %v2470_v28 = vmul.f32 %v5749_v3, %v2299_v44  ;;  %v5751_v21 = vpop.eup %5750 }
 0xb37   :  { %v2472_v18 = vadd.f32 %v2471_v17, %v2470_v28 }
 0xb39   :  { %5752 = vtanh.f32 %v2472_v18 }
 0xb43   :  { %v5753_v19 = vpop.eup %5752 }
 0xb44   :  { %v2474_v22 = vmul.f32 %v5753_v19, %v5751_v21 }
 0xb46   :  { %5188 = vmatmul.mubr.msk.f32.vlgmr.msra.gmra.mrb[28].mxu0 %vm216_vm1, %v2474_v22  ;;  %5189 = vmatmul.mubr.msk.f32.vlgmr.msra.gmra.mrb[28].mxu1 %vm216_vm1, %v2474_v22  ;;  %v3204_v26 = vsel %vm3180_vm2, %v2474_v22, %v3195_v29 }
 0xb47   :  { %5465 = vmatpush1.bf16.msra.mxu0 %v6231_v2  ;;  %5473 = vmatpush1.bf16.msra.mxu1 %v6238_v10  ;;  %v3205_v27 = vsel %vm3182_vm3, %v3204_v26, %v3197_v23 }
 0xb48   :  { %5467 = vmatprep.subr.bf16.mxu0 %v6236_v6  ;;  %5475 = vmatprep.subr.bf16.mxu1 %v6245_v14  ;;  %v6369_v16 = vsel %vm3184_vm4, %v3205_v27, %v3199_v25 }
 0xb49   :  { %2715 = vmatprep.mubr.f32.mxu0 %v5997_v0  ;;  %2786 = vmatprep.mubr.f32.mxu1 %v5997_v0 }
 0xb4b   :  { %5469 = vmatpush1.bf16.msra.mxu0 %v6252_v11  ;;  %5477 = vmatpush1.bf16.msra.mxu1 %v6257_v24 }
 0xb4c   :  { %5479 = vmatprep.subr.bf16.mxu0 %v6224_v55  ;;  %5487 = vmatprep.subr.bf16.mxu1 %v6226_v59 }
 0xc19   :  { %v2544_v43 = vpop.f32.mrb[28].mxu0  ;;  %v2615_v30 = vpop.f32.mrb[28].mxu1 }
 0xc1a   :  { %v2620_v38 = vadd.f32 %v2544_v43, %v6283_v15  ;;  %v2546_v33 = vpop.f32.mrb[29].mxu0  ;;  %v2617_v42 = vpop.f32.mrb[29].mxu1  ;;  %v2622_v45 = vadd.f32 %v2615_v30, %v6293_v7 }
 0xc1b   :  { %v2621_v13 = vadd.f32 %v2546_v33, %v6285_v34  ;;  %v2623_v39 = vadd.f32 %v2617_v42, %v6291_v56 }
 0xc1c   :  { %v5190_v36 = vmul.f32 -1.442695, %v2620_v38 }
 0xc1d   :  { %v5191_v37 = vmul.f32 -1.442695, %v2621_v13  ;;  %v5192_v44 = vmul.f32 -1.442695, %v2623_v39 }
 0xc1e   :  { %5754 = vpow2.f32 %v5190_v36 }
 0xc1f   :  { %5756 = vpow2.f32 %v5191_v37 }
 0xc20   :  { %5758 = vpow2.f32 %v5192_v44 }
 0xc21   :  { %5760 = vtanh.f32 %v2622_v45 }
 0xc28   :  { %v5755_v46 = vpop.eup %5754 }
 0xc29   :  { %v5757_v47 = vpop.eup %5756  ;;  %v2627_v53 = vadd.f32 1.0, %v5755_v46 }
 0xc2a   :  { %v2633_v49 = vadd.f32 1.0, %v5757_v47  ;;  %v5759_v50 = vpop.eup %5758 }
 0xc2b   :  { %5762 = vrcp.f32 %v2627_v53  ;;  %v5761_v57 = vpop.eup %5760  ;;  %v2640_v58 = vadd.f32 1.0, %v5759_v50 }
 0xc2c   :  { %5764 = vrcp.f32 %v2633_v49 }
 0xc2d   :  { %5766 = vrcp.f32 %v2640_v58 }
 0xc35   :  { %v5763_v51 = vpop.eup %5762 }
 0xc36   :  { %v5765_v52 = vpop.eup %5764  ;;  %v2644_v54 = vmul.f32 %v5763_v51, %v5761_v57 }
 0xc37   :  { %v2643_v20 = vmul.f32 %v5765_v52, %v2472_v18  ;;  %v5767_v61 = vpop.eup %5766 }
 0xc39   :  { %v2645_v60 = vadd.f32 %v2644_v54, %v2643_v20 }
 0xc3b   :  { %5768 = vtanh.f32 %v2645_v60 }
 0xc45   :  { %v5769_v62 = vpop.eup %5768 }
 0xc46   :  { %v6381_v63 = vmul.f32 %v5769_v62, %v5767_v61 }
 0xc48   :  { %5193 = vmatmul.mubr.msk.f32.vlgmr.msra.gmra.mrb[30].mxu0 %vm216_vm1, %v6381_v63  ;;  %5194 = vmatmul.mubr.msk.f32.vlgmr.msra.gmra.mrb[30].mxu1 %vm216_vm1, %v6381_v63 }
 0xc49   :  { %5481 = vmatpush1.bf16.msra.mxu0 %v6231_v2  ;;  %5489 = vmatpush1.bf16.msra.mxu1 %v6238_v10 }
 0xc4a   :  { %5483 = vmatprep.subr.bf16.mxu0 %v6236_v6  ;;  %5491 = vmatprep.subr.bf16.mxu1 %v6245_v14 }
 0xc4b   :  { %2888 = vmatprep.mubr.f32.mxu0 %v5997_v0  ;;  %2959 = vmatprep.mubr.f32.mxu1 %v5997_v0 }
 0xc4d   :  { %5485 = vmatpush1.bf16.msra.mxu0 %v6252_v11  ;;  %5493 = vmatpush1.bf16.msra.mxu1 %v6257_v24 }
 0xc4e   :  { %5495 = vmatprep.subr.bf16.mxu0 %v6224_v55  ;;  %5503 = vmatprep.subr.bf16.mxu1 %v6226_v59 }
 0xd1b   :  { %v2717_v1 = vpop.f32.mrb[30].mxu0  ;;  %v2788_v5 = vpop.f32.mrb[30].mxu1 }
 0xd1c   :  { %v2793_v8 = vadd.f32 %v2717_v1, %v6283_v15  ;;  %v2719_v9 = vpop.f32.mrb[31].mxu0  ;;  %v2790_v41 = vpop.f32.mrb[31].mxu1  ;;  %v2795_v21 = vadd.f32 %v2788_v5, %v6293_v7  ;;  %v3230_v5 = vld [vmem:[#allocation2 + $0x208] sm:$0xff] }
 0xd1d   :  { %v2794_v3 = vadd.f32 %v2719_v9, %v6285_v34  ;;  %v2796_v28 = vadd.f32 %v2790_v41, %v6291_v56  ;;  %v3229_v9 = vld [vmem:[#allocation2 + $0x200] sm:$0xff] }
 0xd1e   :  { %v5195_v17 = vmul.f32 -1.442695, %v2793_v8  ;;  %v3234_v8 = vld [vmem:[#allocation2 + $0x228] sm:$0xff] }
 0xd1f   :  { %v5196_v12 = vmul.f32 -1.442695, %v2794_v3  ;;  %v5197_v18 = vmul.f32 -1.442695, %v2796_v28  ;;  %v5510_v41 = vpack.c.bf16 %v3234_v8, %v3230_v5  ;;  %v3233_v3 = vld [vmem:[#allocation2 + $0x220] sm:$0xff] }
 0xd20   :  { %5770 = vpow2.f32 %v5195_v17  ;;  %v3232_v17 = vld [vmem:[#allocation2 + $0x218] sm:$0xff]  ;;  %v5512_v28 = vpack.c.bf16 %v3233_v3, %v3229_v9  ;;  %v3213_v9 = vld [vmem:[#allocation2 + $0x180] sm:$0xff] }
 0xd21   :  { %5772 = vpow2.f32 %v5196_v12  ;;  %v3236_v12 = vld [vmem:[#allocation2 + $0x238] sm:$0xff]  ;;  %v3217_v3 = vld [vmem:[#allocation2 + $0x1a0] sm:$0xff] }
 0xd22   :  { %5774 = vpow2.f32 %v5197_v18  ;;  %v5518_v18 = vpack.c.bf16 %v3236_v12, %v3232_v17  ;;  %v3215_v17 = vld [vmem:[#allocation2 + $0x190] sm:$0xff] }
 0xd23   :  { %5776 = vtanh.f32 %v2795_v21  ;;  %v3231_v21 = vld [vmem:[#allocation2 + $0x210] sm:$0xff] }
 0xd24   :  { %v3219_v12 = vld [vmem:[#allocation2 + $0x1b0] sm:$0xff] }
 0xd2a   :  { %v5771_v55 = vpop.eup %5770 }
 0xd2b   :  { %v5773_v19 = vpop.eup %5772  ;;  %v2800_v59 = vadd.f32 1.0, %v5771_v55  ;;  %v3235_v55 = vld [vmem:[#allocation2 + $0x230] sm:$0xff] }
 0xd2c   :  { %v2806_v22 = vadd.f32 1.0, %v5773_v19  ;;  %v5775_v29 = vpop.eup %5774  ;;  %v3238_v19 = vld [vmem:[#allocation2 + $0x248] sm:$0xff] }
 0xd2d   :  { %5778 = vrcp.f32 %v2800_v59  ;;  %v5777_v23 = vpop.eup %5776  ;;  %v2813_v43 = vadd.f32 1.0, %v5775_v29  ;;  %v5520_v59 = vpack.c.bf16 %v3235_v55, %v3231_v21  ;;  %v3237_v29 = vld [vmem:[#allocation2 + $0x240] sm:$0xff]  ;;  %v3222_v21 = vld [vmem:[#allocation2 + $0x1c8] sm:$0xff] }
 0xd2e   :  { %5780 = vrcp.f32 %v2806_v22  ;;  %v3242_v22 = vld [vmem:[#allocation2 + $0x268] sm:$0xff] }
 0xd2f   :  { %5782 = vrcp.f32 %v2813_v43  ;;  %v3244_v43 = vld [vmem:[#allocation2 + $0x278] sm:$0xff] }
 0xd37   :  { %v5779_v25 = vpop.eup %5778 }
 0xd38   :  { %v5781_v26 = vpop.eup %5780  ;;  %v2817_v27 = vmul.f32 %v5779_v25, %v5777_v23  ;;  %v3241_v23 = vld [vmem:[#allocation2 + $0x260] sm:$0xff]  ;;  %v5514_v25 = vpack.c.bf16 %v3242_v22, %v3238_v19  ;;  %v3226_v19 = vld [vmem:[#allocation2 + $0x1e8] sm:$0xff]  ;;  %v3228_v22 = vld [vmem:[#allocation2 + $0x1f8] sm:$0xff] }
 0xd39   :  { %v2816_v30 = vmul.f32 %v5781_v26, %v2645_v60  ;;  %v5783_v33 = vpop.eup %5782  ;;  %v5516_v26 = vpack.c.bf16 %v3241_v23, %v3237_v29  ;;  %v5528_v23 = vpack.c.bf16 %v3217_v3, %v3213_v9 }
 0xd3b   :  { %v2818_v38 = vadd.f32 %v2817_v27, %v2816_v30  ;;  %v3240_v27 = vld [vmem:[#allocation2 + $0x258] sm:$0xff]  ;;  %v3239_v30 = vld [vmem:[#allocation2 + $0x250] sm:$0xff] }
 0xd3d   :  { %5784 = vtanh.f32 %v2818_v38 }
 0xd47   :  { %v5785_v42 = vpop.eup %5784 }
 0xd48   :  { %v6401_v13 = vmul.f32 %v5785_v42, %v5783_v33  ;;  %v3243_v33 = vld [vmem:[#allocation2 + $0x270] sm:$0xff]  ;;  %v3214_v42 = vld [vmem:[#allocation2 + $0x188] sm:$0xff] }
 0xd4a   :  { %5198 = vmatmul.mubr.msk.f32.vlgmr.msra.gmra.mrb[32].mxu0 %vm216_vm1, %v6401_v13  ;;  %5199 = vmatmul.mubr.msk.f32.vlgmr.msra.gmra.mrb[32].mxu1 %vm216_vm1, %v6401_v13  ;;  %v3191_v55 = vrot.slane %v6401_v13, 4 }
 0xd4b   :  { %5497 = vmatpush1.bf16.msra.mxu0 %v6231_v2  ;;  %5505 = vmatpush1.bf16.msra.mxu1 %v6238_v10 }
 0xd4c   :  { %5499 = vmatprep.subr.bf16.mxu0 %v6236_v6  ;;  %5507 = vmatprep.subr.bf16.mxu1 %v6245_v14 }
 0xd4d   :  { %3061 = vmatprep.mubr.f32.mxu0 %v5997_v0  ;;  %3132 = vmatprep.mubr.f32.mxu1 %v5997_v0 }
 0xd4f   :  { %5501 = vmatpush1.bf16.msra.mxu0 %v6252_v11  ;;  %5509 = vmatpush1.bf16.msra.mxu1 %v6257_v24 }
 0xd50   :  { %5511 = vmatprep.subr.bf16.mxu0 %v5510_v41  ;;  %5519 = vmatprep.subr.bf16.mxu1 %v5518_v18 }
 0xe1d   :  { %v2890_v36 = vpop.f32.mrb[32].mxu0  ;;  %v2961_v37 = vpop.f32.mrb[32].mxu1 }
 0xe1e   :  { %v2966_v39 = vadd.f32 %v2890_v36, %v6283_v15  ;;  %v2892_v44 = vpop.f32.mrb[33].mxu0  ;;  %v2963_v2 = vpop.f32.mrb[33].mxu1  ;;  %v2968_v47 = vadd.f32 %v2961_v37, %v6293_v7  ;;  %v3218_v36 = vld [vmem:[#allocation2 + $0x1a8] sm:$0xff]  ;;  %v5524_v37 = vpack.c.bf16 %v3243_v33, %v3239_v30  ;;  %v3223_v30 = vld [vmem:[#allocation2 + $0x1d0] sm:$0xff]  ;;  %v5530_v33 = vpack.c.bf16 %v3226_v19, %v3222_v21 }
 0xe1f   :  { %v2967_v10 = vadd.f32 %v2892_v44, %v6285_v34  ;;  %v2969_v14 = vadd.f32 %v2963_v2, %v6291_v56  ;;  %v3216_v44 = vld [vmem:[#allocation2 + $0x198] sm:$0xff] }
 0xe20   :  { %v5200_v45 = vmul.f32 -1.442695, %v2966_v39  ;;  %v5526_v39 = vpack.c.bf16 %v3218_v36, %v3214_v42  ;;  %v3220_v2 = vld [vmem:[#allocation2 + $0x1b8] sm:$0xff]  ;;  %v6449_v36 = vld [vmem:[#allocation2 + $0x288] sm:$0xff] }
 0xe21   :  { %v5201_v6 = vmul.f32 -1.442695, %v2967_v10  ;;  %v5202_v46 = vmul.f32 -1.442695, %v2969_v14  ;;  %v5534_v10 = vpack.c.bf16 %v3220_v2, %v3216_v44  ;;  %v6459_v44 = vld [vmem:[#allocation2 + $0x290] sm:$0xff] }
 0xe22   :  { %5786 = vpow2.f32 %v5200_v45 }
 0xe23   :  { %5788 = vpow2.f32 %v5201_v6 }
 0xe24   :  { %5790 = vpow2.f32 %v5202_v46 }
 0xe25   :  { %5792 = vtanh.f32 %v2968_v47 }
 0xe2c   :  { %v5787_v11 = vpop.eup %5786 }
 0xe2d   :  { %v5789_v53 = vpop.eup %5788  ;;  %v2973_v24 = vadd.f32 1.0, %v5787_v11 }
 0xe2e   :  { %v2979_v49 = vadd.f32 1.0, %v5789_v53  ;;  %v5791_v50 = vpop.eup %5790 }
 0xe2f   :  { %5794 = vrcp.f32 %v2973_v24  ;;  %v5793_v57 = vpop.eup %5792  ;;  %v2986_v58 = vadd.f32 1.0, %v5791_v50 }
 0xe30   :  { %5796 = vrcp.f32 %v2979_v49 }
 0xe31   :  { %5798 = vrcp.f32 %v2986_v58 }
 0xe39   :  { %v5795_v51 = vpop.eup %5794 }
 0xe3a   :  { %v5797_v52 = vpop.eup %5796  ;;  %v2990_v54 = vmul.f32 %v5795_v51, %v5793_v57 }
 0xe3b   :  { %v2989_v20 = vmul.f32 %v5797_v52, %v2818_v38  ;;  %v5799_v61 = vpop.eup %5798  ;;  %v5522_v38 = vpack.c.bf16 %v3244_v43, %v3240_v27  ;;  %v3225_v43 = vld [vmem:[#allocation2 + $0x1e0] sm:$0xff] }
 0xe3d   :  { %v6419_v60 = vadd.f32 %v2990_v54, %v2989_v20 }
 0xe3f   :  { %5800 = vtanh.f32 %v6419_v60 }
 0xe49   :  { %v5801_v62 = vpop.eup %5800 }
 0xe4a   :  { %v6422_v1 = vmul.f32 %v5801_v62, %v5799_v61 }
 0xe4c   :  { %5203 = vmatmul.mubr.msk.f32.vlgmr.msra.gmra.mrb[34].mxu0 %vm216_vm1, %v6422_v1  ;;  %5204 = vmatmul.mubr.msk.f32.vlgmr.msra.gmra.mrb[34].mxu1 %vm216_vm1, %v6422_v1  ;;  %v3189_v18 = vrot.slane %v6422_v1, 6 }
 0xe4d   :  { %3315 = vmatprep.mubr.f32.mxu0 %v5997_v0  ;;  %3392 = vmatprep.mubr.f32.mxu1 %v5997_v0 }
 0xe4e   :  { %5513 = vmatpush1.bf16.msra.mxu0 %v5512_v28  ;;  %5521 = vmatpush1.bf16.msra.mxu1 %v5520_v59  ;;  %v3224_v59 = vld [vmem:[#allocation2 + $0x1d8] sm:$0xff] }
 0xe4f   :  { %5515 = vmatprep.subr.bf16.mxu0 %v5514_v25  ;;  %5523 = vmatprep.subr.bf16.mxu1 %v5522_v38  ;;  %v5536_v25 = vpack.c.bf16 %v3219_v12, %v3215_v17  ;;  %v3227_v38 = vld [vmem:[#allocation2 + $0x1f0] sm:$0xff]  ;;  %v5538_v42 = vpack.c.bf16 %v3228_v22, %v3224_v59 }
 0xe50   :  { %v5540_v13 = vpack.c.bf16 %v3227_v38, %v3223_v30 }
 0xe52   :  { %5517 = vmatpush1.bf16.msra.mxu0 %v5516_v26  ;;  %5525 = vmatpush1.bf16.msra.mxu1 %v5524_v37  ;;  %v3221_v26 = vld [vmem:[#allocation2 + $0x1c0] sm:$0xff]  ;;  %v6451_v37 = vld [vmem:[#allocation2 + $0x298] sm:$0xff] }
 0xe53   :  { %5527 = vmatprep.subr.bf16.mxu0 %v5526_v39  ;;  %5535 = vmatprep.subr.bf16.mxu1 %v5534_v10  ;;  %v6455_v39 = vld [vmem:[#allocation2 + $0x280] sm:$0xff] }
 0xf1f   :  { %v3063_v45 = vpop.f32.mrb[34].mxu0  ;;  %v3134_v6 = vpop.f32.mrb[34].mxu1 }
 0xf20   :  { %v3139_v14 = vadd.f32 %v3063_v45, %v6283_v15  ;;  %v3065_v46 = vpop.f32.mrb[35].mxu0  ;;  %v3136_v47 = vpop.f32.mrb[35].mxu1  ;;  %v3141_v57 = vadd.f32 %v3134_v6, %v6293_v7 }
 0xf21   :  { %v3140_v11 = vadd.f32 %v3065_v46, %v6285_v34  ;;  %v3142_v49 = vadd.f32 %v3136_v47, %v6291_v56 }
 0xf22   :  { %v5205_v53 = vmul.f32 -1.442695, %v3139_v14 }
 0xf23   :  { %v5206_v24 = vmul.f32 -1.442695, %v3140_v11  ;;  %v5207_v50 = vmul.f32 -1.442695, %v3142_v49 }
 0xf24   :  { %5802 = vpow2.f32 %v5205_v53 }
 0xf25   :  { %5804 = vpow2.f32 %v5206_v24 }
 0xf26   :  { %5806 = vpow2.f32 %v5207_v50 }
 0xf27   :  { %5808 = vtanh.f32 %v3141_v57 }
 0xf2e   :  { %v5803_v51 = vpop.eup %5802 }
 0xf2f   :  { %v5805_v52 = vpop.eup %5804  ;;  %v3146_v54 = vadd.f32 1.0, %v5803_v51 }
 0xf30   :  { %v3152_v58 = vadd.f32 1.0, %v5805_v52  ;;  %v5807_v15 = vpop.eup %5806 }
 0xf31   :  { %5810 = vrcp.f32 %v3146_v54  ;;  %v5809_v20 = vpop.eup %5808  ;;  %v3159_v5 = vadd.f32 1.0, %v5807_v15 }
 0xf32   :  { %5812 = vrcp.f32 %v3152_v58 }
 0xf33   :  { %5814 = vrcp.f32 %v3159_v5 }
 0xf3b   :  { %v5811_v34 = vpop.eup %5810 }
 0xf3c   :  { %v5813_v61 = vpop.eup %5812  ;;  %v3163_v62 = vmul.f32 %v5811_v34, %v5809_v20 }
 0xf3d   :  { %v3162_v8 = vmul.f32 %v5813_v61, %v6419_v60  ;;  %v5815_v7 = vpop.eup %5814  ;;  %v3193_v60 = vrot.slane %v6381_v63, 2  ;;  %v5532_v63 = vpack.c.bf16 %v3225_v43, %v3221_v26 }
 0xf3f   :  { %v3164_v56 = vadd.f32 %v3163_v62, %v3162_v8 }
 0xf41   :  { %5816 = vtanh.f32 %v3164_v56 }
 0xf4b   :  { %v5817_v41 = vpop.eup %5816 }
 0xf4c   :  { %v3166_v28 = vmul.f32 %v5817_v41, %v5815_v7 }
 0xf4e   :  { %v3201_v29 = vsel %vm3180_vm2, %v3166_v28, %v3189_v18 }
 0xf4f   :  { %v3202_v27 = vsel %vm3182_vm3, %v3201_v29, %v3191_v55 }
 0xf50   :  { %v3203_v1 = vsel %vm3184_vm4, %v3202_v27, %v3193_v60 }
 0xf51   :  { %5208 = vmatmul.mubr.msk.f32.vlgmr.msra.gmra.mrb[36].mxu0 %vm216_vm1, %v3203_v1  ;;  %5210 = vmatmul.mubr.msk.f32.vlgmr.msra.gmra.mrb[36].mxu1 %vm216_vm1, %v3203_v1 }
 0xf52   :  { %5529 = vmatpush1.bf16.msra.mxu0 %v5528_v23  ;;  %5537 = vmatpush1.bf16.msra.mxu1 %v5536_v25 }
 0xf53   :  { %3321 = vmatprep.mubr.f32.mxu0 %v5997_v0  ;;  %3398 = vmatprep.mubr.f32.mxu1 %v5997_v0 }
 0xf54   :  { %5531 = vmatprep.subr.bf16.mxu0 %v5530_v33  ;;  %5539 = vmatprep.subr.bf16.mxu1 %v5538_v42 }
 0xf55   :  { %5209 = vmatmul.mubr.msk.f32.gmra.mrb[38].mxu0 %vm216_vm1, %v6369_v16  ;;  %5211 = vmatmul.mubr.msk.f32.gmra.mrb[38].mxu1 %vm216_vm1, %v6369_v16 }
 0xf56   :  { %5533 = vmatpush1.bf16.msra.mxu0 %v5532_v63  ;;  %5541 = vmatpush1.bf16.msra.mxu1 %v5540_v13 }
 0xf57   :  { %3475 = vmatprep.mubr.f32.mxu0 %v5997_v0  ;;  %3552 = vmatprep.mubr.f32.mxu1 %v5997_v0 }
 0xf58   :  { %3596 = vmatprep.subr.mxu0 %v6449_v36  ;;  %3667 = vmatprep.subr.mxu1 %v6451_v37 }
 0xf59   :  { %5212 = vmatmul.mubr.msk.f32.vlgmr.msra.gmra.mrb[36].mxu0 %vm216_vm1, %v6170_v4  ;;  %5214 = vmatmul.mubr.msk.f32.vlgmr.msra.gmra.mrb[36].mxu1 %vm216_vm1, %v6170_v4  ;;  %v3212_v4 = vld [vmem:[#allocation2 + $0x2a0] ss:$8 sm:$0xf] }
 0xf5a   :  { %3597 = vmatpush1.msra.mxu0 %v6455_v39  ;;  %3481 = vmatprep.mubr.f32.mxu0 %v5997_v0  ;;  %v3569_v45 = vrot.slane %v3212_v4, %v6084_v32  ;;  %v3577_v6 = vrot.slane %v3212_v4, %v6098_v48  ;;  %v3573_v14 = vrot.slane %v3212_v4, %v6086_v35 }
 0xf5b   :  { %3558 = vmatprep.mubr.f32.mxu1 %v5997_v0  ;;  %3668 = vmatpush1.msra.mxu1 %v6459_v44  ;;  %v3581_v46 = vrot.slane %v3212_v4, %v6090_v40 }
 0xf5c   :  { %3769 = vmatprep.subr.mxu0 %v6449_v36  ;;  %3840 = vmatprep.subr.mxu1 %v6451_v37 }
 0xf5d   :  { %5213 = vmatmul.mubr.msk.f32.gmra.mrb[38].mxu0 %vm216_vm1, %v6300_v31  ;;  %5215 = vmatmul.mubr.msk.f32.gmra.mrb[38].mxu1 %vm216_vm1, %v6300_v31 }
 0xf5e   :  { %3660 = vmatprep.mubr.f32.mxu0 %v5997_v0  ;;  %3731 = vmatprep.mubr.f32.mxu1 %v5997_v0 }
 0xf61   :  { %3661 = vmatmul.mubr.f32.vlgmr.msra.gmra.mrb[40].mxu0 %v5997_v0  ;;  %3732 = vmatmul.mubr.f32.vlgmr.msra.gmra.mrb[40].mxu1 %v5997_v0 }
 0xf62   :  { %3770 = vmatpush1.msra.mxu0 %v6455_v39  ;;  %3833 = vmatprep.mubr.f32.mxu0 %v5997_v0 }
 0xf63   :  { %3841 = vmatpush1.msra.mxu1 %v6459_v44  ;;  %3904 = vmatprep.mubr.f32.mxu1 %v5997_v0 }
 0xf64   :  { %3958 = vmatprep.subr.mxu0 %v6449_v36  ;;  %4029 = vmatprep.subr.mxu1 %v6451_v37 }
0x102c   :  { %v3477_v31 = vpop.f32.mrb[36].mxu0  ;;  %v3554_v16 = vpop.f32.mrb[36].mxu1 }
0x102d   :  { %v3479_v2 = vpop.f32.mrb[37].mxu0  ;;  %v3556_v10 = vpop.f32.mrb[37].mxu1  ;;  %v6497_v52 = vadd.f32 %v3569_v45, %v3477_v31  ;;  %v6506_v5 = vadd.f32 %v3577_v6, %v3554_v16 }
0x102e   :  { %v6499_v32 = vadd.f32 %v3573_v14, %v3479_v2  ;;  %v6503_v61 = vadd.f32 %v3581_v46, %v3556_v10 }
0x1030   :  { %v3483_v47 = vpop.f32.mrb[38].mxu0  ;;  %v3560_v11 = vpop.f32.mrb[38].mxu1 }
0x1031   :  { %v6489_v53 = vadd.f32 %v3569_v45, %v3483_v47  ;;  %v6491_v24 = vadd.f32 %v3577_v6, %v3560_v11  ;;  %v3485_v49 = vpop.f32.mrb[39].mxu0  ;;  %v3562_v50 = vpop.f32.mrb[39].mxu1 }
0x1032   :  { %v6493_v57 = vadd.f32 %v3573_v14, %v3485_v49  ;;  %v6495_v51 = vadd.f32 %v3581_v46, %v3562_v50 }
0x1034   :  { %v3662_v48 = vpop.f32.mrb[40].mxu0  ;;  %v3733_v35 = vpop.f32.mrb[40].mxu1 }
0x1035   :  { %v3738_v40 = vadd.f32 %v3662_v48, %v6497_v52  ;;  %v3664_v54 = vpop.f32.mrb[41].mxu0  ;;  %v3735_v58 = vpop.f32.mrb[41].mxu1  ;;  %v3740_v56 = vadd.f32 %v3733_v35, %v6506_v5 }
0x1036   :  { %v3739_v15 = vadd.f32 %v3664_v54, %v6499_v32  ;;  %v3741_v62 = vadd.f32 %v3735_v58, %v6503_v61 }
0x1037   :  { %v5216_v20 = vmul.f32 -1.442695, %v3738_v40 }
0x1038   :  { %v5217_v34 = vmul.f32 -1.442695, %v3739_v15  ;;  %v5218_v8 = vmul.f32 -1.442695, %v3741_v62 }
0x1039   :  { %5818 = vpow2.f32 %v5216_v20 }
0x103a   :  { %5820 = vpow2.f32 %v5217_v34 }
0x103b   :  { %5822 = vpow2.f32 %v5218_v8 }
0x103c   :  { %5824 = vtanh.f32 %v3740_v56 }
0x1043   :  { %v5819_v7 = vpop.eup %5818 }
0x1044   :  { %v5821_v9 = vpop.eup %5820  ;;  %v3745_v41 = vadd.f32 1.0, %v5819_v7 }
0x1045   :  { %v3751_v3 = vadd.f32 1.0, %v5821_v9  ;;  %v5823_v17 = vpop.eup %5822 }
0x1046   :  { %5826 = vrcp.f32 %v3745_v41  ;;  %v5825_v12 = vpop.eup %5824  ;;  %v3758_v55 = vadd.f32 1.0, %v5823_v17 }
0x1047   :  { %5828 = vrcp.f32 %v3751_v3 }
0x1048   :  { %5830 = vrcp.f32 %v3758_v55 }
0x1050   :  { %v5827_v28 = vpop.eup %5826 }
0x1051   :  { %v5829_v18 = vpop.eup %5828  ;;  %v3762_v21 = vmul.f32 %v5827_v28, %v5825_v12 }
0x1052   :  { %v3761_v19 = vmul.f32 0.0, %v5829_v18  ;;  %v5831_v22 = vpop.eup %5830 }
0x1054   :  { %v3763_v59 = vadd.f32 %v3762_v21, %v3761_v19 }
0x1056   :  { %5832 = vtanh.f32 %v3763_v59  ;;  %v3947_v11 = vrot.slane %v3763_v59, 6 }
0x1060   :  { %v5833_v60 = vpop.eup %5832 }
0x1061   :  { %v6509_v29 = vmul.f32 %v5833_v60, %v5831_v22 }
0x1063   :  { %5219 = vmatmul.mubr.msk.f32.vlgmr.msra.gmra.mrb[42].mxu0 %vm70_vm0, %v6509_v29  ;;  %5220 = vmatmul.mubr.msk.f32.vlgmr.msra.gmra.mrb[42].mxu1 %vm70_vm0, %v6509_v29 }
0x1064   :  { %3959 = vmatpush1.msra.mxu0 %v6455_v39  ;;  %4022 = vmatprep.mubr.f32.mxu0 %v5997_v0 }
0x1065   :  { %4030 = vmatpush1.msra.mxu1 %v6459_v44  ;;  %4093 = vmatprep.mubr.f32.mxu1 %v5997_v0 }
0x1066   :  { %4147 = vmatprep.subr.mxu0 %v6449_v36  ;;  %4218 = vmatprep.subr.mxu1 %v6451_v37 }
0x1136   :  { %v3835_v23 = vpop.f32.mrb[42].mxu0  ;;  %v3906_v25 = vpop.f32.mrb[42].mxu1 }
0x1137   :  { %v3915_v26 = vrot.slane %v3835_v23, 6  ;;  %v3837_v27 = vpop.f32.mrb[43].mxu0  ;;  %v3908_v43 = vpop.f32.mrb[43].mxu1  ;;  %v3917_v4 = vrot.slane %v3906_v25, 6 }
0x1138   :  { %v3916_v30 = vrot.slane %v3837_v27, 6  ;;  %v3918_v63 = vrot.slane %v3908_v43, 6 }
0x1139   :  { %v3923_v38 = vadd.f32 %v3915_v26, %v6497_v52  ;;  %v3925_v16 = vadd.f32 %v3917_v4, %v6506_v5 }
0x113a   :  { %v3924_v1 = vadd.f32 %v3916_v30, %v6499_v32  ;;  %v3926_v13 = vadd.f32 %v3918_v63, %v6503_v61 }
0x113b   :  { %v5221_v33 = vmul.f32 -1.442695, %v3923_v38 }
0x113c   :  { %v5222_v42 = vmul.f32 -1.442695, %v3924_v1  ;;  %v5223_v31 = vmul.f32 -1.442695, %v3926_v13 }
0x113d   :  { %5834 = vpow2.f32 %v5221_v33 }
0x113e   :  { %5836 = vpow2.f32 %v5222_v42 }
0x113f   :  { %5838 = vpow2.f32 %v5223_v31 }
0x1140   :  { %5840 = vtanh.f32 %v3925_v16 }
0x1147   :  { %v5835_v2 = vpop.eup %5834 }
0x1148   :  { %v5837_v10 = vpop.eup %5836  ;;  %v3930_v45 = vadd.f32 1.0, %v5835_v2 }
0x1149   :  { %v3936_v6 = vadd.f32 1.0, %v5837_v10  ;;  %v5839_v14 = vpop.eup %5838 }
0x114a   :  { %5842 = vrcp.f32 %v3930_v45  ;;  %v5841_v46 = vpop.eup %5840  ;;  %v3943_v48 = vadd.f32 1.0, %v5839_v14 }
0x114b   :  { %5844 = vrcp.f32 %v3936_v6 }
0x114c   :  { %5846 = vrcp.f32 %v3943_v48 }
0x1154   :  { %v5843_v47 = vpop.eup %5842 }
0x1155   :  { %v5845_v49 = vpop.eup %5844  ;;  %v3950_v50 = vmul.f32 %v5843_v47, %v5841_v46 }
0x1156   :  { %v3949_v35 = vmul.f32 %v5845_v49, %v3947_v11  ;;  %v5847_v54 = vpop.eup %5846 }
0x1158   :  { %v3951_v40 = vadd.f32 %v3950_v50, %v3949_v35 }
0x115a   :  { %5848 = vtanh.f32 %v3951_v40  ;;  %v4136_v43 = vrot.slane %v3951_v40, 6 }
0x1164   :  { %v5849_v58 = vpop.eup %5848 }
0x1165   :  { %v3953_v15 = vmul.f32 %v5849_v58, %v5847_v54 }
0x1167   :  { %v3955_v20 = vrot.slane %v3953_v15, 2 }
0x1169   :  { %5075 = vrot.lane.b32.xlu0 %v3955_v20, %s5998_s0  ;;  %5224 = vmatmul.mubr.msk.f32.vlgmr.msra.gmra.mrb[44].mxu0 %vm70_vm0, %v3955_v20 }
0x116a   :  { %5225 = vmatmul.mubr.msk.f32.vlgmr.msra.gmra.mrb[44].mxu1 %vm70_vm0, %v3955_v20  ;;  %4148 = vmatpush1.msra.mxu0 %v6455_v39 }
0x116b   :  { %4211 = vmatprep.mubr.f32.mxu0 %v5997_v0  ;;  %4219 = vmatpush1.msra.mxu1 %v6459_v44 }
0x116c   :  { %4282 = vmatprep.mubr.f32.mxu1 %v5997_v0  ;;  %4336 = vmatprep.subr.mxu0 %v6449_v36 }
0x116d   :  { %4407 = vmatprep.subr.mxu1 %v6451_v37 }
0x123c   :  { %v4024_v34 = vpop.f32.mrb[44].mxu0 }
0x123d   :  { %v4104_v62 = vrot.slane %v4024_v34, 4  ;;  %v4095_v8 = vpop.f32.mrb[44].mxu1  ;;  %v4026_v56 = vpop.f32.mrb[45].mxu0 }
0x123e   :  { %v4105_v7 = vrot.slane %v4026_v56, 4  ;;  %v4097_v9 = vpop.f32.mrb[45].mxu1  ;;  %v4106_v21 = vrot.slane %v4095_v8, 4 }
0x123f   :  { %v4112_v41 = vadd.f32 %v4104_v62, %v6497_v52  ;;  %v4107_v28 = vrot.slane %v4097_v9, 4 }
0x1240   :  { %v4113_v3 = vadd.f32 %v4105_v7, %v6499_v32  ;;  %v4114_v19 = vadd.f32 %v4106_v21, %v6506_v5 }
0x1241   :  { %v5226_v17 = vmul.f32 -1.442695, %v4112_v41  ;;  %v4115_v18 = vadd.f32 %v4107_v28, %v6503_v61 }
0x1242   :  { %v5227_v12 = vmul.f32 -1.442695, %v4113_v3 }
0x1243   :  { %5850 = vpow2.f32 %v5226_v17  ;;  %v5228_v55 = vmul.f32 -1.442695, %v4115_v18 }
0x1244   :  { %5852 = vpow2.f32 %v5227_v12 }
0x1245   :  { %5854 = vpow2.f32 %v5228_v55 }
0x1246   :  { %5856 = vtanh.f32 %v4114_v19 }
0x124d   :  { %v5851_v59 = vpop.eup %5850 }
0x124e   :  { %v5853_v22 = vpop.eup %5852  ;;  %v4119_v60 = vadd.f32 1.0, %v5851_v59 }
0x124f   :  { %v4125_v23 = vadd.f32 1.0, %v5853_v22  ;;  %v5855_v25 = vpop.eup %5854 }
0x1250   :  { %5858 = vrcp.f32 %v4119_v60  ;;  %v5857_v26 = vpop.eup %5856  ;;  %v4132_v1 = vadd.f32 1.0, %v5855_v25 }
0x1251   :  { %5860 = vrcp.f32 %v4125_v23 }
0x1252   :  { %5862 = vrcp.f32 %v4132_v1 }
0x125a   :  { %v5859_v27 = vpop.eup %5858 }
0x125b   :  { %v5861_v30 = vpop.eup %5860  ;;  %v4139_v38 = vmul.f32 %v5859_v27, %v5857_v26 }
0x125c   :  { %v4138_v33 = vmul.f32 %v5861_v30, %v4136_v43  ;;  %v5863_v63 = vpop.eup %5862 }
0x125e   :  { %v4140_v42 = vadd.f32 %v4139_v38, %v4138_v33 }
0x1260   :  { %5864 = vtanh.f32 %v4140_v42  ;;  %v4325_v8 = vrot.slane %v4140_v42, 6 }
0x126a   :  { %v5865_v13 = vpop.eup %5864 }
0x126b   :  { %v4142_v4 = vmul.f32 %v5865_v13, %v5863_v63 }
0x126d   :  { %v4144_v31 = vrot.slane %v4142_v4, 4 }
0x126f   :  { %5078 = vrot.lane.b32.xlu0 %v4144_v31, %s5999_s1  ;;  %5229 = vmatmul.mubr.msk.f32.vlgmr.msra.gmra.mrb[46].mxu0 %vm70_vm0, %v4144_v31 }
0x1270   :  { %5230 = vmatmul.mubr.msk.f32.vlgmr.msra.gmra.mrb[46].mxu1 %vm70_vm0, %v4144_v31  ;;  %4337 = vmatpush1.msra.mxu0 %v6455_v39 }
0x1271   :  { %4400 = vmatprep.mubr.f32.mxu0 %v5997_v0  ;;  %4408 = vmatpush1.msra.mxu1 %v6459_v44 }
0x1272   :  { %4471 = vmatprep.mubr.f32.mxu1 %v5997_v0  ;;  %4512 = vmatprep.subr.mxu0 %v6449_v36 }
0x1273   :  { %4583 = vmatprep.subr.mxu1 %v6451_v37 }
0x1342   :  { %v4213_v16 = vpop.f32.mrb[46].mxu0 }
0x1343   :  { %v4293_v2 = vrot.slane %v4213_v16, 2  ;;  %v4284_v10 = vpop.f32.mrb[46].mxu1  ;;  %v4215_v45 = vpop.f32.mrb[47].mxu0 }
0x1344   :  { %v4294_v6 = vrot.slane %v4215_v45, 2  ;;  %v4286_v14 = vpop.f32.mrb[47].mxu1  ;;  %v4295_v35 = vrot.slane %v4284_v10, 2 }
0x1345   :  { %v4301_v46 = vadd.f32 %v4293_v2, %v6497_v52  ;;  %v4296_v50 = vrot.slane %v4286_v14, 2 }
0x1346   :  { %v4302_v47 = vadd.f32 %v4294_v6, %v6499_v32  ;;  %v4303_v54 = vadd.f32 %v4295_v35, %v6506_v5 }
0x1347   :  { %v5231_v11 = vmul.f32 -1.442695, %v4301_v46  ;;  %v4304_v48 = vadd.f32 %v4296_v50, %v6503_v61 }
0x1348   :  { %v5232_v49 = vmul.f32 -1.442695, %v4302_v47 }
0x1349   :  { %5866 = vpow2.f32 %v5231_v11  ;;  %v5233_v40 = vmul.f32 -1.442695, %v4304_v48 }
0x134a   :  { %5868 = vpow2.f32 %v5232_v49 }
0x134b   :  { %5870 = vpow2.f32 %v5233_v40 }
0x134c   :  { %5872 = vtanh.f32 %v4303_v54 }
0x1353   :  { %v5867_v58 = vpop.eup %5866 }
0x1354   :  { %v5869_v15 = vpop.eup %5868  ;;  %v4308_v20 = vadd.f32 1.0, %v5867_v58 }
0x1355   :  { %v4314_v34 = vadd.f32 1.0, %v5869_v15  ;;  %v5871_v52 = vpop.eup %5870 }
0x1356   :  { %5874 = vrcp.f32 %v4308_v20  ;;  %v5873_v32 = vpop.eup %5872  ;;  %v4321_v9 = vadd.f32 1.0, %v5871_v52 }
0x1357   :  { %5876 = vrcp.f32 %v4314_v34 }
0x1358   :  { %5878 = vrcp.f32 %v4321_v9 }
0x1360   :  { %v5875_v62 = vpop.eup %5874 }
0x1361   :  { %v5877_v56 = vpop.eup %5876  ;;  %v4328_v7 = vmul.f32 %v5875_v62, %v5873_v32 }
0x1362   :  { %v4327_v61 = vmul.f32 %v5877_v56, %v4325_v8  ;;  %v5879_v5 = vpop.eup %5878 }
0x1364   :  { %v4329_v41 = vadd.f32 %v4328_v7, %v4327_v61 }
0x1366   :  { %5880 = vtanh.f32 %v4329_v41  ;;  %v4502_v63 = vrot.slane %v4329_v41, 6 }
0x1370   :  { %v5881_v3 = vpop.eup %5880 }
0x1371   :  { %v4331_v17 = vmul.f32 %v5881_v3, %v5879_v5 }
0x1373   :  { %v4333_v12 = vrot.slane %v4331_v17, 6 }
0x1375   :  { %5081 = vrot.lane.b32.xlu1 %v4333_v12, %s6000_s25  ;;  %5234 = vmatmul.mubr.msk.f32.vlgmr.msra.gmra.mrb[48].mxu0 %vm70_vm0, %v4333_v12 }
0x1376   :  { %5235 = vmatmul.mubr.msk.f32.vlgmr.msra.gmra.mrb[48].mxu1 %vm70_vm0, %v4333_v12  ;;  %4513 = vmatpush1.msra.mxu0 %v6455_v39 }
0x1377   :  { %4576 = vmatprep.mubr.f32.mxu0 %v5997_v0  ;;  %4584 = vmatpush1.msra.mxu1 %v6459_v44 }
0x1378   :  { %4647 = vmatprep.mubr.f32.mxu1 %v5997_v0  ;;  %4701 = vmatprep.subr.mxu0 %v6449_v36 }
0x1379   :  { %4772 = vmatprep.subr.mxu1 %v6451_v37 }
0x1448   :  { %v4402_v28 = vpop.f32.mrb[48].mxu0 }
0x1449   :  { %v4478_v18 = vadd.f32 %v4402_v28, %v6489_v53  ;;  %v4473_v21 = vpop.f32.mrb[48].mxu1  ;;  %v4404_v55 = vpop.f32.mrb[49].mxu0 }
0x144a   :  { %v4479_v19 = vadd.f32 %v4404_v55, %v6493_v57  ;;  %v4475_v59 = vpop.f32.mrb[49].mxu1  ;;  %v4480_v26 = vadd.f32 %v4473_v21, %v6491_v24 }
0x144b   :  { %v5236_v22 = vmul.f32 -1.442695, %v4478_v18  ;;  %v4481_v23 = vadd.f32 %v4475_v59, %v6495_v51 }
0x144c   :  { %v5237_v60 = vmul.f32 -1.442695, %v4479_v19 }
0x144d   :  { %5882 = vpow2.f32 %v5236_v22  ;;  %v5238_v25 = vmul.f32 -1.442695, %v4481_v23 }
0x144e   :  { %5884 = vpow2.f32 %v5237_v60 }
0x144f   :  { %5886 = vpow2.f32 %v5238_v25 }
0x1450   :  { %5888 = vtanh.f32 %v4480_v26 }
0x1457   :  { %v5883_v27 = vpop.eup %5882 }
0x1458   :  { %v5885_v43 = vpop.eup %5884  ;;  %v4485_v30 = vadd.f32 1.0, %v5883_v27 }
0x1459   :  { %v4491_v38 = vadd.f32 1.0, %v5885_v43  ;;  %v5887_v1 = vpop.eup %5886 }
0x145a   :  { %5890 = vrcp.f32 %v4485_v30  ;;  %v5889_v33 = vpop.eup %5888  ;;  %v4498_v31 = vadd.f32 1.0, %v5887_v1 }
0x145b   :  { %5892 = vrcp.f32 %v4491_v38 }
0x145c   :  { %5894 = vrcp.f32 %v4498_v31 }
0x1464   :  { %v5891_v42 = vpop.eup %5890 }
0x1465   :  { %v5893_v13 = vpop.eup %5892  ;;  %v4505_v4 = vmul.f32 %v5891_v42, %v5889_v33 }
0x1466   :  { %v4504_v16 = vmul.f32 %v5893_v13, %v4502_v63  ;;  %v5895_v10 = vpop.eup %5894 }
0x1468   :  { %v4506_v2 = vadd.f32 %v4505_v4, %v4504_v16 }
0x146a   :  { %5896 = vtanh.f32 %v4506_v2  ;;  %v4690_v9 = vrot.slane %v4506_v2, 6 }
0x1474   :  { %v5897_v45 = vpop.eup %5896 }
0x1475   :  { %v4508_v6 = vmul.f32 %v5897_v45, %v5895_v10 }
0x1477   :  { %5084 = vrot.lane.b32.xlu1 %v4508_v6, %s6001_s26  ;;  %5239 = vmatmul.mubr.msk.f32.vlgmr.msra.gmra.mrb[50].mxu0 %vm70_vm0, %v4508_v6 }
0x1478   :  { %5240 = vmatmul.mubr.msk.f32.vlgmr.msra.gmra.mrb[50].mxu1 %vm70_vm0, %v4508_v6  ;;  %4702 = vmatpush1.msra.mxu0 %v6455_v39 }
0x1479   :  { %4765 = vmatprep.mubr.f32.mxu0 %v5997_v0  ;;  %4773 = vmatpush1.msra.mxu1 %v6459_v44 }
0x147a   :  { %4836 = vmatprep.mubr.f32.mxu1 %v5997_v0  ;;  %4890 = vmatprep.subr.mxu0 %v6449_v36 }
0x147b   :  { %4961 = vmatprep.subr.mxu1 %v6451_v37 }
0x154a   :  { %v4578_v14 = vpop.f32.mrb[50].mxu0 }
0x154b   :  { %v4658_v46 = vrot.slane %v4578_v14, 6  ;;  %v4649_v47 = vpop.f32.mrb[50].mxu1  ;;  %v4580_v11 = vpop.f32.mrb[51].mxu0 }
0x154c   :  { %v4659_v49 = vrot.slane %v4580_v11, 6  ;;  %v4651_v50 = vpop.f32.mrb[51].mxu1  ;;  %v4660_v36 = vrot.slane %v4649_v47, 6 }
0x154d   :  { %v4666_v48 = vadd.f32 %v4658_v46, %v6489_v53  ;;  %v4661_v58 = vrot.slane %v4651_v50, 6 }
0x154e   :  { %v4667_v35 = vadd.f32 %v4659_v49, %v6493_v57  ;;  %v4668_v37 = vadd.f32 %v4660_v36, %v6491_v24 }
0x154f   :  { %v5241_v40 = vmul.f32 -1.442695, %v4666_v48  ;;  %v4669_v15 = vadd.f32 %v4661_v58, %v6495_v51 }
0x1550   :  { %v5242_v54 = vmul.f32 -1.442695, %v4667_v35 }
0x1551   :  { %5898 = vpow2.f32 %v5241_v40  ;;  %v5243_v20 = vmul.f32 -1.442695, %v4669_v15 }
0x1552   :  { %5900 = vpow2.f32 %v5242_v54 }
0x1553   :  { %5902 = vpow2.f32 %v5243_v20 }
0x1554   :  { %5904 = vtanh.f32 %v4668_v37 }
0x155b   :  { %v5899_v34 = vpop.eup %5898 }
0x155c   :  { %v5901_v52 = vpop.eup %5900  ;;  %v4673_v32 = vadd.f32 1.0, %v5899_v34 }
0x155d   :  { %v4679_v62 = vadd.f32 1.0, %v5901_v52  ;;  %v5903_v8 = vpop.eup %5902 }
0x155e   :  { %5906 = vrcp.f32 %v4673_v32  ;;  %v5905_v56 = vpop.eup %5904  ;;  %v4686_v5 = vadd.f32 1.0, %v5903_v8 }
0x155f   :  { %5908 = vrcp.f32 %v4679_v62 }
0x1560   :  { %5910 = vrcp.f32 %v4686_v5 }
0x1568   :  { %v5907_v7 = vpop.eup %5906 }
0x1569   :  { %v5909_v61 = vpop.eup %5908  ;;  %v4693_v41 = vmul.f32 %v5907_v7, %v5905_v56 }
0x156a   :  { %v4692_v3 = vmul.f32 %v5909_v61, %v4690_v9  ;;  %v5911_v12 = vpop.eup %5910 }
0x156c   :  { %v4694_v17 = vadd.f32 %v4693_v41, %v4692_v3 }
0x156e   :  { %5912 = vtanh.f32 %v4694_v17  ;;  %v4879_v16 = vrot.slane %v4694_v17, 6 }
0x1578   :  { %v5913_v28 = vpop.eup %5912 }
0x1579   :  { %v4696_v18 = vmul.f32 %v5913_v28, %v5911_v12 }
0x157b   :  { %v4698_v21 = vrot.slane %v4696_v18, 2 }
0x157d   :  { %5087 = vrot.lane.b32.xlu0 %v4698_v21, %s6002_s27  ;;  %5244 = vmatmul.mubr.msk.f32.vlgmr.msra.gmra.mrb[52].mxu0 %vm70_vm0, %v4698_v21 }
0x157e   :  { %5245 = vmatmul.mubr.msk.f32.vlgmr.msra.gmra.mrb[52].mxu1 %vm70_vm0, %v4698_v21  ;;  %4891 = vmatpush1.msra.mxu0 %v6455_v39 }
0x157f   :  { %4954 = vmatprep.mubr.f32.mxu0 %v5997_v0  ;;  %4962 = vmatpush1.msra.mxu1 %v6459_v44 }
0x1580   :  { %5025 = vmatprep.mubr.f32.mxu1 %v5997_v0 }
0x1650   :  { %v4767_v55 = vpop.f32.mrb[52].mxu0 }
0x1651   :  { %v4847_v19 = vrot.slane %v4767_v55, 4  ;;  %v4838_v59 = vpop.f32.mrb[52].mxu1  ;;  %v4769_v22 = vpop.f32.mrb[53].mxu0 }
0x1652   :  { %v4848_v60 = vrot.slane %v4769_v22, 4  ;;  %v4840_v23 = vpop.f32.mrb[53].mxu1  ;;  %v4849_v44 = vrot.slane %v4838_v59, 4  ;;  %v5082_v59 = vpop.permute.xlu1 %5081 }
0x1653   :  { %v4855_v25 = vadd.f32 %v4847_v19, %v6489_v53  ;;  %v4850_v30 = vrot.slane %v4840_v23, 4  ;;  %v5076_v19 = vpop.permute.xlu0 %5075 }
0x1654   :  { %v4856_v26 = vadd.f32 %v4848_v60, %v6493_v57  ;;  %v4857_v0 = vadd.f32 %v4849_v44, %v6491_v24  ;;  %v5099_v23 = vsel %vm5098_vm5, %v6509_v29, %v5076_v19 }
0x1655   :  { %v5246_v27 = vmul.f32 -1.442695, %v4855_v25  ;;  %v4858_v39 = vadd.f32 %v4850_v30, %v6495_v51 }
0x1656   :  { %v5247_v43 = vmul.f32 -1.442695, %v4856_v26  ;;  %v5085_v60 = vpop.permute.xlu1 %5084 }
0x1657   :  { %5914 = vpow2.f32 %v5246_v27  ;;  %v5248_v38 = vmul.f32 -1.442695, %v4858_v39  ;;  %v5079_v22 = vpop.permute.xlu0 %5078 }
0x1658   :  { %5916 = vpow2.f32 %v5247_v43  ;;  %v5100_v25 = vsel %vm70_vm0, %v5099_v23, %v5079_v22 }
0x1659   :  { %5918 = vpow2.f32 %v5248_v38  ;;  %v5102_v27 = vsel %vm5101_vm6, %v5100_v25, %v5082_v59 }
0x165a   :  { %5920 = vtanh.f32 %v4857_v0  ;;  %v5104_v30 = vsel %vm5103_vm7, %v5102_v27, %v5085_v60 }
0x165b   :  { %v5088_v26 = vpop.permute.xlu0 %5087 }
0x165c   :  { %v5106_v39 = vsel %vm5105_vm8, %v5104_v30, %v5088_v26 }
0x1661   :  { %v5915_v1 = vpop.eup %5914 }
0x1662   :  { %v5917_v33 = vpop.eup %5916  ;;  %v4862_v42 = vadd.f32 1.0, %v5915_v1 }
0x1663   :  { %v4868_v63 = vadd.f32 1.0, %v5917_v33  ;;  %v5919_v13 = vpop.eup %5918 }
0x1664   :  { %5922 = vrcp.f32 %v4862_v42  ;;  %v5921_v4 = vpop.eup %5920  ;;  %v4875_v45 = vadd.f32 1.0, %v5919_v13 }
0x1665   :  { %5924 = vrcp.f32 %v4868_v63 }
0x1666   :  { %5926 = vrcp.f32 %v4875_v45 }
0x166e   :  { %v5923_v31 = vpop.eup %5922 }
0x166f   :  { %v5925_v2 = vpop.eup %5924  ;;  %v4882_v10 = vmul.f32 %v5923_v31, %v5921_v4 }
0x1670   :  { %v4881_v6 = vmul.f32 %v5925_v2, %v4879_v16  ;;  %v5927_v46 = vpop.eup %5926 }
0x1672   :  { %v4883_v14 = vadd.f32 %v4882_v10, %v4881_v6 }
0x1674   :  { %5928 = vtanh.f32 %v4883_v14  ;;  %v5068_v5 = vrot.slane %v4883_v14, 6 }
0x167e   :  { %v5929_v47 = vpop.eup %5928 }
0x167f   :  { %v4885_v11 = vmul.f32 %v5929_v47, %v5927_v46 }
0x1681   :  { %v4887_v49 = vrot.slane %v4885_v11, 4 }
0x1683   :  { %5090 = vrot.lane.b32.xlu1 %v4887_v49, %s6003_s28  ;;  %5249 = vmatmul.mubr.msk.f32.vlgmr.msra.gmra.mrb[54].mxu0 %vm70_vm0, %v4887_v49 }
0x1684   :  { %5250 = vmatmul.mubr.msk.f32.vlgmr.msra.gmra.mrb[54].mxu1 %vm70_vm0, %v4887_v49 }
0x16f5   :  { %v5091_v43 = vpop.permute.xlu1 %5090 }
0x16f6   :  { %v5108_v44 = vsel %vm5107_vm9, %v5106_v39, %v5091_v43 }
0x1756   :  { %v4956_v50 = vpop.f32.mrb[54].mxu0 }
0x1757   :  { %v5036_v48 = vrot.slane %v4956_v50, 2  ;;  %v5027_v35 = vpop.f32.mrb[54].mxu1  ;;  %v4958_v40 = vpop.f32.mrb[55].mxu0 }
0x1758   :  { %v5037_v54 = vrot.slane %v4958_v40, 2  ;;  %v5029_v58 = vpop.f32.mrb[55].mxu1  ;;  %v5038_v32 = vrot.slane %v5027_v35, 2 }
0x1759   :  { %v5044_v15 = vadd.f32 %v5036_v48, %v6489_v53  ;;  %v5039_v34 = vrot.slane %v5029_v58, 2 }
0x175a   :  { %v5045_v36 = vadd.f32 %v5037_v54, %v6493_v57  ;;  %v5046_v8 = vadd.f32 %v5038_v32, %v6491_v24 }
0x175b   :  { %v5251_v20 = vmul.f32 -1.442695, %v5044_v15  ;;  %v5047_v52 = vadd.f32 %v5039_v34, %v6495_v51 }
0x175c   :  { %v5252_v37 = vmul.f32 -1.442695, %v5045_v36 }
0x175d   :  { %5930 = vpow2.f32 %v5251_v20  ;;  %v5253_v62 = vmul.f32 -1.442695, %v5047_v52 }
0x175e   :  { %5932 = vpow2.f32 %v5252_v37 }
0x175f   :  { %5934 = vpow2.f32 %v5253_v62 }
0x1760   :  { %5936 = vtanh.f32 %v5046_v8 }
0x1767   :  { %v5931_v56 = vpop.eup %5930 }
0x1768   :  { %v5933_v7 = vpop.eup %5932  ;;  %v5051_v9 = vadd.f32 1.0, %v5931_v56 }
0x1769   :  { %v5057_v61 = vadd.f32 1.0, %v5933_v7  ;;  %v5935_v53 = vpop.eup %5934 }
0x176a   :  { %5938 = vrcp.f32 %v5051_v9  ;;  %v5937_v57 = vpop.eup %5936  ;;  %v5064_v12 = vadd.f32 1.0, %v5935_v53 }
0x176b   :  { %5940 = vrcp.f32 %v5057_v61 }
0x176c   :  { %5942 = vrcp.f32 %v5064_v12 }
0x1774   :  { %v5939_v41 = vpop.eup %5938 }
0x1775   :  { %v5941_v3 = vpop.eup %5940  ;;  %v5071_v17 = vmul.f32 %v5939_v41, %v5937_v57 }
0x1776   :  { %v5070_v51 = vmul.f32 %v5941_v3, %v5068_v5  ;;  %v5943_v24 = vpop.eup %5942 }
0x1778   :  { %v5072_v28 = vadd.f32 %v5071_v17, %v5070_v51 }
0x177a   :  { %5944 = vtanh.f32 %v5072_v28 }
0x1784   :  { %v5945_v18 = vpop.eup %5944 }
0x1785   :  { %v5074_v21 = vmul.f32 %v5945_v18, %v5943_v24 }
0x1787   :  { %v5094_v55 = vrot.slane %v5074_v21, 6 }
0x1789   :  { %5095 = vrot.lane.b32.xlu0 %v5094_v55, %s6004_s29 }
0x17fb   :  { %v5096_v38 = vpop.permute.xlu0 %5095 }
0x17fc   :  { %v5110_v0 = vsel %vm5109_vm10, %v5108_v44, %v5096_v38 }
0x17fd   :  { %5112 = vst.msk [vmem:[#allocation5] sm:$0x3] %vm5111_vm11, %v5110_v0 }
0x17fe   :  { %5979 = shalt.err (!%p5976_p12)
}
0x17ff   :  { %s5980_s7 = scalar_lea.hbm %s6605_s2, 32 }
0x1800   :  { %p5981_p13 = scmp.ne.s32.totalorder %s6605_s2, %s5980_s7  ;;  %p5984_p0 = scmp.lt.u32.totalorder %s5980_s7, %s6605_s2 }
0x1802   :  { %p5986_p1 = pnand %p5984_p0, %p5981_p13 }
0x1804   :  { %5989 = shalt.err (!%p5986_p1)
}
0x1805   :  { %5122 = dma.vmem_to_hbm [thread:$0]  %s5120_s3, 32, %s6605_s2, [#allocation4]  }
0x1806   :  { %5992 = dma.done.wait [#allocation4], 32  }
0x1807   :  { %5993 = vsyncadd [#allocation4], 4294967264 }
0x1808   :  { %5126 = vsyncpa [#allocation3], 1 }
0x1809   :  { %5127 = vsyncpa [#allocation4], 1 }

</bundles_post_ra>
